<compile_context>
chip_gen: v6e
topology: v6e:2x2x1
jax: 0.10.0
libtpu: 0.0.40
codegen_flags: <defaults>
</compile_context>

<pallas_src>
import functools

import jax
import jax.numpy as jnp
import numpy as np
from jax import lax
from jax.experimental import pallas as pl
from jax.experimental.pallas import tpu as pltpu

C1 = 12          # hidden channels of first conv
C_OUT = 24       # c_out of AnnEncoder
KH = KW = 3      # 3x3 convolutions, padding=1
LANE = 128


def ann_encoder_kernel(x_ref, mask_ref, w1_ref, b1_ref, w2_ref, b2_ref, o_ref,
                       *, n_items, wp, pp_pad):
    """Single-invocation kernel (grid=(1,)).

    Lane axis layout: [annotation, padded-row, padded-col] flattened, with each
    annotation's padded plane strided by pp_pad (a multiple of 128).

    x_ref    : (1, L)        bf16  zero-padded inputs, L = n_items * pp_pad
    mask_ref : (1, L)        bf16  1.0 on interior pixels, 0.0 on halo/lane-pad
    w1_ref   : (9, c1, 1)    f32   conv1 weights, tap-major (k = dy*3+dx)
    b1_ref   : (c1, 1)       f32
    w2_ref   : (9, c2, c1)   bf16  conv2 weights, tap-major
    b2_ref   : (c2, 1)       f32
    o_ref    : (c2, pp_pad)  f32   mean over annotations on the padded plane
    """
    length = n_items * pp_pad
    # Lane offset of 3x3 tap (dy, dx) on the flattened padded plane.
    offs = [(dy - 1) * wp + (dx - 1) for dy in range(KH) for dx in range(KW)]

    def tap(v, off):
        # v[:, i + off] with circular wrap. Wrapped / cross-annotation lanes only
        # ever contaminate halo or lane-pad output positions, which are masked
        # (h1) or discarded by the wrapper (h2).
        return v if off == 0 else pltpu.roll(v, (-off) % length, axis=1)

    # ---- conv1 (1 -> c1): weighted sum of 9 shifted input copies (pure VPU) ---
    xf = x_ref[...].astype(jnp.float32)                           # (1, L) f32
    acc1 = None
    for k in range(KH * KW):
        term = w1_ref[k] * tap(xf, offs[k])                       # (c1,1)*(1,L)
        acc1 = term if acc1 is None else acc1 + term
    h1 = jnp.maximum(acc1 + b1_ref[...], 0.0)
    # Zero the 1-px halo ring (and lane padding): it *is* conv2's zero padding.
    h1 = h1 * mask_ref[...].astype(jnp.float32)                   # (c1, L) f32

    # ---- conv2 (c1 -> c2): 9 accumulated MXU matmuls over shifted h1 ----------
    # (rolls stay in f32 for lowering safety; operands cast to bf16 per tap,
    #  f32 accumulation on the MXU — MXU has huge slack at these sizes).
    acc2 = None
    for k in range(KH * KW):
        t = tap(h1, offs[k]).astype(jnp.bfloat16)                 # (c1, L) bf16
        p = jnp.dot(w2_ref[k], t, preferred_element_type=jnp.float32)
        acc2 = p if acc2 is None else acc2 + p
    h2 = jnp.maximum(acc2 + b2_ref[...], 0.0)                     # (c2, L) f32

    # ---- mean over annotations: lane-aligned slice adds (pp_pad % 128 == 0) ---
    acc = h2[:, 0:pp_pad]
    for m in range(1, n_items):
        acc = acc + h2[:, m * pp_pad:(m + 1) * pp_pad]
    o_ref[...] = acc * (1.0 / n_items)


def ann_encoder(y_list, w1_oihw, b1, w2_oihw, b2):
    """Pallas implementation of AnnEncoder.forward.

    y_list: list of (1, H, W) single-channel annotations (PyTorch CHW layout).
    Returns (1, c_out, H, W) float32, like torch.stack(feats).mean(0).
    """
    if len(y_list) == 0:
        return None
    n = len(y_list)
    H, W = y_list[0].shape[-2:]
    c1 = w1_oihw.shape[0]
    c2 = w2_oihw.shape[0]
    Hp, Wp = H + 2, W + 2
    Pp = Hp * Wp
    Pp_pad = ((Pp + LANE - 1) // LANE) * LANE       # lane-aligned plane stride
    L = n * Pp_pad

    # ---- input: zero-pad by 1 px, flatten rows, pad each plane to Pp_pad lanes.
    x = jnp.stack([y.astype(jnp.float32).reshape(H, W) for y in y_list])
    xp = jnp.pad(x, ((0, 0), (1, 1), (1, 1)))                     # (n, Hp, Wp)
    xflat = jnp.pad(xp.reshape(n, Pp), ((0, 0), (0, Pp_pad - Pp)))
    x_in = xflat.reshape(1, L).astype(jnp.bfloat16)

    # interior mask: host-side numpy constant (no XLA ops); zero on the 1-px
    # halo ring and on the lane-padding zone of every annotation plane.
    rows = np.arange(Hp)
    cols = np.arange(Wp)
    m2d = ((rows[:, None] >= 1) & (rows[:, None] <= H) &
           (cols[None, :] >= 1) & (cols[None, :] <= W)).astype(np.float32)
    mplane = np.zeros((Pp_pad,), np.float32)
    mplane[:Pp] = m2d.reshape(-1)
    mask = jnp.asarray(np.tile(mplane, n).reshape(1, L), dtype=jnp.bfloat16)

    # weights, tap-major so the kernel loads one full per-tap slab per step.
    w1m = jnp.transpose(w1_oihw.reshape(c1, KH * KW), (1, 0)).reshape(
        KH * KW, c1, 1).astype(jnp.float32)                        # (9, c1, 1)
    w2m = jnp.transpose(w2_oihw, (2, 3, 0, 1)).reshape(
        KH * KW, c2, c1).astype(jnp.bfloat16)                      # (9, c2, c1)
    b1c = b1.reshape(c1, 1).astype(jnp.float32)
    b2c = b2.reshape(c2, 1).astype(jnp.float32)

    kernel = functools.partial(ann_encoder_kernel, n_items=n, wp=Wp,
                               pp_pad=Pp_pad)

    out_pad = pl.pallas_call(
        kernel,
        out_shape=jax.ShapeDtypeStruct((c2, Pp_pad), jnp.float32),
        grid_spec=pltpu.PrefetchScalarGridSpec(
            num_scalar_prefetch=0,
            grid=(1,),
            in_specs=[
                pl.BlockSpec((1, L), lambda i: (0, 0)),
                pl.BlockSpec((1, L), lambda i: (0, 0)),
                pl.BlockSpec((KH * KW, c1, 1), lambda i: (0, 0, 0)),
                pl.BlockSpec((c1, 1), lambda i: (0, 0)),
                pl.BlockSpec((KH * KW, c2, c1), lambda i: (0, 0, 0)),
                pl.BlockSpec((c2, 1), lambda i: (0, 0)),
            ],
            out_specs=pl.BlockSpec((c2, Pp_pad), lambda i: (0, 0)),
        ),
        compiler_params=pltpu.CompilerParams(
            dimension_semantics=("arbitrary",)),
    )(x_in, mask, w1m, b1c, w2m, b2c)

    # Kernel output is channel-major (NCHW-ordered) on the padded plane: drop
    # the lane padding and the 1-px halo ring, add the leading batch dim.
    out = out_pad[:, :Pp].reshape(c2, Hp, Wp)[:, 1:H + 1, 1:W + 1]
    return out.reshape(1, c2, H, W)


def ann_encoder_reference(y_list, w1_oihw, b1, w2_oihw, b2):
    """Pure-JAX reference mirroring the PyTorch forward exactly (NCHW, f32)."""
    dn = ("NCHW", "OIHW", "NCHW")
    feats = []
    for y in y_list:
        h = lax.conv_general_dilated(y[None], w1_oihw, (1, 1), "SAME",
                                     dimension_numbers=dn,
                                     precision=lax.Precision.HIGHEST)
        h = jnp.maximum(h + b1[None, :, None, None], 0.0)
        h = lax.conv_general_dilated(h, w2_oihw, (1, 1), "SAME",
                                     dimension_numbers=dn,
                                     precision=lax.Precision.HIGHEST)
        h = jnp.maximum(h + b2[None, :, None, None], 0.0)
        feats.append(h)
    return jnp.stack(feats).mean(0)


if __name__ == "__main__":
    H = W = 16
    N_ANN = 3

    key = jax.random.PRNGKey(0)
    k1, k2, k3, k4, kx = jax.random.split(key, 5)

    # Deterministic parameter init (PyTorch Conv2d default-style uniform bounds).
    bound1 = 1.0 / np.sqrt(1 * KH * KW)
    bound2 = 1.0 / np.sqrt(C1 * KH * KW)
    w1 = jax.random.uniform(k1, (C1, 1, KH, KW), jnp.float32, -bound1, bound1)
    b1 = jax.random.uniform(k2, (C1,), jnp.float32, -bound1, bound1)
    w2 = jax.random.uniform(k3, (C_OUT, C1, KH, KW), jnp.float32, -bound2, bound2)
    b2 = jax.random.uniform(k4, (C_OUT,), jnp.float32, -bound2, bound2)

    # y_list: list of single-channel annotations, each (1, H, W) as in PyTorch.
    ykeys = jax.random.split(kx, N_ANN)
    y_list = [jax.random.normal(k, (1, H, W), jnp.float32) for k in ykeys]

    # Snap inputs / conv2 weights to bf16-representable values so the f32
    # reference and the bf16-operand MXU path see identical operands; the only
    # remaining difference is the bf16 cast of the conv1 activations (~1e-3).
    q = lambda a: a.astype(jnp.bfloat16).astype(jnp.float32)
    w1, w2 = q(w1), q(w2)
    y_list = [q(y) for y in y_list]

    out = ann_encoder(y_list, w1, b1, w2, b2)
    out = jax.block_until_ready(out)

    ref = ann_encoder_reference(y_list, w1, b1, w2, b2)
    ref = jax.block_until_ready(ref)

    assert out.shape == (1, C_OUT, H, W), out.shape
    max_err = float(jnp.max(jnp.abs(out - ref)))
    assert max_err < 2e-2, f"max abs error {max_err}"

    print("KERNEL_OK")
</pallas_src>

<mosaic_0001>
module attributes {stable_mosaic.version = 11 : i64} {
  func.func @ann_encoder_kernel(%arg0: i32, %arg1: memref<1x1152xbf16, #tpu.memory_space<vmem>>, %arg2: memref<1x1152xbf16, #tpu.memory_space<vmem>>, %arg3: memref<9x12x1xf32, #tpu.memory_space<vmem>>, %arg4: memref<12x1xf32, #tpu.memory_space<vmem>>, %arg5: memref<9x24x12xbf16, #tpu.memory_space<vmem>>, %arg6: memref<24x1xf32, #tpu.memory_space<vmem>>, %arg7: memref<24x384xf32, #tpu.memory_space<vmem>>) attributes {dimension_semantics = [#tpu.dimension_semantics<arbitrary>], iteration_bounds = array<i64: 1>, scalar_prefetch = 0 : i64, scratch_operands = 0 : i64, tpu.core_type = #tpu.core_type<tc>, window_params = [{pipeline_mode = #tpu.pipeline_mode<synchronous>, transform_indices = @transform_0, window_bounds = array<i64: 1, 1152>}, {pipeline_mode = #tpu.pipeline_mode<synchronous>, transform_indices = @transform_1, window_bounds = array<i64: 1, 1152>}, {pipeline_mode = #tpu.pipeline_mode<synchronous>, transform_indices = @transform_2, window_bounds = array<i64: 9, 12, 1>}, {pipeline_mode = #tpu.pipeline_mode<synchronous>, transform_indices = @transform_3, window_bounds = array<i64: 12, 1>}, {pipeline_mode = #tpu.pipeline_mode<synchronous>, transform_indices = @transform_4, window_bounds = array<i64: 9, 24, 12>}, {pipeline_mode = #tpu.pipeline_mode<synchronous>, transform_indices = @transform_5, window_bounds = array<i64: 24, 1>}, {pipeline_mode = #tpu.pipeline_mode<synchronous>, transform_indices = @transform_6, window_bounds = array<i64: 24, 384>}]} {
    %c0 = arith.constant 0 : index
    %c0_0 = arith.constant 0 : index
    %0 = vector.load %arg1[%c0, %c0_0] : memref<1x1152xbf16, #tpu.memory_space<vmem>>, vector<1x1152xbf16>
    %1 = arith.extf %0 : vector<1x1152xbf16> to vector<1x1152xf32>
    %c0_1 = arith.constant 0 : index
    %c0_2 = arith.constant 0 : index
    %c0_3 = arith.constant 0 : index
    %2 = vector.load %arg3[%c0_1, %c0_2, %c0_3] : memref<9x12x1xf32, #tpu.memory_space<vmem>>, vector<1x12x1xf32>
    %3 = vector.shape_cast %2 : vector<1x12x1xf32> to vector<12x1xf32>
    %c19_i32 = arith.constant 19 : i32
    %4 = tpu.dynamic_rotate %1 by %c19_i32 dim 1 : vector<1x1152xf32>, i32 -> vector<1x1152xf32>
    %5 = vector.broadcast %3 : vector<12x1xf32> to vector<12x1152xf32>
    %6 = vector.broadcast %4 : vector<1x1152xf32> to vector<12x1152xf32>
    %7 = arith.mulf %5, %6 : vector<12x1152xf32>
    %c1 = arith.constant 1 : index
    %c0_4 = arith.constant 0 : index
    %c0_5 = arith.constant 0 : index
    %8 = vector.load %arg3[%c1, %c0_4, %c0_5] : memref<9x12x1xf32, #tpu.memory_space<vmem>>, vector<1x12x1xf32>
    %9 = vector.shape_cast %8 : vector<1x12x1xf32> to vector<12x1xf32>
    %c18_i32 = arith.constant 18 : i32
    %10 = tpu.dynamic_rotate %1 by %c18_i32 dim 1 : vector<1x1152xf32>, i32 -> vector<1x1152xf32>
    %11 = vector.broadcast %9 : vector<12x1xf32> to vector<12x1152xf32>
    %12 = vector.broadcast %10 : vector<1x1152xf32> to vector<12x1152xf32>
    %13 = arith.mulf %11, %12 : vector<12x1152xf32>
    %14 = arith.addf %7, %13 : vector<12x1152xf32>
    %c2 = arith.constant 2 : index
    %c0_6 = arith.constant 0 : index
    %c0_7 = arith.constant 0 : index
    %15 = vector.load %arg3[%c2, %c0_6, %c0_7] : memref<9x12x1xf32, #tpu.memory_space<vmem>>, vector<1x12x1xf32>
    %16 = vector.shape_cast %15 : vector<1x12x1xf32> to vector<12x1xf32>
    %c17_i32 = arith.constant 17 : i32
    %17 = tpu.dynamic_rotate %1 by %c17_i32 dim 1 : vector<1x1152xf32>, i32 -> vector<1x1152xf32>
    %18 = vector.broadcast %16 : vector<12x1xf32> to vector<12x1152xf32>
    %19 = vector.broadcast %17 : vector<1x1152xf32> to vector<12x1152xf32>
    %20 = arith.mulf %18, %19 : vector<12x1152xf32>
    %21 = arith.addf %14, %20 : vector<12x1152xf32>
    %c3 = arith.constant 3 : index
    %c0_8 = arith.constant 0 : index
    %c0_9 = arith.constant 0 : index
    %22 = vector.load %arg3[%c3, %c0_8, %c0_9] : memref<9x12x1xf32, #tpu.memory_space<vmem>>, vector<1x12x1xf32>
    %23 = vector.shape_cast %22 : vector<1x12x1xf32> to vector<12x1xf32>
    %c1_i32 = arith.constant 1 : i32
    %24 = tpu.dynamic_rotate %1 by %c1_i32 dim 1 : vector<1x1152xf32>, i32 -> vector<1x1152xf32>
    %25 = vector.broadcast %23 : vector<12x1xf32> to vector<12x1152xf32>
    %26 = vector.broadcast %24 : vector<1x1152xf32> to vector<12x1152xf32>
    %27 = arith.mulf %25, %26 : vector<12x1152xf32>
    %28 = arith.addf %21, %27 : vector<12x1152xf32>
    %c4 = arith.constant 4 : index
    %c0_10 = arith.constant 0 : index
    %c0_11 = arith.constant 0 : index
    %29 = vector.load %arg3[%c4, %c0_10, %c0_11] : memref<9x12x1xf32, #tpu.memory_space<vmem>>, vector<1x12x1xf32>
    %30 = vector.shape_cast %29 : vector<1x12x1xf32> to vector<12x1xf32>
    %31 = vector.broadcast %30 : vector<12x1xf32> to vector<12x1152xf32>
    %32 = vector.broadcast %1 : vector<1x1152xf32> to vector<12x1152xf32>
    %33 = arith.mulf %31, %32 : vector<12x1152xf32>
    %34 = arith.addf %28, %33 : vector<12x1152xf32>
    %c5 = arith.constant 5 : index
    %c0_12 = arith.constant 0 : index
    %c0_13 = arith.constant 0 : index
    %35 = vector.load %arg3[%c5, %c0_12, %c0_13] : memref<9x12x1xf32, #tpu.memory_space<vmem>>, vector<1x12x1xf32>
    %36 = vector.shape_cast %35 : vector<1x12x1xf32> to vector<12x1xf32>
    %c1151_i32 = arith.constant 1151 : i32
    %37 = tpu.dynamic_rotate %1 by %c1151_i32 dim 1 : vector<1x1152xf32>, i32 -> vector<1x1152xf32>
    %38 = vector.broadcast %36 : vector<12x1xf32> to vector<12x1152xf32>
    %39 = vector.broadcast %37 : vector<1x1152xf32> to vector<12x1152xf32>
    %40 = arith.mulf %38, %39 : vector<12x1152xf32>
    %41 = arith.addf %34, %40 : vector<12x1152xf32>
    %c6 = arith.constant 6 : index
    %c0_14 = arith.constant 0 : index
    %c0_15 = arith.constant 0 : index
    %42 = vector.load %arg3[%c6, %c0_14, %c0_15] : memref<9x12x1xf32, #tpu.memory_space<vmem>>, vector<1x12x1xf32>
    %43 = vector.shape_cast %42 : vector<1x12x1xf32> to vector<12x1xf32>
    %c1135_i32 = arith.constant 1135 : i32
    %44 = tpu.dynamic_rotate %1 by %c1135_i32 dim 1 : vector<1x1152xf32>, i32 -> vector<1x1152xf32>
    %45 = vector.broadcast %43 : vector<12x1xf32> to vector<12x1152xf32>
    %46 = vector.broadcast %44 : vector<1x1152xf32> to vector<12x1152xf32>
    %47 = arith.mulf %45, %46 : vector<12x1152xf32>
    %48 = arith.addf %41, %47 : vector<12x1152xf32>
    %c7 = arith.constant 7 : index
    %c0_16 = arith.constant 0 : index
    %c0_17 = arith.constant 0 : index
    %49 = vector.load %arg3[%c7, %c0_16, %c0_17] : memref<9x12x1xf32, #tpu.memory_space<vmem>>, vector<1x12x1xf32>
    %50 = vector.shape_cast %49 : vector<1x12x1xf32> to vector<12x1xf32>
    %c1134_i32 = arith.constant 1134 : i32
    %51 = tpu.dynamic_rotate %1 by %c1134_i32 dim 1 : vector<1x1152xf32>, i32 -> vector<1x1152xf32>
    %52 = vector.broadcast %50 : vector<12x1xf32> to vector<12x1152xf32>
    %53 = vector.broadcast %51 : vector<1x1152xf32> to vector<12x1152xf32>
    %54 = arith.mulf %52, %53 : vector<12x1152xf32>
    %55 = arith.addf %48, %54 : vector<12x1152xf32>
    %c8 = arith.constant 8 : index
    %c0_18 = arith.constant 0 : index
    %c0_19 = arith.constant 0 : index
    %56 = vector.load %arg3[%c8, %c0_18, %c0_19] : memref<9x12x1xf32, #tpu.memory_space<vmem>>, vector<1x12x1xf32>
    %57 = vector.shape_cast %56 : vector<1x12x1xf32> to vector<12x1xf32>
    %c1133_i32 = arith.constant 1133 : i32
    %58 = tpu.dynamic_rotate %1 by %c1133_i32 dim 1 : vector<1x1152xf32>, i32 -> vector<1x1152xf32>
    %59 = vector.broadcast %57 : vector<12x1xf32> to vector<12x1152xf32>
    %60 = vector.broadcast %58 : vector<1x1152xf32> to vector<12x1152xf32>
    %61 = arith.mulf %59, %60 : vector<12x1152xf32>
    %62 = arith.addf %55, %61 : vector<12x1152xf32>
    %c0_20 = arith.constant 0 : index
    %c0_21 = arith.constant 0 : index
    %63 = vector.load %arg4[%c0_20, %c0_21] : memref<12x1xf32, #tpu.memory_space<vmem>>, vector<12x1xf32>
    %64 = vector.broadcast %63 : vector<12x1xf32> to vector<12x1152xf32>
    %65 = arith.addf %62, %64 : vector<12x1152xf32>
    %cst = arith.constant 0.000000e+00 : f32
    %66 = vector.broadcast %cst : f32 to vector<12x1152xf32>
    %67 = arith.maximumf %65, %66 : vector<12x1152xf32>
    %c0_22 = arith.constant 0 : index
    %c0_23 = arith.constant 0 : index
    %68 = vector.load %arg2[%c0_22, %c0_23] : memref<1x1152xbf16, #tpu.memory_space<vmem>>, vector<1x1152xbf16>
    %69 = arith.extf %68 : vector<1x1152xbf16> to vector<1x1152xf32>
    %70 = vector.broadcast %69 : vector<1x1152xf32> to vector<12x1152xf32>
    %71 = arith.mulf %67, %70 : vector<12x1152xf32>
    %c19_i32_24 = arith.constant 19 : i32
    %72 = tpu.dynamic_rotate %71 by %c19_i32_24 dim 1 : vector<12x1152xf32>, i32 -> vector<12x1152xf32>
    %73 = arith.truncf %72 : vector<12x1152xf32> to vector<12x1152xbf16>
    %c0_25 = arith.constant 0 : index
    %c0_26 = arith.constant 0 : index
    %c0_27 = arith.constant 0 : index
    %74 = vector.load %arg5[%c0_25, %c0_26, %c0_27] : memref<9x24x12xbf16, #tpu.memory_space<vmem>>, vector<1x24x12xbf16>
    %75 = vector.shape_cast %74 : vector<1x24x12xbf16> to vector<24x12xbf16>
    %cst_28 = arith.constant dense<0.000000e+00> : vector<24x1152xf32>
    %76 = tpu.matmul %75, %73, %cst_28 {dimension_numbers = #tpu.dot_dimension_numbers<[1], [0], [0], [1], [0, 0, 1, 1], [], []>} : vector<24x12xbf16>, vector<12x1152xbf16>, vector<24x1152xf32> -> vector<24x1152xf32>
    %c18_i32_29 = arith.constant 18 : i32
    %77 = tpu.dynamic_rotate %71 by %c18_i32_29 dim 1 : vector<12x1152xf32>, i32 -> vector<12x1152xf32>
    %78 = arith.truncf %77 : vector<12x1152xf32> to vector<12x1152xbf16>
    %c1_30 = arith.constant 1 : index
    %c0_31 = arith.constant 0 : index
    %c0_32 = arith.constant 0 : index
    %79 = vector.load %arg5[%c1_30, %c0_31, %c0_32] : memref<9x24x12xbf16, #tpu.memory_space<vmem>>, vector<1x24x12xbf16>
    %80 = vector.shape_cast %79 : vector<1x24x12xbf16> to vector<24x12xbf16>
    %cst_33 = arith.constant dense<0.000000e+00> : vector<24x1152xf32>
    %81 = tpu.matmul %80, %78, %cst_33 {dimension_numbers = #tpu.dot_dimension_numbers<[1], [0], [0], [1], [0, 0, 1, 1], [], []>} : vector<24x12xbf16>, vector<12x1152xbf16>, vector<24x1152xf32> -> vector<24x1152xf32>
    %82 = arith.addf %76, %81 : vector<24x1152xf32>
    %c17_i32_34 = arith.constant 17 : i32
    %83 = tpu.dynamic_rotate %71 by %c17_i32_34 dim 1 : vector<12x1152xf32>, i32 -> vector<12x1152xf32>
    %84 = arith.truncf %83 : vector<12x1152xf32> to vector<12x1152xbf16>
    %c2_35 = arith.constant 2 : index
    %c0_36 = arith.constant 0 : index
    %c0_37 = arith.constant 0 : index
    %85 = vector.load %arg5[%c2_35, %c0_36, %c0_37] : memref<9x24x12xbf16, #tpu.memory_space<vmem>>, vector<1x24x12xbf16>
    %86 = vector.shape_cast %85 : vector<1x24x12xbf16> to vector<24x12xbf16>
    %cst_38 = arith.constant dense<0.000000e+00> : vector<24x1152xf32>
    %87 = tpu.matmul %86, %84, %cst_38 {dimension_numbers = #tpu.dot_dimension_numbers<[1], [0], [0], [1], [0, 0, 1, 1], [], []>} : vector<24x12xbf16>, vector<12x1152xbf16>, vector<24x1152xf32> -> vector<24x1152xf32>
    %88 = arith.addf %82, %87 : vector<24x1152xf32>
    %c1_i32_39 = arith.constant 1 : i32
    %89 = tpu.dynamic_rotate %71 by %c1_i32_39 dim 1 : vector<12x1152xf32>, i32 -> vector<12x1152xf32>
    %90 = arith.truncf %89 : vector<12x1152xf32> to vector<12x1152xbf16>
    %c3_40 = arith.constant 3 : index
    %c0_41 = arith.constant 0 : index
    %c0_42 = arith.constant 0 : index
    %91 = vector.load %arg5[%c3_40, %c0_41, %c0_42] : memref<9x24x12xbf16, #tpu.memory_space<vmem>>, vector<1x24x12xbf16>
    %92 = vector.shape_cast %91 : vector<1x24x12xbf16> to vector<24x12xbf16>
    %cst_43 = arith.constant dense<0.000000e+00> : vector<24x1152xf32>
    %93 = tpu.matmul %92, %90, %cst_43 {dimension_numbers = #tpu.dot_dimension_numbers<[1], [0], [0], [1], [0, 0, 1, 1], [], []>} : vector<24x12xbf16>, vector<12x1152xbf16>, vector<24x1152xf32> -> vector<24x1152xf32>
    %94 = arith.addf %88, %93 : vector<24x1152xf32>
    %95 = arith.truncf %71 : vector<12x1152xf32> to vector<12x1152xbf16>
    %c4_44 = arith.constant 4 : index
    %c0_45 = arith.constant 0 : index
    %c0_46 = arith.constant 0 : index
    %96 = vector.load %arg5[%c4_44, %c0_45, %c0_46] : memref<9x24x12xbf16, #tpu.memory_space<vmem>>, vector<1x24x12xbf16>
    %97 = vector.shape_cast %96 : vector<1x24x12xbf16> to vector<24x12xbf16>
    %cst_47 = arith.constant dense<0.000000e+00> : vector<24x1152xf32>
    %98 = tpu.matmul %97, %95, %cst_47 {dimension_numbers = #tpu.dot_dimension_numbers<[1], [0], [0], [1], [0, 0, 1, 1], [], []>} : vector<24x12xbf16>, vector<12x1152xbf16>, vector<24x1152xf32> -> vector<24x1152xf32>
    %99 = arith.addf %94, %98 : vector<24x1152xf32>
    %c1151_i32_48 = arith.constant 1151 : i32
    %100 = tpu.dynamic_rotate %71 by %c1151_i32_48 dim 1 : vector<12x1152xf32>, i32 -> vector<12x1152xf32>
    %101 = arith.truncf %100 : vector<12x1152xf32> to vector<12x1152xbf16>
    %c5_49 = arith.constant 5 : index
    %c0_50 = arith.constant 0 : index
    %c0_51 = arith.constant 0 : index
    %102 = vector.load %arg5[%c5_49, %c0_50, %c0_51] : memref<9x24x12xbf16, #tpu.memory_space<vmem>>, vector<1x24x12xbf16>
    %103 = vector.shape_cast %102 : vector<1x24x12xbf16> to vector<24x12xbf16>
    %cst_52 = arith.constant dense<0.000000e+00> : vector<24x1152xf32>
    %104 = tpu.matmul %103, %101, %cst_52 {dimension_numbers = #tpu.dot_dimension_numbers<[1], [0], [0], [1], [0, 0, 1, 1], [], []>} : vector<24x12xbf16>, vector<12x1152xbf16>, vector<24x1152xf32> -> vector<24x1152xf32>
    %105 = arith.addf %99, %104 : vector<24x1152xf32>
    %c1135_i32_53 = arith.constant 1135 : i32
    %106 = tpu.dynamic_rotate %71 by %c1135_i32_53 dim 1 : vector<12x1152xf32>, i32 -> vector<12x1152xf32>
    %107 = arith.truncf %106 : vector<12x1152xf32> to vector<12x1152xbf16>
    %c6_54 = arith.constant 6 : index
    %c0_55 = arith.constant 0 : index
    %c0_56 = arith.constant 0 : index
    %108 = vector.load %arg5[%c6_54, %c0_55, %c0_56] : memref<9x24x12xbf16, #tpu.memory_space<vmem>>, vector<1x24x12xbf16>
    %109 = vector.shape_cast %108 : vector<1x24x12xbf16> to vector<24x12xbf16>
    %cst_57 = arith.constant dense<0.000000e+00> : vector<24x1152xf32>
    %110 = tpu.matmul %109, %107, %cst_57 {dimension_numbers = #tpu.dot_dimension_numbers<[1], [0], [0], [1], [0, 0, 1, 1], [], []>} : vector<24x12xbf16>, vector<12x1152xbf16>, vector<24x1152xf32> -> vector<24x1152xf32>
    %111 = arith.addf %105, %110 : vector<24x1152xf32>
    %c1134_i32_58 = arith.constant 1134 : i32
    %112 = tpu.dynamic_rotate %71 by %c1134_i32_58 dim 1 : vector<12x1152xf32>, i32 -> vector<12x1152xf32>
    %113 = arith.truncf %112 : vector<12x1152xf32> to vector<12x1152xbf16>
    %c7_59 = arith.constant 7 : index
    %c0_60 = arith.constant 0 : index
    %c0_61 = arith.constant 0 : index
    %114 = vector.load %arg5[%c7_59, %c0_60, %c0_61] : memref<9x24x12xbf16, #tpu.memory_space<vmem>>, vector<1x24x12xbf16>
    %115 = vector.shape_cast %114 : vector<1x24x12xbf16> to vector<24x12xbf16>
    %cst_62 = arith.constant dense<0.000000e+00> : vector<24x1152xf32>
    %116 = tpu.matmul %115, %113, %cst_62 {dimension_numbers = #tpu.dot_dimension_numbers<[1], [0], [0], [1], [0, 0, 1, 1], [], []>} : vector<24x12xbf16>, vector<12x1152xbf16>, vector<24x1152xf32> -> vector<24x1152xf32>
    %117 = arith.addf %111, %116 : vector<24x1152xf32>
    %c1133_i32_63 = arith.constant 1133 : i32
    %118 = tpu.dynamic_rotate %71 by %c1133_i32_63 dim 1 : vector<12x1152xf32>, i32 -> vector<12x1152xf32>
    %119 = arith.truncf %118 : vector<12x1152xf32> to vector<12x1152xbf16>
    %c8_64 = arith.constant 8 : index
    %c0_65 = arith.constant 0 : index
    %c0_66 = arith.constant 0 : index
    %120 = vector.load %arg5[%c8_64, %c0_65, %c0_66] : memref<9x24x12xbf16, #tpu.memory_space<vmem>>, vector<1x24x12xbf16>
    %121 = vector.shape_cast %120 : vector<1x24x12xbf16> to vector<24x12xbf16>
    %cst_67 = arith.constant dense<0.000000e+00> : vector<24x1152xf32>
    %122 = tpu.matmul %121, %119, %cst_67 {dimension_numbers = #tpu.dot_dimension_numbers<[1], [0], [0], [1], [0, 0, 1, 1], [], []>} : vector<24x12xbf16>, vector<12x1152xbf16>, vector<24x1152xf32> -> vector<24x1152xf32>
    %123 = arith.addf %117, %122 : vector<24x1152xf32>
    %c0_68 = arith.constant 0 : index
    %c0_69 = arith.constant 0 : index
    %124 = vector.load %arg6[%c0_68, %c0_69] : memref<24x1xf32, #tpu.memory_space<vmem>>, vector<24x1xf32>
    %125 = vector.broadcast %124 : vector<24x1xf32> to vector<24x1152xf32>
    %126 = arith.addf %123, %125 : vector<24x1152xf32>
    %cst_70 = arith.constant 0.000000e+00 : f32
    %127 = vector.broadcast %cst_70 : f32 to vector<24x1152xf32>
    %128 = arith.maximumf %126, %127 : vector<24x1152xf32>
    %129 = vector.extract_strided_slice %128 {offsets = [0, 0], sizes = [24, 384], strides = [1, 1]} : vector<24x1152xf32> to vector<24x384xf32>
    %130 = vector.extract_strided_slice %128 {offsets = [0, 384], sizes = [24, 384], strides = [1, 1]} : vector<24x1152xf32> to vector<24x384xf32>
    %131 = arith.addf %129, %130 : vector<24x384xf32>
    %132 = vector.extract_strided_slice %128 {offsets = [0, 768], sizes = [24, 384], strides = [1, 1]} : vector<24x1152xf32> to vector<24x384xf32>
    %133 = arith.addf %131, %132 : vector<24x384xf32>
    %cst_71 = arith.constant 0.333333343 : f32
    %134 = vector.broadcast %cst_71 : f32 to vector<24x384xf32>
    %135 = arith.mulf %133, %134 : vector<24x384xf32>
    %c0_72 = arith.constant 0 : index
    %c0_73 = arith.constant 0 : index
    %136 = vector.load %arg7[%c0_72, %c0_73] : memref<24x384xf32, #tpu.memory_space<vmem>>, vector<24x384xf32>
    tpu.vector_store %arg7[%c0_72, %c0_73], %135 {strides = array<i32>} : memref<24x384xf32, #tpu.memory_space<vmem>>, vector<24x384xf32>,
    return
  }
  func.func @transform_0(%arg0: i32) -> (i32, i32) {
    %c0_i32 = arith.constant 0 : i32
    %c0_i32_0 = arith.constant 0 : i32
    %c0_i32_1 = arith.constant 0 : i32
    return %c0_i32, %c0_i32_0 : i32, i32
  }
  func.func @transform_1(%arg0: i32) -> (i32, i32) {
    %c0_i32 = arith.constant 0 : i32
    %c0_i32_0 = arith.constant 0 : i32
    %c0_i32_1 = arith.constant 0 : i32
    return %c0_i32, %c0_i32_0 : i32, i32
  }
  func.func @transform_2(%arg0: i32) -> (i32, i32, i32) {
    %c0_i32 = arith.constant 0 : i32
    %c0_i32_0 = arith.constant 0 : i32
    %c0_i32_1 = arith.constant 0 : i32
    %c0_i32_2 = arith.constant 0 : i32
    return %c0_i32, %c0_i32_0, %c0_i32_1 : i32, i32, i32
  }
  func.func @transform_3(%arg0: i32) -> (i32, i32) {
    %c0_i32 = arith.constant 0 : i32
    %c0_i32_0 = arith.constant 0 : i32
    %c0_i32_1 = arith.constant 0 : i32
    return %c0_i32, %c0_i32_0 : i32, i32
  }
  func.func @transform_4(%arg0: i32) -> (i32, i32, i32) {
    %c0_i32 = arith.constant 0 : i32
    %c0_i32_0 = arith.constant 0 : i32
    %c0_i32_1 = arith.constant 0 : i32
    %c0_i32_2 = arith.constant 0 : i32
    return %c0_i32, %c0_i32_0, %c0_i32_1 : i32, i32, i32
  }
  func.func @transform_5(%arg0: i32) -> (i32, i32) {
    %c0_i32 = arith.constant 0 : i32
    %c0_i32_0 = arith.constant 0 : i32
    %c0_i32_1 = arith.constant 0 : i32
    return %c0_i32, %c0_i32_0 : i32, i32
  }
  func.func @transform_6(%arg0: i32) -> (i32, i32) {
    %c0_i32 = arith.constant 0 : i32
    %c0_i32_0 = arith.constant 0 : i32
    %c0_i32_1 = arith.constant 0 : i32
    return %c0_i32, %c0_i32_0 : i32, i32
  }
}

</mosaic_0001>

<bundles_post_ra>
// kernel: tpu_custom_call.1
= control target key start
LH: loop header
LB: loop body
LE: loop exit
PB: predicated region body
PF: predicated region fallthrough
CT: control target
= control target key end

     0   :  { %v35_v2 = vlaneseq  ;;  %v8396_v3 = vmov 0   ;;  %s5555_s11 = smov 18   ;;  %s8389_s0 = inlined_call_operand.vmem [shape: bf16[1,1152], index: 0, kind: input, shape index: {}]   ;;  %s8390_s1 = inlined_call_operand.vmem [shape: bf16[1,1152], index: 1, kind: input, shape index: {}]   ;;  %s8391_s2 = inlined_call_operand.vmem [shape: f32[9,12,1], index: 2, kind: input, shape index: {}]   ;;  %s8392_s3 = inlined_call_operand.vmem [shape: f32[12,1], index: 3, kind: input, shape index: {}]   ;;  %s8393_s4 = inlined_call_operand.vmem [shape: bf16[9,24,12], index: 4, kind: input, shape index: {}]   ;;  %s8394_s5 = inlined_call_operand.vmem [shape: f32[24,1], index: 5, kind: input, shape index: {}]   ;;  %s8395_s6 = inlined_call_operand.hbm [shape: f32[24,384], index: 6, kind: output, shape index: {}]  }
   0x1   :  { %v4705_v0 = vld [vmem:[%s8391_s2 + $0x10] sm:$0xff]  ;;  %v30_v1 = vld [vmem:[%s8391_s2] sm:$0xff]  ;;  %4992 = vset.pattern.permute.xlu1 %v8396_v3  ;;  %4991 = vset.pattern.permute.xlu0 %v8396_v3  ;;  %v26_v5 = vld [vmem:[%s8389_s0 + $0x8] sm:$0x1] }
   0x2   :  { %v25_v4 = vld [vmem:[%s8389_s0] sm:$0xff]  ;;  %207 = vperm.xlu1 %4992, %v4705_v0   ;;  %112 = vperm.xlu0 %4991, %v30_v1   ;;  %v29_v7 = vunpack.c.l.bf16 %v26_v5  ;;  %v36_v8 = vshrl.u32 %v35_v2, 7  ;;  %v4706_v9 = vld [vmem:[%s8391_s2 + $0x18] sm:$0xf]  ;;  %v31_v10 = vld [vmem:[%s8391_s2 + $0x8] sm:$0xf] }
   0x3   :  { %v5614_v6 = vunpack.c.h.bf16 %v25_v4  ;;  %v27_v11 = vunpack.c.l.bf16 %v25_v4  ;;  %1413 = vmatprep.mubr.bf16.mxu0 %v8396_v3  ;;  %1464 = vmatprep.mubr.bf16.mxu1 %v8396_v3  ;;  %s5554_s0 = smov 19   ;;  %v4708_v21 = vld [vmem:[%s8391_s2 + $0x28] sm:$0xf]  ;;  %v4707_v22 = vld [vmem:[%s8391_s2 + $0x20] sm:$0xff] }
   0x4   :  { %v5625_v12 = vsub.s32 0, %v36_v8  ;;  %v5627_v13 = vsub.s32 6, %v36_v8  ;;  %v5639_v17 = vsub.s32 2, %v36_v8 }
   0x6   :  { %8465 = vst [vmem:[#allocation5_spill] sm:$0xff] %v5627_v13  ;;  %212 = vperm.xlu1 %4992, %v4706_v9   ;;  %117 = vperm.xlu0 %4991, %v31_v10   ;;  %v5631_v14 = vrot.slane %v5614_v6, %v5627_v13  ;;  %v5634_v15 = vrot.slane %v29_v7, %v5625_v12 }
   0x7   :  { %v5637_v16 = vrot.slane %v27_v11, %v5625_v12  ;;  %v5644_v19 = vrot.slane %v27_v11, %v5639_v17 }
   0x8   :  { %v4998_v18 = vpack.i.bf16 %v5634_v15, %v5631_v14 }
   0x9   :  { %v4993_v20 = vpack.i.bf16 %v5644_v19, %v5637_v16 }
   0xa   :  { %4999 = vrot.lane.b32.xlu1 %v4998_v18, %s5554_s0 }
   0xb   :  { %4994 = vrot.lane.b32.xlu0 %v4993_v20, %s5554_s0 }
   0xe   :  { %5009 = vrot.lane.b32.xlu1 %v4998_v18, %s5555_s11 }
   0xf   :  { %5004 = vrot.lane.b32.xlu0 %v4993_v20, %s5555_s11 }
  0x12   :  { %325 = vperm.xlu1 %4992, %v4708_v21  }
  0x13   :  { %11 = vsyncpa [#allocation3], 0  ;;  %320 = vperm.xlu0 %4991, %v4707_v22   ;;  %s5556_s14 = smov 17   ;;  %v4710_v23 = vld [vmem:[%s8391_s2 + $0x38] sm:$0xf]  ;;  %v4709_v24 = vld [vmem:[%s8391_s2 + $0x30] sm:$0xff]  ;;  %v5697_v34 = vrot.slane %v27_v11, %v5627_v13  ;;  %v5720_v40 = vrot.slane %v5614_v6, %v5625_v12  ;;  %v5724_v41 = vrot.slane %v5614_v6, %v5639_v17  ;;  %v5825_v7 = vrot.slane %v5637_v16, %v5625_v12 }
  0x14   :  { %s5557_s19 = smov 1   ;;  %v5667_v25 = vsub.s32 4, %v36_v8  ;;  %v4712_v26 = vld [vmem:[%s8391_s2 + $0x48] sm:$0xf]  ;;  %v4711_v27 = vld [vmem:[%s8391_s2 + $0x40] sm:$0xff]  ;;  %v4713_v30 = vld [vmem:[%s8391_s2 + $0x50] sm:$0xff] }
  0x15   :  { %v4714_v29 = vld [vmem:[%s8391_s2 + $0x58] sm:$0xf]  ;;  %s5558_s28 = smov 127   ;;  %v4716_v32 = vld [vmem:[%s8391_s2 + $0x68] sm:$0xf]  ;;  %v4715_v33 = vld [vmem:[%s8391_s2 + $0x60] sm:$0xff]  ;;  %v5088_v42 = vpack.i.bf16 %v5724_v41, %v5720_v40  ;;  %v5118_v45 = vpack.i.bf16 %v5720_v40, %v5697_v34  ;;  %v5851_v21 = vrot.slane %v5724_v41, %v5625_v12 }
  0x16   :  { %5019 = vrot.lane.b32.xlu1 %v4998_v18, %s5556_s14  ;;  %8466 = vst [vmem:[#allocation6_spill] sm:$0xff] %v5667_v25  ;;  %v5677_v28 = vrot.slane %v27_v11, %v5667_v25  ;;  %s5559_s9 = smov 111   ;;  %v4718_v35 = vld [vmem:[%s8391_s2 + $0x78] sm:$0xf]  ;;  %v4717_v36 = vld [vmem:[%s8391_s2 + $0x70] sm:$0xff]  ;;  %s5560_s16 = smov 110   ;;  %v5746_v46 = vrot.slane %v5614_v6, %v5667_v25  ;;  %v5821_v6 = vrot.slane %v5634_v15, %v5625_v12 }
  0x17   :  { %5014 = vrot.lane.b32.xlu0 %v4993_v20, %s5556_s14  ;;  %v4720_v38 = vld [vmem:[%s8391_s2 + $0x88] sm:$0xf]  ;;  %v4719_v39 = vld [vmem:[%s8391_s2 + $0x80] sm:$0xff]  ;;  %s5561_s22 = smov 109   ;;  %v5791_v56 = vand.u32 127, %v35_v2  ;;  %v5816_v2 = vrot.slane %v5644_v19, %v5625_v12  ;;  %v5835_v11 = vrot.slane %v5697_v34, %v5625_v12  ;;  %vm1353_vm8 = vcmask 1045504  }
  0x18   :  { %v5038_v31 = vpack.i.bf16 %v5634_v15, %v5677_v28  ;;  %v5058_v37 = vpack.i.bf16 %v5697_v34, %v5677_v28  ;;  %v1051_v43 = vld [vmem:[%s8392_s3 + $0x8] sm:$0xf]  ;;  %v1050_v44 = vld [vmem:[%s8392_s3] sm:$0xff]  ;;  %v5123_v47 = vpack.i.bf16 %v5746_v46, %v5724_v41  ;;  %v5829_v8 = vrot.slane %v5677_v28, %v5625_v12 }
  0x19   :  { %v5798_v58 = vld [vmem:[%s8390_s1] sm:$0xff]  ;;  %v1099_v59 = vld [vmem:[%s8390_s1 + $0x8] sm:$0x1]  ;;  %vm100_vm0 = vcmp.lt.s32.totalorder %v5791_v56, 19  ;;  %vm195_vm1 = vcmp.lt.s32.totalorder %v5791_v56, 18  ;;  %vm308_vm2 = vcmp.lt.s32.totalorder %v5791_v56, 17  ;;  %v5839_v15 = vrot.slane %v5720_v40, %v5625_v12 }
  0x1a   :  { %438 = vperm.xlu1 %4992, %v4710_v23   ;;  %v1100_v63 = vunpack.c.l.bf16 %v5798_v58  ;;  %v1102_v4 = vunpack.c.l.bf16 %v1099_v59  ;;  %vm421_vm3 = vcmp.lt.s32.totalorder %v5791_v56, 1  ;;  %v5885_v40 = vrot.slane %v5631_v14, %v5625_v12 }
  0x1b   :  { %433 = vperm.xlu0 %4991, %v4709_v24   ;;  %vm619_vm4 = vcmp.lt.s32.totalorder %v5791_v56, 127  ;;  %vm732_vm5 = vcmp.lt.s32.totalorder %v5791_v56, 111  ;;  %vm845_vm6 = vcmp.lt.s32.totalorder %v5791_v56, 110  ;;  %vm958_vm7 = vcmp.lt.s32.totalorder %v5791_v56, 109 }
  0x1c   :  { %v1109_v19 = vrot.slane %v1100_v63, %v5625_v12  ;;  %vm1346_vm9 = vcmask 97280  }
  0x1e   :  { %5029 = vrot.lane.b32.xlu1 %v4998_v18, %s5557_s19 }
  0x1f   :  { %5024 = vrot.lane.b32.xlu0 %v4993_v20, %s5557_s19 }
  0x22   :  { %523 = vperm.xlu1 %4992, %v4712_v26  }
  0x23   :  { %518 = vperm.xlu0 %4991, %v4711_v27   ;;  %v1141_v27 = vrot.slane %v1102_v4, %v5625_v12 }
  0x26   :  { %636 = vperm.xlu1 %4992, %v4714_v29   ;;  %v1117_v29 = vrot.slane %v1100_v63, %v5667_v25 }
  0x27   :  { %631 = vperm.xlu0 %4991, %v4713_v30   ;;  %v1121_v30 = vrot.slane %v1100_v63, %v5627_v13 }
  0x28   :  { %v5907_v59 = vrot.slane %v1117_v29, %v5625_v12 }
  0x29   :  { %v5916_v4 = vrot.slane %v1121_v30, %v5625_v12  ;;  %v5934_v30 = vunpack.c.h.bf16 %v5798_v58 }
  0x2a   :  { %5039 = vrot.lane.b32.xlu1 %v5038_v31, %s5558_s28  ;;  %8473 = vst [vmem:[#allocation13_spill] sm:$0xff] %v5907_v59 }
  0x2b   :  { %5034 = vrot.lane.b32.xlu0 %v4993_v20, %s5558_s28  ;;  %8474 = vst [vmem:[#allocation14_spill] sm:$0xff] %v5916_v4  ;;  %8475 = vst [vmem:[#allocation15_spill] sm:$0xff] %v5934_v30 }
  0x2e   :  { %749 = vperm.xlu1 %4992, %v4716_v32  }
  0x2f   :  { %744 = vperm.xlu0 %4991, %v4715_v33  }
  0x32   :  { %5049 = vrot.lane.b32.xlu1 %v5038_v31, %s5559_s9 }
  0x33   :  { %5044 = vrot.lane.b32.xlu0 %v4993_v20, %s5559_s9 }
  0x36   :  { %862 = vperm.xlu1 %4992, %v4718_v35  }
  0x37   :  { %857 = vperm.xlu0 %4991, %v4717_v36  }
  0x3a   :  { %5059 = vrot.lane.b32.xlu1 %v5058_v37, %s5555_s11 }
  0x3b   :  { %5054 = vrot.lane.b32.xlu0 %v5058_v37, %s5554_s0 }
  0x3e   :  { %5069 = vrot.lane.b32.xlu1 %v5038_v31, %s5560_s16 }
  0x3f   :  { %5064 = vrot.lane.b32.xlu0 %v4993_v20, %s5560_s16 }
  0x42   :  { %975 = vperm.xlu1 %4992, %v4720_v38  }
  0x43   :  { %970 = vperm.xlu0 %4991, %v4719_v39  }
  0x46   :  { %5079 = vrot.lane.b32.xlu1 %v4993_v20, %s5561_s22  ;;  %v1113_v20 = vrot.slane %v1100_v63, %v5639_v17 }
  0x47   :  { %5074 = vrot.lane.b32.xlu0 %v5058_v37, %s5556_s14 }
  0x4a   :  { %5089 = vrot.lane.b32.xlu1 %v5088_v42, %s5554_s0 }
  0x4b   :  { %5084 = vrot.lane.b32.xlu0 %v5038_v31, %s5561_s22  ;;  %v5869_v31 = vrot.slane %v5746_v46, %v5625_v12 }
  0x4e   :  { %5099 = vrot.lane.b32.xlu1 %v5058_v37, %s5557_s19 }
  0x4f   :  { %5094 = vrot.lane.b32.xlu0 %v5088_v42, %s5555_s11 }
  0x52   :  { %1059 = vperm.xlu1 %4992, %v1051_v43   ;;  %v5894_v43 = vrot.slane %v1109_v19, %v5625_v12 }
  0x53   :  { %1054 = vperm.xlu0 %4991, %v1050_v44   ;;  %v5897_v44 = vrot.slane %v1113_v20, %v5625_v12 }
  0x56   :  { %5109 = vrot.lane.b32.xlu1 %v5088_v42, %s5557_s19 }
  0x57   :  { %5104 = vrot.lane.b32.xlu0 %v5088_v42, %s5556_s14 }
  0x5a   :  { %5119 = vrot.lane.b32.xlu1 %v5118_v45, %s5559_s9 }
  0x5b   :  { %5114 = vrot.lane.b32.xlu0 %v5118_v45, %s5558_s28 }
  0x5e   :  { %5129 = vrot.lane.b32.xlu1 %v5118_v45, %s5560_s16 }
  0x5f   :  { %5124 = vrot.lane.b32.xlu0 %v5123_v47, %s5558_s28 }
  0x62   :  { %5139 = vrot.lane.b32.xlu1 %v5118_v45, %s5561_s22  ;;  %v5900_v45 = vrot.slane %v1141_v27, %v5625_v12 }
  0x63   :  { %5134 = vrot.lane.b32.xlu0 %v5123_v47, %s5559_s9 }
  0x66   :  { %189 = vrot.lane.b32.xlu1 %v5746_v46, %s5555_s11 }
  0x67   :  { %92 = vrot.lane.b32.xlu0 %v5746_v46, %s5554_s0 }
  0x6a   :  { %302 = vrot.lane.b32.xlu1 %v5746_v46, %s5556_s14 }
  0x6b   :  { %5144 = vrot.lane.b32.xlu0 %v5123_v47, %s5560_s16 }
  0x6e   :  { %415 = vrot.lane.b32.xlu1 %v5746_v46, %s5557_s19 }
  0x6f   :  { %5149 = vrot.lane.b32.xlu0 %v5123_v47, %s5561_s22 }
  0x72   :  { %728 = vrot.lane.b32.xlu1 %v5631_v14, %s5559_s9 }
  0x73   :  { %615 = vrot.lane.b32.xlu0 %v5631_v14, %s5558_s28 }
  0x76   :  { %954 = vrot.lane.b32.xlu1 %v5631_v14, %s5561_s22 }
  0x77   :  { %841 = vrot.lane.b32.xlu0 %v5631_v14, %s5560_s16 }
  0x7d   :  { %v5774_v48 = vpop.permute.xlu1 %207  ;;  %v5776_v49 = vpop.permute.xlu0 %112 }
  0x7e   :  { %8467 = vst [vmem:[#allocation7_spill] sm:$0xff] %v5776_v49 }
  0x81   :  { %v5778_v50 = vpop.permute.xlu1 %212  ;;  %v5780_v51 = vpop.permute.xlu0 %117 }
  0x82   :  { %8468 = vst [vmem:[#allocation8_spill] sm:$0xff] %v5780_v51 }
  0x85   :  { %v5782_v52 = vpop.permute.xlu1 %4999  ;;  %v5784_v53 = vpop.permute.xlu0 %4994 }
  0x86   :  { %8469 = vst [vmem:[#allocation9_spill] sm:$0xff] %v5782_v52  ;;  %v5002_v60 = vunpack.i.h.bf16 %v5782_v52  ;;  %v8399_v61 = vunpack.i.l.bf16 %v5782_v52  ;;  %v4996_v0 = vunpack.i.l.bf16 %v5784_v53  ;;  %v8402_v5 = vunpack.i.h.bf16 %v5784_v53 }
  0x88   :  { %v101_v16 = vsel %vm100_vm0, %v8399_v61, %v5002_v60  ;;  %v109_v22 = vsel %vm100_vm0, %v5002_v60, %v4996_v0  ;;  %v108_v28 = vsel %vm100_vm0, %v4996_v0, %v8402_v5 }
  0x89   :  { %v5786_v54 = vpop.permute.xlu1 %5009  ;;  %v5788_v55 = vpop.permute.xlu0 %5004  ;;  %v155_v32 = vrot.slane %v101_v16, %v5625_v12  ;;  %v123_v36 = vrot.slane %v109_v22, %v5625_v12  ;;  %v127_v46 = vrot.slane %v108_v28, %v5625_v12 }
  0x8a   :  { %8470 = vst [vmem:[#allocation10_spill] sm:$0xff] %v5786_v54  ;;  %v5012_v9 = vunpack.i.h.bf16 %v5786_v54  ;;  %v8400_v10 = vunpack.i.l.bf16 %v5786_v54  ;;  %v8403_v23 = vunpack.i.h.bf16 %v5788_v55  ;;  %v5006_v24 = vunpack.i.l.bf16 %v5788_v55 }
  0x8b   :  { %v164_v60 = vmul.f32 %v155_v32, %v5776_v49  ;;  %v173_v63 = vmul.f32 %v155_v32, %v5780_v51  ;;  %v156_v16 = vmul.f32 %v123_v36, %v5776_v49  ;;  %v157_v32 = vmul.f32 %v127_v46, %v5776_v49 }
  0x8c   :  { %v196_v33 = vsel %vm195_vm1, %v8400_v10, %v5012_v9  ;;  %v203_v41 = vsel %vm195_vm1, %v5006_v24, %v8403_v23  ;;  %v204_v47 = vsel %vm195_vm1, %v5012_v9, %v5006_v24  ;;  %v166_v61 = vmul.f32 %v127_v46, %v5780_v51 }
  0x8d   :  { %v5793_v57 = vpop.permute.xlu1 %325  ;;  %v250_v14 = vrot.slane %v196_v33, %v5625_v12  ;;  %v222_v19 = vrot.slane %v203_v41, %v5625_v12  ;;  %v218_v24 = vrot.slane %v204_v47, %v5625_v12 }
  0x8e   :  { %v5807_v62 = vpop.permute.xlu0 %320 }
  0x8f   :  { %v259_v33 = vmul.f32 %v250_v14, %v5774_v48  ;;  %v268_v41 = vmul.f32 %v250_v14, %v5778_v50  ;;  %v252_v58 = vmul.f32 %v222_v19, %v5774_v48  ;;  %v261_v10 = vmul.f32 %v222_v19, %v5778_v50 }
  0x90   :  { %v260_v14 = vmul.f32 %v218_v24, %v5778_v50  ;;  %v1125_v19 = vrot.slane %v5934_v30, %v5625_v12 }
  0x91   :  { %v5812_v1 = vpop.permute.xlu1 %5019  ;;  %v279_v59 = vadd.f32 %v261_v10, %v166_v61 }
  0x92   :  { %8471 = vst [vmem:[#allocation11_spill] sm:$0xff] %v5812_v1  ;;  %v5845_v18 = vpop.permute.xlu0 %5014  ;;  %v5022_v34 = vunpack.i.h.bf16 %v5812_v1  ;;  %v8398_v35 = vunpack.i.l.bf16 %v5812_v1 }
  0x93   :  { %v8401_v37 = vunpack.i.h.bf16 %v5845_v18  ;;  %v5016_v38 = vunpack.i.l.bf16 %v5845_v18 }
  0x94   :  { %v309_v0 = vsel %vm308_vm2, %v8398_v35, %v5022_v34 }
  0x95   :  { %v5857_v26 = vpop.permute.xlu1 %438  ;;  %v316_v9 = vsel %vm308_vm2, %v5016_v38, %v8401_v37  ;;  %v317_v20 = vsel %vm308_vm2, %v5022_v34, %v5016_v38  ;;  %v363_v34 = vrot.slane %v309_v0, %v5625_v12  ;;  %v165_v38 = vmul.f32 %v123_v36, %v5780_v51 }
  0x96   :  { %v5881_v39 = vpop.permute.xlu0 %433  ;;  %v331_v47 = vrot.slane %v317_v20, %v5625_v12  ;;  %v335_v3 = vrot.slane %v316_v9, %v5625_v12  ;;  %v251_v36 = vmul.f32 %v218_v24, %v5774_v48  ;;  %v277_v9 = vadd.f32 %v259_v33, %v164_v60 }
  0x97   :  { %v286_v20 = vadd.f32 %v268_v41, %v173_v63  ;;  %v372_v23 = vmul.f32 %v363_v34, %v5807_v62  ;;  %v1129_v37 = vrot.slane %v5934_v30, %v5639_v17  ;;  %v381_v13 = vmul.f32 %v363_v34, %v5793_v57 }
  0x98   :  { %v364_v24 = vmul.f32 %v331_v47, %v5807_v62  ;;  %v365_v25 = vmul.f32 %v335_v3, %v5807_v62  ;;  %v373_v4 = vmul.f32 %v331_v47, %v5793_v57  ;;  %v269_v41 = vadd.f32 %v251_v36, %v156_v16 }
  0x99   :  { %v5891_v42 = vpop.permute.xlu1 %5029  ;;  %v270_v34 = vadd.f32 %v252_v58, %v157_v32  ;;  %v278_v30 = vadd.f32 %v260_v14, %v165_v38  ;;  %v399_v52 = vadd.f32 %v381_v13, %v286_v20 }
  0x9a   :  { %8472 = vst [vmem:[#allocation12_spill] sm:$0xff] %v5891_v42  ;;  %v5926_v22 = vpop.permute.xlu0 %5024  ;;  %v5032_v27 = vunpack.i.h.bf16 %v5891_v42  ;;  %v8406_v28 = vunpack.i.l.bf16 %v5891_v42  ;;  %v374_v42 = vmul.f32 %v335_v3, %v5793_v57  ;;  %v5982_v3 = vrot.slane %v1125_v19, %v5625_v12 }
  0x9b   :  { %v5026_v35 = vunpack.i.l.bf16 %v5926_v22  ;;  %v8477_v63 = vunpack.i.h.bf16 %v5926_v22  ;;  %v382_v54 = vadd.f32 %v364_v24, %v269_v41  ;;  %v391_v16 = vadd.f32 %v373_v4, %v278_v30 }
  0x9c   :  { %v422_v0 = vsel %vm421_vm3, %v8406_v28, %v5032_v27  ;;  %8480 = vst [vmem:[#allocation19_spill] sm:$0xff] %v5982_v3  ;;  %v392_v32 = vadd.f32 %v374_v42, %v279_v59 }
  0x9d   :  { %v5931_v29 = vpop.permute.xlu1 %523  ;;  %v430_v28 = vsel %vm421_vm3, %v5032_v27, %v5026_v35  ;;  %v476_v60 = vrot.slane %v422_v0, %v5625_v12  ;;  %v429_v17 = vsel %vm421_vm3, %v5026_v35, %v8477_v63  ;;  %v390_v27 = vadd.f32 %v372_v23, %v277_v9 }
  0x9e   :  { %v5948_v5 = vpop.permute.xlu0 %518  ;;  %v444_v47 = vrot.slane %v430_v28, %v5625_v12  ;;  %v5985_v0 = vrot.slane %v1129_v37, %v5625_v12  ;;  %v383_v35 = vadd.f32 %v365_v25, %v270_v34  ;;  %v448_v63 = vrot.slane %v429_v17, %v5625_v12 }
  0x9f   :  { %v485_v61 = vmul.f32 %v476_v60, %v5881_v39  ;;  %v572_v10 = vmul.f32 %v5816_v2, %v5931_v29  ;;  %v494_v25 = vmul.f32 %v476_v60, %v5857_v26  ;;  %v579_v59 = vmul.f32 %v5821_v6, %v5931_v29 }
  0xa0   :  { %8481 = vst [vmem:[#allocation20_spill] sm:$0xff] %v5985_v0  ;;  %v477_v42 = vmul.f32 %v444_v47, %v5881_v39  ;;  %v571_v4 = vmul.f32 %v5825_v7, %v5931_v29  ;;  %v478_v30 = vmul.f32 %v448_v63, %v5881_v39  ;;  %v486_v36 = vmul.f32 %v444_v47, %v5857_v26 }
  0xa1   :  { %v5957_v46 = vpop.permute.xlu1 %636  ;;  %v487_v14 = vmul.f32 %v448_v63, %v5857_v26  ;;  %v6007_v19 = vmul.f32 %v5829_v8, %v5931_v29  ;;  %v563_v9 = vmul.f32 %v5816_v2, %v5948_v5  ;;  %v570_v20 = vmul.f32 %v5821_v6, %v5948_v5 }
  0xa2   :  { %8476 = vst [vmem:[#allocation16_spill] sm:$0xff] %v5957_v46  ;;  %v5976_v33 = vpop.permute.xlu0 %631  ;;  %v6019_v17 = vmul.f32 %v5835_v11, %v5931_v29  ;;  %v503_v41 = vadd.f32 %v485_v61, %v390_v27  ;;  %v562_v2 = vmul.f32 %v5825_v7, %v5948_v5  ;;  %v512_v63 = vadd.f32 %v494_v25, %v399_v52 }
  0xa3   :  { %8478 = vst [vmem:[#allocation17_spill] sm:$0xff] %v5976_v33  ;;  %v6035_v27 = vmul.f32 %v5829_v8, %v5948_v5  ;;  %v6039_v61 = vmul.f32 %v5835_v11, %v5948_v5  ;;  %v505_v7 = vadd.f32 %v487_v14, %v392_v32  ;;  %v6047_v8 = vmul.f32 %v5839_v15, %v5948_v5 }
  0xa4   :  { %8483 = vst [vmem:[#allocation22_spill] sm:$0xff] %v6019_v17  ;;  %v588_v25 = vadd.f32 %v570_v20, %v503_v41  ;;  %v597_v32 = vadd.f32 %v579_v59, %v512_v63  ;;  %v6058_v14 = vmul.f32 %v5839_v15, %v5931_v29  ;;  %v6072_v15 = vmul.f32 %v5851_v21, %v5931_v29 }
  0xa5   :  { %v5978_v1 = vpop.permute.xlu1 %5039  ;;  %8484 = vst [vmem:[#allocation23_spill] sm:$0xff] %v6047_v8 }
  0xa6   :  { %8479 = vst [vmem:[#allocation18_spill] sm:$0xff] %v5978_v1  ;;  %v5035_v23 = vpop.permute.xlu0 %5034  ;;  %v8418_v28 = vunpack.i.h.bf16 %v5978_v1  ;;  %v8415_v37 = vunpack.i.l.bf16 %v5978_v1  ;;  %8486 = vst [vmem:[#allocation25_spill] sm:$0xff] %v6058_v14 }
  0xa7   :  { %v5037_v38 = vunpack.i.h.bf16 %v5035_v23  ;;  %v5036_v13 = vunpack.i.l.bf16 %v5035_v23  ;;  %v495_v23 = vadd.f32 %v477_v42, %v382_v54  ;;  %8487 = vst [vmem:[#allocation26_spill] sm:$0xff] %v6072_v15 }
  0xa9   :  { %v5994_v58 = vpop.permute.xlu1 %749  ;;  %v627_v24 = vsel %vm619_vm4, %v5036_v13, %v5037_v38  ;;  %v626_v34 = vsel %vm619_vm4, %v5037_v38, %v8415_v37  ;;  %v628_v6 = vsel %vm619_vm4, %v8418_v28, %v5036_v13  ;;  %v496_v38 = vadd.f32 %v478_v30, %v383_v35 }
  0xaa   :  { %8482 = vst [vmem:[#allocation21_spill] sm:$0xff] %v5994_v58  ;;  %v6015_v60 = vpop.permute.xlu0 %744  ;;  %v504_v37 = vadd.f32 %v486_v36, %v391_v16  ;;  %v642_v0 = vrot.slane %v627_v24, %v5625_v12  ;;  %v646_v3 = vrot.slane %v626_v34, %v5625_v12  ;;  %v674_v13 = vrot.slane %v628_v6, %v5625_v12 }
  0xab   :  { %v580_v30 = vadd.f32 %v562_v2, %v495_v23  ;;  %v6054_v36 = vmul.f32 %v5851_v21, %v5948_v5  ;;  %v581_v24 = vadd.f32 %v563_v9, %v496_v38  ;;  %v590_v6 = vadd.f32 %v572_v10, %v505_v7 }
  0xac   :  { %v589_v34 = vadd.f32 %v571_v4, %v504_v37  ;;  %v675_v20 = vmul.f32 %v642_v0, %v5976_v33  ;;  %v676_v41 = vmul.f32 %v646_v3, %v5976_v33  ;;  %v683_v59 = vmul.f32 %v674_v13, %v5976_v33 }
  0xad   :  { %v6031_v47 = vpop.permute.xlu1 %5049  ;;  %8485 = vst [vmem:[#allocation24_spill] sm:$0xff] %v6054_v36  ;;  %v685_v10 = vmul.f32 %v646_v3, %v5957_v46  ;;  %v684_v37 = vmul.f32 %v642_v0, %v5957_v46  ;;  %v692_v38 = vmul.f32 %v674_v13, %v5957_v46  ;;  %v6087_v21 = vmul.f32 %v5869_v31, %v5948_v5 }
  0xae   :  { %v8420_v52 = vunpack.i.l.bf16 %v6031_v47  ;;  %v5045_v54 = vpop.permute.xlu0 %5044  ;;  %v8419_v11 = vunpack.i.h.bf16 %v6031_v47  ;;  %v6091_v3 = vmul.f32 %v5885_v40, %v5948_v5  ;;  %v6095_v0 = vmul.f32 %v5869_v31, %v5931_v29 }
  0xaf   :  { %v5047_v42 = vunpack.i.h.bf16 %v5045_v54  ;;  %v5046_v35 = vunpack.i.l.bf16 %v5045_v54  ;;  %8488 = vst [vmem:[#allocation27_spill] sm:$0xff] %v6087_v21  ;;  %v693_v7 = vadd.f32 %v675_v20, %v580_v30  ;;  %v694_v13 = vadd.f32 %v676_v41, %v581_v24 }
  0xb0   :  { %8489 = vst [vmem:[#allocation28_spill] sm:$0xff] %v6091_v3  ;;  %8490 = vst [vmem:[#allocation29_spill] sm:$0xff] %v6095_v0  ;;  %v701_v28 = vadd.f32 %v683_v59, %v588_v25  ;;  %v702_v5 = vadd.f32 %v684_v37, %v589_v34  ;;  %v703_v3 = vadd.f32 %v685_v10, %v590_v6  ;;  %v8491_v30 = vunpack.i.h.bf16 %v5788_v55 }
  0xb1   :  { %v6050_v16 = vpop.permute.xlu1 %862  ;;  %v739_v2 = vsel %vm732_vm5, %v5047_v42, %v8420_v52  ;;  %v740_v4 = vsel %vm732_vm5, %v5046_v35, %v5047_v42  ;;  %v741_v9 = vsel %vm732_vm5, %v8419_v11, %v5046_v35  ;;  %v710_v25 = vadd.f32 %v692_v38, %v597_v32 }
  0xb2   :  { %v6068_v63 = vpop.permute.xlu0 %857  ;;  %v759_v54 = vrot.slane %v739_v2, %v5625_v12  ;;  %v755_v11 = vrot.slane %v740_v4, %v5625_v12  ;;  %v787_v52 = vrot.slane %v741_v9, %v5625_v12 }
  0xb4   :  { %v789_v6 = vmul.f32 %v759_v54, %v6015_v60  ;;  %v798_v37 = vmul.f32 %v759_v54, %v5994_v58  ;;  %v788_v32 = vmul.f32 %v755_v11, %v6015_v60  ;;  %v796_v4 = vmul.f32 %v787_v52, %v6015_v60 }
  0xb5   :  { %v6082_v23 = vpop.permute.xlu1 %5059  ;;  %v797_v9 = vmul.f32 %v755_v11, %v5994_v58  ;;  %v805_v55 = vmul.f32 %v787_v52, %v5994_v58 }
  0xb6   :  { %v8421_v42 = vunpack.i.h.bf16 %v6082_v23  ;;  %v5061_v35 = vunpack.i.l.bf16 %v6082_v23  ;;  %v6102_v21 = vpop.permute.xlu0 %5054  ;;  %v814_v33 = vadd.f32 %v796_v4, %v701_v28  ;;  %v816_v1 = vadd.f32 %v798_v37, %v703_v3 }
  0xb7   :  { %v8422_v59 = vunpack.i.h.bf16 %v6102_v21  ;;  %v5056_v34 = vunpack.i.l.bf16 %v6102_v21  ;;  %v815_v17 = vadd.f32 %v797_v9, %v702_v5 }
  0xb8   :  { %v201_v31 = vsel %vm195_vm1, %v5061_v35, %v8421_v42  ;;  %v202_v20 = vsel %vm195_vm1, %v8491_v30, %v5061_v35 }
  0xb9   :  { %v6112_v24 = vpop.permute.xlu1 %5069  ;;  %v226_v41 = vrot.slane %v202_v20, %v5625_v12  ;;  %v230_v2 = vrot.slane %v201_v31, %v5625_v12  ;;  %v106_v35 = vsel %vm100_vm0, %v5056_v34, %v8422_v59  ;;  %v8493_v31 = vunpack.i.h.bf16 %v5784_v53 }
  0xba   :  { %8492 = vst [vmem:[#allocation30_spill] sm:$0xff] %v6112_v24  ;;  %v5065_v38 = vpop.permute.xlu0 %5064  ;;  %v135_v0 = vrot.slane %v106_v35, %v5625_v12  ;;  %v8494_v59 = vunpack.i.l.bf16 %v6112_v24 }
  0xbb   :  { %v107_v30 = vsel %vm100_vm0, %v8493_v31, %v5056_v34  ;;  %v5067_v20 = vunpack.i.h.bf16 %v5065_v38  ;;  %v5066_v42 = vunpack.i.l.bf16 %v5065_v38  ;;  %v253_v10 = vmul.f32 %v226_v41, %v5774_v48 }
  0xbc   :  { %v131_v11 = vrot.slane %v107_v30, %v5625_v12  ;;  %v254_v15 = vmul.f32 %v230_v2, %v5774_v48  ;;  %v8495_v38 = vunpack.i.h.bf16 %v6112_v24  ;;  %v262_v31 = vmul.f32 %v226_v41, %v5778_v50 }
  0xbd   :  { %v6134_v54 = vpop.permute.xlu1 %975  ;;  %v852_v53 = vsel %vm845_vm6, %v5067_v20, %v8494_v59  ;;  %v853_v34 = vsel %vm845_vm6, %v5066_v42, %v5067_v20  ;;  %v263_v30 = vmul.f32 %v230_v2, %v5778_v50  ;;  %v159_v14 = vmul.f32 %v135_v0, %v5776_v49 }
  0xbe   :  { %v854_v52 = vsel %vm845_vm6, %v8495_v38, %v5066_v42  ;;  %v158_v35 = vmul.f32 %v131_v11, %v5776_v49  ;;  %v6155_v36 = vpop.permute.xlu0 %970  ;;  %v167_v59 = vmul.f32 %v131_v11, %v5780_v51  ;;  %v168_v8 = vmul.f32 %v135_v0, %v5780_v51 }
  0xbf   :  { %v872_v20 = vrot.slane %v852_v53, %v5625_v12  ;;  %v868_v24 = vrot.slane %v853_v34, %v5625_v12  ;;  %v806_v42 = vadd.f32 %v788_v32, %v693_v7  ;;  %v807_v41 = vadd.f32 %v789_v6, %v694_v13 }
  0xc0   :  { %v900_v2 = vrot.slane %v854_v52, %v5625_v12  ;;  %v6166_v38 = vmul.f32 %v5885_v40, %v5931_v29  ;;  %v823_v11 = vadd.f32 %v805_v55, %v710_v25  ;;  %v271_v13 = vadd.f32 %v253_v10, %v158_v35 }
  0xc1   :  { %v6161_v46 = vpop.permute.xlu1 %5079  ;;  %v902_v0 = vmul.f32 %v872_v20, %v6068_v63  ;;  %v901_v53 = vmul.f32 %v868_v24, %v6068_v63  ;;  %v272_v6 = vadd.f32 %v254_v15, %v159_v14  ;;  %v280_v32 = vadd.f32 %v262_v31, %v167_v59 }
  0xc2   :  { %8496 = vst [vmem:[#allocation31_spill] sm:$0xff] %v6166_v38  ;;  %v5082_v34 = vunpack.i.h.bf16 %v6161_v46  ;;  %v5081_v58 = vunpack.i.l.bf16 %v6161_v46  ;;  %v6172_v7 = vpop.permute.xlu0 %5074  ;;  %v281_v52 = vadd.f32 %v263_v30, %v168_v8  ;;  %v909_v29 = vmul.f32 %v900_v2, %v6068_v63 }
  0xc3   :  { %v910_v28 = vmul.f32 %v868_v24, %v6050_v16  ;;  %v8434_v5 = vunpack.i.h.bf16 %v6172_v7  ;;  %v5076_v46 = vunpack.i.l.bf16 %v6172_v7  ;;  %v911_v8 = vmul.f32 %v872_v20, %v6050_v16 }
  0xc4   :  { %v966_v3 = vsel %vm958_vm7, %v5081_v58, %v5082_v34  ;;  %v918_v15 = vmul.f32 %v900_v2, %v6050_v16  ;;  %v919_v10 = vadd.f32 %v901_v53, %v806_v42  ;;  %v920_v37 = vadd.f32 %v902_v0, %v807_v41 }
  0xc5   :  { %v6174_v40 = vpop.permute.xlu1 %5089  ;;  %v981_v25 = vrot.slane %v966_v3, %v5625_v12  ;;  %v314_v31 = vsel %vm308_vm2, %v5076_v46, %v8434_v5  ;;  %v8498_v30 = vunpack.i.h.bf16 %v5845_v18  ;;  %v8499_v41 = vunpack.i.h.bf16 %v6102_v21 }
  0xc6   :  { %8497 = vst [vmem:[#allocation32_spill] sm:$0xff] %v6174_v40  ;;  %v8433_v55 = vunpack.i.h.bf16 %v6174_v40  ;;  %v5091_v14 = vunpack.i.l.bf16 %v6174_v40  ;;  %v6187_v24 = vpop.permute.xlu0 %5084  ;;  %v343_v20 = vrot.slane %v314_v31, %v5625_v12  ;;  %v927_v18 = vadd.f32 %v909_v29, %v814_v33 }
  0xc7   :  { %v1014_v4 = vmul.f32 %v981_v25, %v6155_v36  ;;  %v1023_v9 = vmul.f32 %v981_v25, %v6134_v54  ;;  %v315_v35 = vsel %vm308_vm2, %v8498_v30, %v5076_v46  ;;  %v928_v53 = vadd.f32 %v910_v28, %v815_v17 }
  0xc8   :  { %v339_v59 = vrot.slane %v315_v35, %v5625_v12  ;;  %v104_v42 = vsel %vm100_vm0, %v5091_v14, %v8433_v55  ;;  %v105_v2 = vsel %vm100_vm0, %v8499_v41, %v5091_v14  ;;  %v929_v46 = vadd.f32 %v911_v8, %v816_v1 }
  0xc9   :  { %v6209_v0 = vpop.permute.xlu1 %5099  ;;  %v139_v3 = vrot.slane %v105_v2, %v5625_v12  ;;  %v143_v25 = vrot.slane %v104_v42, %v5625_v12  ;;  %v936_v31 = vadd.f32 %v918_v15, %v823_v11  ;;  %v367_v35 = vmul.f32 %v343_v20, %v5807_v62 }
  0xca   :  { %v366_v30 = vmul.f32 %v339_v59, %v5807_v62  ;;  %v1032_v55 = vadd.f32 %v1014_v4, %v919_v10  ;;  %v1041_v5 = vadd.f32 %v1023_v9, %v928_v53  ;;  %v375_v21 = vmul.f32 %v339_v59, %v5793_v57  ;;  %v6217_v41 = vpop.permute.xlu0 %5094 }
  0xcb   :  { %v376_v14 = vmul.f32 %v343_v20, %v5793_v57  ;;  %v160_v33 = vmul.f32 %v139_v3, %v5776_v49  ;;  %v6221_v17 = vmul.f32 %v143_v25, %v5776_v49  ;;  %v6224_v1 = vmul.f32 %v139_v3, %v5780_v51 }
  0xcc   :  { %v6227_v11 = vmul.f32 %v143_v25, %v5780_v51  ;;  %v8435_v29 = vunpack.i.h.bf16 %v6187_v24  ;;  %v8436_v28 = vunpack.i.l.bf16 %v6187_v24  ;;  %v8438_v8 = vunpack.i.h.bf16 %v6209_v0 }
  0xcd   :  { %v5101_v15 = vunpack.i.l.bf16 %v6209_v0  ;;  %v384_v10 = vadd.f32 %v366_v30, %v271_v13  ;;  %v385_v4 = vadd.f32 %v367_v35, %v272_v6  ;;  %v8437_v9 = vunpack.i.h.bf16 %v6217_v41  ;;  %v6235_v20 = vpop.permute.xlu1 %1059 }
  0xce   :  { %v5096_v59 = vunpack.i.l.bf16 %v6217_v41  ;;  %v967_v42 = vsel %vm958_vm7, %v8435_v29, %v5081_v58  ;;  %v965_v2 = vsel %vm958_vm7, %v5082_v34, %v8436_v28  ;;  %v8500_v6 = vunpack.i.h.bf16 %v5926_v22 }
  0xcf   :  { %v427_v13 = vsel %vm421_vm3, %v5101_v15, %v8438_v8  ;;  %v1013_v3 = vrot.slane %v967_v42, %v5625_v12  ;;  %v985_v25 = vrot.slane %v965_v2, %v5625_v12  ;;  %v393_v35 = vadd.f32 %v375_v21, %v280_v32 }
  0xd0   :  { %v428_v53 = vsel %vm421_vm3, %v8500_v6, %v5101_v15  ;;  %v456_v30 = vrot.slane %v427_v13, %v5625_v12  ;;  %v394_v34 = vadd.f32 %v376_v14, %v281_v52  ;;  %v199_v29 = vsel %vm195_vm1, %v5096_v59, %v8437_v9  ;;  %v6266_v6 = vpop.permute.xlu0 %1054 }
  0xd1   :  { %v452_v58 = vrot.slane %v428_v53, %v5625_v12  ;;  %v1071_v22 = vadd.f32 %v6235_v20, %v1041_v5  ;;  %v1022_v28 = vmul.f32 %v1013_v3, %v6155_v36  ;;  %v1031_v15 = vmul.f32 %v1013_v3, %v6134_v54  ;;  %v6275_v8 = vpop.permute.xlu1 %5109 }
  0xd2   :  { %v1015_v42 = vmul.f32 %v985_v25, %v6155_v36  ;;  %v1024_v2 = vmul.f32 %v985_v25, %v6134_v54  ;;  %v480_v52 = vmul.f32 %v456_v30, %v5881_v39  ;;  %v8501_v14 = vunpack.i.h.bf16 %v6082_v23 }
  0xd3   :  { %v479_v32 = vmul.f32 %v452_v58, %v5881_v39  ;;  %v488_v21 = vmul.f32 %v452_v58, %v5857_v26  ;;  %v1040_v53 = vadd.f32 %v1022_v28, %v927_v18  ;;  %v1049_v9 = vadd.f32 %v1031_v15, %v936_v31 }
  0xd4   :  { %v200_v5 = vsel %vm195_vm1, %v8501_v14, %v5096_v59  ;;  %v1033_v13 = vadd.f32 %v1015_v42, %v920_v37  ;;  %v1042_v3 = vadd.f32 %v1024_v2, %v929_v46  ;;  %v489_v25 = vmul.f32 %v456_v30, %v5857_v26 }
  0xd5   :  { %v497_v38 = vadd.f32 %v479_v32, %v384_v10  ;;  %v1089_v51 = vmax.f32 %v1071_v22, 0.0  ;;  %v1062_v49 = vadd.f32 %v6266_v6, %v1032_v55  ;;  %v234_v40 = vrot.slane %v200_v5, %v5625_v12  ;;  %v6289_v22 = vpop.permute.xlu0 %5104 }
  0xd6   :  { %v238_v58 = vrot.slane %v199_v29, %v5625_v12  ;;  %v1072_v23 = vadd.f32 %v6235_v20, %v1042_v3  ;;  %v1079_v59 = vadd.f32 %v6235_v20, %v1049_v9  ;;  %v498_v37 = vadd.f32 %v480_v52, %v385_v4  ;;  %v6296_v52 = vpop.permute.xlu1 %5119 }
  0xd7   :  { %v506_v18 = vadd.f32 %v488_v21, %v393_v35  ;;  %v1063_v46 = vadd.f32 %v6266_v6, %v1033_v13  ;;  %v1070_v31 = vadd.f32 %v6266_v6, %v1040_v53  ;;  %v255_v28 = vmul.f32 %v234_v40, %v5774_v48 }
  0xd8   :  { %v256_v10 = vmul.f32 %v238_v58, %v5774_v48  ;;  %v264_v55 = vmul.f32 %v234_v40, %v5778_v50  ;;  %v265_v30 = vmul.f32 %v238_v58, %v5778_v50  ;;  %v6291_v29 = vadd.f32 %v489_v25, %v394_v34 }
  0xd9   :  { %v1090_v15 = vmax.f32 %v1072_v23, 0.0  ;;  %v1097_v9 = vmax.f32 %v1079_v59, 0.0  ;;  %v1080_v4 = vmax.f32 %v1062_v49, 0.0  ;;  %v273_v35 = vadd.f32 %v255_v28, %v160_v33  ;;  %v6330_v23 = vpop.permute.xlu0 %5114 }
  0xda   :  { %v6294_v42 = vmul.f32 %v5894_v43, %v1089_v51  ;;  %v1081_v2 = vmax.f32 %v1063_v46, 0.0  ;;  %v1088_v32 = vmax.f32 %v1070_v31, 0.0  ;;  %v274_v21 = vadd.f32 %v256_v10, %v6221_v17 }
  0xdb   :  { %v282_v40 = vadd.f32 %v264_v55, %v6224_v1  ;;  %v283_v14 = vadd.f32 %v265_v30, %v6227_v11  ;;  %v6302_v34 = vmul.f32 %v5897_v44, %v1090_v15  ;;  %v6305_v5 = vmul.f32 %v5900_v45, %v1097_v9 }
  0xdc   :  { %8502 = vst [vmem:[#allocation33_spill] sm:$0xff] %v6294_v42  ;;  %v8444_v49 = vunpack.i.h.bf16 %v6275_v8  ;;  %v5111_v51 = vunpack.i.l.bf16 %v6275_v8  ;;  %v8445_v33 = vunpack.i.h.bf16 %v6289_v22  ;;  %v6311_v13 = vmul.f32 %v5894_v43, %v1080_v4 }
  0xdd   :  { %8503 = vst [vmem:[#allocation34_spill] sm:$0xff] %v6302_v34  ;;  %8504 = vst [vmem:[#allocation35_spill] sm:$0xff] %v6305_v5  ;;  %v5106_v17 = vunpack.i.l.bf16 %v6289_v22  ;;  %v8446_v1 = vunpack.i.h.bf16 %v6296_v52  ;;  %v5121_v11 = vunpack.i.l.bf16 %v6296_v52  ;;  %v6317_v53 = vmul.f32 %v5897_v44, %v1081_v2 }
  0xde   :  { %8505 = vst [vmem:[#allocation36_spill] sm:$0xff] %v6311_v13  ;;  %v6320_v3 = vmul.f32 %v5900_v45, %v1088_v32  ;;  %v425_v25 = vsel %vm421_vm3, %v5111_v51, %v8444_v49  ;;  %v8508_v43 = vunpack.i.h.bf16 %v6209_v0  ;;  %v8509_v46 = vunpack.i.h.bf16 %v6172_v7  ;;  %v6368_v49 = vpop.permute.xlu1 %5129 }
  0xdf   :  { %8506 = vst [vmem:[#allocation37_spill] sm:$0xff] %v6317_v53  ;;  %v464_v44 = vrot.slane %v425_v25, %v5625_v12  ;;  %v312_v45 = vsel %vm308_vm2, %v5106_v17, %v8445_v33  ;;  %v737_v10 = vsel %vm732_vm5, %v5121_v11, %v8446_v1  ;;  %v8510_v55 = vunpack.i.l.bf16 %v6031_v47 }
  0xe0   :  { %8507 = vst [vmem:[#allocation38_spill] sm:$0xff] %v6320_v3  ;;  %v426_v58 = vsel %vm421_vm3, %v8508_v43, %v5111_v51  ;;  %v313_v31 = vsel %vm308_vm2, %v8509_v46, %v5106_v17  ;;  %v351_v28 = vrot.slane %v312_v45, %v5625_v12  ;;  %v8447_v7 = vunpack.i.h.bf16 %v6330_v23 }
  0xe1   :  { %v460_v59 = vrot.slane %v426_v58, %v5625_v12  ;;  %v347_v0 = vrot.slane %v313_v31, %v5625_v12  ;;  %v738_v30 = vsel %vm732_vm5, %v8510_v55, %v5121_v11  ;;  %v5116_v9 = vunpack.i.l.bf16 %v6330_v23 }
  0xe2   :  { %v582_v4 = vadd.f32 %v6035_v27, %v497_v38  ;;  %v369_v32 = vmul.f32 %v351_v28, %v5807_v62  ;;  %v378_v17 = vmul.f32 %v351_v28, %v5793_v57  ;;  %v482_v25 = vmul.f32 %v464_v44, %v5881_v39 }
  0xe3   :  { %v481_v15 = vmul.f32 %v460_v59, %v5881_v39  ;;  %v368_v2 = vmul.f32 %v347_v0, %v5807_v62  ;;  %v377_v51 = vmul.f32 %v347_v0, %v5793_v57  ;;  %v490_v11 = vmul.f32 %v460_v59, %v5857_v26 }
  0xe4   :  { %v763_v43 = vrot.slane %v738_v30, %v5625_v12  ;;  %v767_v58 = vrot.slane %v737_v10, %v5625_v12  ;;  %v491_v45 = vmul.f32 %v464_v44, %v5857_v26  ;;  %v387_v27 = vadd.f32 %v369_v32, %v274_v21  ;;  %v8511_v30 = vld [vmem:[#allocation21_spill] sm:$0xff]  ;;  %v6373_v44 = vpop.permute.xlu0 %5124  ;;  %v8516_v32 = vld [vmem:[#allocation22_spill] sm:$0xff] }
  0xe5   :  { %v386_v46 = vadd.f32 %v368_v2, %v273_v35  ;;  %v583_v38 = vadd.f32 %v6039_v61, %v498_v37  ;;  %v395_v31 = vadd.f32 %v377_v51, %v282_v40  ;;  %v396_v55 = vadd.f32 %v378_v17, %v283_v14  ;;  %v8512_v37 = vld [vmem:[#allocation18_spill] sm:$0xff] }
  0xe6   :  { %v790_v0 = vmul.f32 %v763_v43, %v6015_v60  ;;  %v591_v28 = vadd.f32 %v6007_v19, %v506_v18  ;;  %v791_v59 = vmul.f32 %v767_v58, %v6015_v60  ;;  %v799_v1 = vmul.f32 %v763_v43, %v8511_v30  ;;  %v8517_v43 = vld [vmem:[#allocation17_spill] sm:$0xff] }
  0xe7   :  { %v499_v33 = vadd.f32 %v481_v15, %v386_v46  ;;  %v800_v10 = vmul.f32 %v767_v58, %v8511_v30  ;;  %v500_v35 = vadd.f32 %v482_v25, %v387_v27  ;;  %v624_v61 = vsel %vm619_vm4, %v5116_v9, %v8447_v7  ;;  %v8518_v27 = vld [vmem:[#allocation16_spill] sm:$0xff]  ;;  %v8519_v7 = vld [vmem:[#allocation30_spill] sm:$0xff] }
  0xe8   :  { %v8513_v21 = vunpack.i.l.bf16 %v8512_v37  ;;  %v6385_v18 = vpack.i.bf16 %v6294_v42, %v6311_v13  ;;  %v654_v14 = vrot.slane %v624_v61, %v5625_v12  ;;  %v6391_v15 = vpack.i.bf16 %v6302_v34, %v6317_v53  ;;  %v6415_v13 = vpop.permute.xlu1 %5139 }
  0xe9   :  { %v8454_v2 = vunpack.i.h.bf16 %v6368_v49  ;;  %v592_v51 = vadd.f32 %v8516_v32, %v6291_v29  ;;  %v5126_v25 = vunpack.i.l.bf16 %v6373_v44  ;;  %v508_v29 = vadd.f32 %v490_v11, %v395_v31 }
  0xea   :  { %v625_v19 = vsel %vm619_vm4, %v8513_v21, %v5116_v9  ;;  %8514 = vst [vmem:[#allocation21_spill] sm:$0xff] %v6385_v18  ;;  %8515 = vst [vmem:[#allocation18_spill] sm:$0xff] %v6391_v15  ;;  %5154 = vrot.lane.b32.xlu0 %v6385_v18, %s5555_s11  ;;  %v5131_v9 = vunpack.i.l.bf16 %v6368_v49  ;;  %v678_v46 = vmul.f32 %v654_v14, %v8517_v43  ;;  %5159 = vrot.lane.b32.xlu1 %v6391_v15, %s5555_s11 }
  0xeb   :  { %v650_v40 = vrot.slane %v625_v19, %v5625_v12  ;;  %v687_v21 = vmul.f32 %v654_v14, %v8518_v27  ;;  %v509_v19 = vadd.f32 %v491_v45, %v396_v55  ;;  %v8520_v17 = vunpack.i.l.bf16 %v8519_v7  ;;  %v8521_v45 = vld [vmem:[#allocation23_spill] sm:$0xff] }
  0xec   :  { %v850_v32 = vsel %vm845_vm6, %v5131_v9, %v8454_v2  ;;  %v696_v34 = vadd.f32 %v678_v46, %v583_v38  ;;  %v584_v31 = vadd.f32 %v8521_v45, %v499_v33  ;;  %v8522_v55 = vunpack.i.h.bf16 %v6373_v44 }
  0xed   :  { %v677_v58 = vmul.f32 %v650_v40, %v8517_v43  ;;  %v686_v61 = vmul.f32 %v650_v40, %v8518_v27  ;;  %v851_v42 = vsel %vm845_vm6, %v8520_v17, %v5131_v9  ;;  %v705_v53 = vadd.f32 %v687_v21, %v592_v51  ;;  %v8523_v51 = vld [vmem:[#allocation24_spill] sm:$0xff]  ;;  %v190_v21 = vpop.permute.xlu1 %189 }
  0xee   :  { %v876_v18 = vrot.slane %v851_v42, %v5625_v12  ;;  %v880_v11 = vrot.slane %v850_v32, %v5625_v12  ;;  %v622_v2 = vsel %vm619_vm4, %v5126_v25, %v8522_v55  ;;  %v809_v7 = vadd.f32 %v791_v59, %v696_v34  ;;  %v8526_v59 = vld [vmem:[#allocation25_spill] sm:$0xff] }
  0xef   :  { %v695_v40 = vadd.f32 %v677_v58, %v582_v4  ;;  %v704_v14 = vadd.f32 %v686_v61, %v591_v28  ;;  %v818_v17 = vadd.f32 %v800_v10, %v705_v53  ;;  %v585_v58 = vadd.f32 %v8523_v51, %v500_v35 }
  0xf0   :  { %v903_v4 = vmul.f32 %v876_v18, %v6068_v63  ;;  %v904_v38 = vmul.f32 %v880_v11, %v6068_v63  ;;  %v912_v28 = vmul.f32 %v876_v18, %v6050_v16  ;;  %v913_v42 = vmul.f32 %v880_v11, %v6050_v16  ;;  %v8527_v18 = vld [vmem:[#allocation26_spill] sm:$0xff] }
  0xf1   :  { %v808_v15 = vadd.f32 %v790_v0, %v695_v40  ;;  %v817_v9 = vadd.f32 %v799_v1, %v704_v14  ;;  %v8524_v33 = vunpack.i.h.bf16 %v6330_v23  ;;  %v662_v0 = vrot.slane %v622_v2, %v5625_v12  ;;  %v6438_v1 = vpop.permute.xlu0 %5134 }
  0xf2   :  { %v6436_v34 = vpack.i.bf16 %v6305_v5, %v6320_v3  ;;  %v593_v10 = vadd.f32 %v8526_v59, %v508_v29  ;;  %v594_v61 = vadd.f32 %v8527_v18, %v509_v19  ;;  %v8458_v35 = vunpack.i.h.bf16 %v6415_v13 }
  0xf3   :  { %v623_v46 = vsel %vm619_vm4, %v8524_v33, %v5126_v25  ;;  %v921_v53 = vadd.f32 %v903_v4, %v808_v15  ;;  %v922_v23 = vadd.f32 %v904_v38, %v809_v7  ;;  %v930_v32 = vadd.f32 %v912_v28, %v817_v9  ;;  %v8528_v7 = vld [vmem:[#allocation10_spill] sm:$0xff] }
  0xf4   :  { %8525 = vst [vmem:[#allocation22_spill] sm:$0xff] %v6436_v34  ;;  %v658_v25 = vrot.slane %v623_v46, %v5625_v12  ;;  %5164 = vrot.lane.b32.xlu0 %v6436_v34, %s5555_s11  ;;  %v5141_v2 = vunpack.i.l.bf16 %v6415_v13  ;;  %v931_v40 = vadd.f32 %v913_v42, %v818_v17  ;;  %v680_v14 = vmul.f32 %v662_v0, %v8517_v43 }
  0xf5   :  { %v8457_v15 = vunpack.i.h.bf16 %v6438_v1  ;;  %v5136_v29 = vunpack.i.l.bf16 %v6438_v1  ;;  %v689_v11 = vmul.f32 %v662_v0, %v8518_v27  ;;  %v8529_v45 = vunpack.i.l.bf16 %v8528_v7 }
  0xf6   :  { %v679_v19 = vmul.f32 %v658_v25, %v8517_v43  ;;  %v8530_v9 = vunpack.i.h.bf16 %v6217_v41  ;;  %v963_v4 = vsel %vm958_vm7, %v5141_v2, %v8458_v35  ;;  %v8531_v38 = vunpack.i.l.bf16 %v6187_v24 }
  0xf7   :  { %v197_v55 = vsel %vm195_vm1, %v190_v21, %v8529_v45  ;;  %v735_v42 = vsel %vm732_vm5, %v5136_v29, %v8457_v15  ;;  %v8532_v41 = vunpack.i.h.bf16 %v6296_v52  ;;  %v688_v33 = vmul.f32 %v658_v25, %v8518_v27 }
  0xf8   :  { %v198_v17 = vsel %vm195_vm1, %v8530_v9, %v190_v21  ;;  %v964_v28 = vsel %vm958_vm7, %v8531_v38, %v5141_v2  ;;  %v697_v46 = vadd.f32 %v679_v19, %v584_v31  ;;  %v993_v59 = vrot.slane %v963_v4, %v5625_v12  ;;  %v93_v38 = vpop.permute.xlu0 %92 }
  0xf9   :  { %v736_v51 = vsel %vm732_vm5, %v8532_v41, %v5136_v29  ;;  %v989_v0 = vrot.slane %v964_v28, %v5625_v12  ;;  %v775_v21 = vrot.slane %v735_v42, %v5625_v12  ;;  %v242_v2 = vrot.slane %v198_v17, %v5625_v12  ;;  %v303_v17 = vpop.permute.xlu1 %302 }
  0xfa   :  { %v771_v18 = vrot.slane %v736_v51, %v5625_v12  ;;  %v246_v7 = vrot.slane %v197_v55, %v5625_v12  ;;  %v1017_v45 = vmul.f32 %v993_v59, %v6155_v36  ;;  %v1026_v31 = vmul.f32 %v993_v59, %v6134_v54 }
  0xfb   :  { %v1016_v52 = vmul.f32 %v989_v0, %v6155_v36  ;;  %v1025_v29 = vmul.f32 %v989_v0, %v6134_v54  ;;  %v793_v19 = vmul.f32 %v775_v21, %v6015_v60  ;;  %v802_v4 = vmul.f32 %v775_v21, %v8511_v30 }
  0xfc   :  { %v792_v25 = vmul.f32 %v771_v18, %v6015_v60  ;;  %v801_v9 = vmul.f32 %v771_v18, %v8511_v30  ;;  %v1035_v55 = vadd.f32 %v1017_v45, %v922_v23  ;;  %v1044_v41 = vadd.f32 %v1026_v31, %v931_v40  ;;  %v8533_v40 = vld [vmem:[#allocation9_spill] sm:$0xff] }
  0xfd   :  { %v1034_v28 = vadd.f32 %v1016_v52, %v921_v53  ;;  %v1043_v42 = vadd.f32 %v1025_v29, %v930_v32  ;;  %v698_v51 = vadd.f32 %v680_v14, %v585_v58  ;;  %v706_v15 = vadd.f32 %v688_v33, %v593_v10  ;;  %v8535_v33 = vld [vmem:[#allocation32_spill] sm:$0xff] }
  0xfe   :  { %v707_v35 = vadd.f32 %v689_v11, %v594_v61  ;;  %v6491_v0 = vadd.f32 %v792_v25, %v697_v46  ;;  %v1065_v5 = vadd.f32 %v6266_v6, %v1035_v55  ;;  %v1074_v18 = vadd.f32 %v6235_v20, %v1044_v41 }
  0xff   :  { %v1064_v59 = vadd.f32 %v6266_v6, %v1034_v28  ;;  %v1073_v3 = vadd.f32 %v6235_v20, %v1043_v42  ;;  %v6497_v21 = vadd.f32 %v793_v19, %v698_v51  ;;  %v6499_v34 = vadd.f32 %v801_v9, %v706_v15  ;;  %v8537_v15 = vld [vmem:[#allocation11_spill] sm:$0xff]  ;;  %v8540_v19 = vld [vmem:[#allocation13_spill] sm:$0xff]  ;;  %v8541_v42 = vld [vmem:[#allocation12_spill] sm:$0xff] }
 0x100   :  { %v6501_v53 = vadd.f32 %v802_v4, %v707_v35  ;;  %v257_v58 = vmul.f32 %v242_v2, %v5774_v48  ;;  %v258_v61 = vmul.f32 %v246_v7, %v5774_v48  ;;  %v266_v23 = vmul.f32 %v242_v2, %v5778_v50  ;;  %v6523_v2 = vpop.permute.xlu0 %5144 }
 0x101   :  { %v1082_v10 = vmax.f32 %v1064_v59, 0.0  ;;  %v267_v32 = vmul.f32 %v246_v7, %v5778_v50  ;;  %v8534_v14 = vunpack.i.l.bf16 %v8533_v40  ;;  %v8536_v46 = vunpack.i.h.bf16 %v8535_v33  ;;  %v416_v7 = vpop.permute.xlu1 %415  ;;  %v8544_v59 = vld [vmem:[#allocation7_spill] sm:$0xff]  ;;  %v8545_v40 = vld [vmem:[#allocation8_spill] sm:$0xff]  ;;  %v8546_v33 = vld [vmem:[#allocation14_spill] sm:$0xff] }
 0x102   :  { %v8538_v52 = vunpack.i.l.bf16 %v8537_v15  ;;  %v8539_v48 = vunpack.i.h.bf16 %v6289_v22  ;;  %v1083_v29 = vmax.f32 %v1065_v5, 0.0  ;;  %v1091_v31 = vmax.f32 %v1073_v3, 0.0 }
 0x103   :  { %v102_v11 = vsel %vm100_vm0, %v93_v38, %v8534_v14  ;;  %v103_v35 = vsel %vm100_vm0, %v8536_v46, %v93_v38  ;;  %v1092_v25 = vmax.f32 %v1074_v18, 0.0  ;;  %v6526_v9 = vmul.f32 %v8540_v19, %v1082_v10 }
 0x104   :  { %v310_v45 = vsel %vm308_vm2, %v303_v17, %v8538_v52  ;;  %v311_v50 = vsel %vm308_vm2, %v8539_v48, %v303_v17  ;;  %v147_v4 = vrot.slane %v103_v35, %v5625_v12  ;;  %v151_v38 = vrot.slane %v102_v11, %v5625_v12 }
 0x105   :  { %v355_v28 = vrot.slane %v311_v50, %v5625_v12  ;;  %v359_v22 = vrot.slane %v310_v45, %v5625_v12  ;;  %v5147_v55 = vunpack.i.h.bf16 %v6523_v2  ;;  %v5146_v17 = vunpack.i.l.bf16 %v6523_v2 }
 0x106   :  { %v8542_v41 = vunpack.i.l.bf16 %v8541_v42  ;;  %v8543_v3 = vunpack.i.h.bf16 %v6275_v8  ;;  %v162_v18 = vmul.f32 %v147_v4, %v8544_v59  ;;  %v163_v10 = vmul.f32 %v151_v38, %v8544_v59 }
 0x107   :  { %v171_v14 = vmul.f32 %v147_v4, %v8545_v40  ;;  %v172_v11 = vmul.f32 %v151_v38, %v8545_v40  ;;  %v6547_v46 = vmul.f32 %v8546_v33, %v1083_v29  ;;  %v6550_v35 = vmul.f32 %v8540_v19, %v1091_v31 }
 0x108   :  { %v423_v5 = vsel %vm421_vm3, %v416_v7, %v8542_v41  ;;  %v424_v51 = vsel %vm421_vm3, %v8543_v3, %v416_v7  ;;  %v370_v15 = vmul.f32 %v355_v28, %v5807_v62  ;;  %v371_v8 = vmul.f32 %v359_v22, %v5807_v62 }
 0x109   :  { %v275_v52 = vadd.f32 %v257_v58, %v162_v18  ;;  %v276_v45 = vadd.f32 %v258_v61, %v163_v10  ;;  %v379_v48 = vmul.f32 %v355_v28, %v5793_v57  ;;  %v380_v50 = vmul.f32 %v359_v22, %v5793_v57  ;;  %v6566_v58 = vpop.permute.xlu0 %5149  ;;  %v729_v18 = vpop.permute.xlu1 %728 }
 0x10a   :  { %v848_v7 = vsel %vm845_vm6, %v5146_v17, %v5147_v55  ;;  %v8547_v29 = vunpack.i.h.bf16 %v6368_v49  ;;  %v468_v19 = vrot.slane %v424_v51, %v5625_v12  ;;  %v472_v62 = vrot.slane %v423_v5, %v5625_v12 }
 0x10b   :  { %v284_v61 = vadd.f32 %v266_v23, %v171_v14  ;;  %v285_v4 = vadd.f32 %v267_v32, %v172_v11  ;;  %v388_v38 = vadd.f32 %v370_v15, %v275_v52  ;;  %v389_v57 = vadd.f32 %v371_v8, %v276_v45 }
 0x10c   :  { %v849_v31 = vsel %vm845_vm6, %v8547_v29, %v5146_v17  ;;  %v888_v22 = vrot.slane %v848_v7, %v5625_v12  ;;  %v483_v42 = vmul.f32 %v468_v19, %v5881_v39  ;;  %v484_v49 = vmul.f32 %v472_v62, %v5881_v39 }
 0x10d   :  { %v884_v28 = vrot.slane %v849_v31, %v5625_v12  ;;  %v492_v17 = vmul.f32 %v468_v19, %v5857_v26  ;;  %v493_v41 = vmul.f32 %v472_v62, %v5857_v26  ;;  %v5152_v5 = vunpack.i.h.bf16 %v6566_v58 }
 0x10e   :  { %v5151_v3 = vunpack.i.l.bf16 %v6566_v58  ;;  %v397_v23 = vadd.f32 %v379_v48, %v284_v61  ;;  %v398_v32 = vadd.f32 %v380_v50, %v285_v4  ;;  %v906_v59 = vmul.f32 %v888_v22, %v6068_v63  ;;  %v8551_v61 = vld [vmem:[#allocation28_spill] sm:$0xff] }
 0x10f   :  { %v905_v51 = vmul.f32 %v884_v28, %v6068_v63  ;;  %v6579_v10 = vmul.f32 %v8546_v33, %v1092_v25  ;;  %v914_v39 = vmul.f32 %v884_v28, %v6050_v16  ;;  %v915_v40 = vmul.f32 %v888_v22, %v6050_v16  ;;  %v616_v28 = vpop.permute.xlu0 %615 }
 0x110   :  { %v502_v14 = vadd.f32 %v484_v49, %v389_v57  ;;  %v501_v11 = vadd.f32 %v483_v42, %v388_v38  ;;  %v510_v15 = vadd.f32 %v492_v17, %v397_v23  ;;  %v511_v8 = vadd.f32 %v493_v41, %v398_v32  ;;  %v8552_v42 = vld [vmem:[#allocation31_spill] sm:$0xff] }
 0x111   :  { %v923_v26 = vadd.f32 %v905_v51, %v6491_v0  ;;  %v961_v52 = vsel %vm958_vm7, %v5151_v3, %v5152_v5  ;;  %v8548_v45 = vunpack.i.h.bf16 %v6415_v13  ;;  %v8549_v33 = vunpack.i.h.bf16 %v6031_v47 }
 0x112   :  { %v8550_v0 = vunpack.i.h.bf16 %v6438_v1  ;;  %v924_v7 = vadd.f32 %v906_v59, %v6497_v21  ;;  %v1001_v31 = vrot.slane %v961_v52, %v5625_v12  ;;  %v932_v19 = vadd.f32 %v914_v39, %v6499_v34  ;;  %v8553_v34 = vld [vmem:[#allocation27_spill] sm:$0xff] }
 0x113   :  { %v962_v25 = vsel %vm958_vm7, %v8548_v45, %v5151_v3  ;;  %v733_v48 = vsel %vm732_vm5, %v729_v18, %v8549_v33  ;;  %v933_v47 = vadd.f32 %v915_v40, %v6501_v53  ;;  %v587_v4 = vadd.f32 %v8551_v61, %v502_v14  ;;  %v8554_v53 = vld [vmem:[#allocation29_spill] sm:$0xff] }
 0x114   :  { %v734_v50 = vsel %vm732_vm5, %v8550_v0, %v729_v18  ;;  %v997_v29 = vrot.slane %v962_v25, %v5625_v12  ;;  %v783_v62 = vrot.slane %v733_v48, %v5625_v12  ;;  %v1019_v38 = vmul.f32 %v1001_v31, %v6155_v36  ;;  %v955_v25 = vpop.permute.xlu1 %954 }
 0x115   :  { %v779_v13 = vrot.slane %v734_v50, %v5625_v12  ;;  %v1028_v57 = vmul.f32 %v1001_v31, %v6134_v54  ;;  %v596_v49 = vadd.f32 %v8552_v42, %v511_v8  ;;  %v586_v17 = vadd.f32 %v8553_v34, %v501_v11 }
 0x116   :  { %v1018_v1 = vmul.f32 %v997_v29, %v6155_v36  ;;  %v1027_v21 = vmul.f32 %v997_v29, %v6134_v54  ;;  %v595_v41 = vadd.f32 %v8554_v53, %v510_v15  ;;  %v1037_v23 = vadd.f32 %v1019_v38, %v924_v7 }
 0x117   :  { %v794_v22 = vmul.f32 %v779_v13, %v6015_v60  ;;  %v1046_v51 = vadd.f32 %v1028_v57, %v933_v47  ;;  %v8555_v59 = vunpack.i.h.bf16 %v8512_v37  ;;  %v8556_v39 = vunpack.i.h.bf16 %v6373_v44  ;;  %v8557_v47 = vld [vmem:[#allocation19_spill] sm:$0xff] }
 0x118   :  { %v1036_v3 = vadd.f32 %v1018_v1, %v923_v26  ;;  %v1045_v32 = vadd.f32 %v1027_v21, %v932_v19  ;;  %v6626_v14 = vpack.i.bf16 %v6550_v35, %v6526_v9  ;;  %v6630_v26 = vpack.i.bf16 %v6579_v10, %v6547_v46  ;;  %v842_v19 = vpop.permute.xlu0 %841  ;;  %v8558_v1 = vld [vmem:[#allocation20_spill] sm:$0xff] }
 0x119   :  { %v620_v18 = vsel %vm619_vm4, %v616_v28, %v8555_v59  ;;  %v621_v40 = vsel %vm619_vm4, %v8556_v39, %v616_v28  ;;  %v1067_v37 = vadd.f32 %v6266_v6, %v1037_v23  ;;  %v1076_v8 = vadd.f32 %v6235_v20, %v1046_v51  ;;  %v8560_v23 = vld [vmem:[#allocation30_spill] sm:$0xff] }
 0x11a   :  { %v1066_v11 = vadd.f32 %v6266_v6, %v1036_v3  ;;  %v1075_v15 = vadd.f32 %v6235_v20, %v1045_v32  ;;  %v803_v44 = vmul.f32 %v779_v13, %v8511_v30  ;;  %v666_v52 = vrot.slane %v621_v40, %v5625_v12  ;;  %5169 = vrot.lane.b32.xlu1 %v6626_v14, %s5555_s11 }
 0x11b   :  { %v670_v45 = vrot.slane %v620_v18, %v5625_v12  ;;  %5174 = vrot.lane.b32.xlu0 %v6630_v26, %s5555_s11  ;;  %v1085_v48 = vmax.f32 %v1067_v37, 0.0  ;;  %v1094_v50 = vmax.f32 %v1076_v8, 0.0  ;;  %v8559_v57 = vunpack.i.h.bf16 %v6187_v24  ;;  %v8564_v37 = vld [vmem:[#allocation5_spill] sm:$0xff] }
 0x11c   :  { %v1084_v33 = vmax.f32 %v1066_v11, 0.0  ;;  %v1093_v0 = vmax.f32 %v1075_v15, 0.0  ;;  %v681_v7 = vmul.f32 %v666_v52, %v8517_v43  ;;  %v690_v31 = vmul.f32 %v666_v52, %v8518_v27 }
 0x11d   :  { %v682_v29 = vmul.f32 %v670_v45, %v8517_v43  ;;  %v691_v13 = vmul.f32 %v670_v45, %v8518_v27  ;;  %v6651_v38 = vmul.f32 %v8558_v1, %v1085_v48  ;;  %v959_v28 = vsel %vm958_vm7, %v955_v25, %v8559_v57 }
 0x11e   :  { %v6648_v61 = vmul.f32 %v8557_v47, %v1084_v33  ;;  %v6654_v21 = vmul.f32 %v8557_v47, %v1093_v0  ;;  %v699_v43 = vadd.f32 %v681_v7, %v586_v17  ;;  %v708_v34 = vadd.f32 %v690_v31, %v595_v41 }
 0x11f   :  { %v700_v42 = vadd.f32 %v682_v29, %v587_v4  ;;  %v709_v53 = vadd.f32 %v691_v13, %v596_v49  ;;  %v6661_v27 = vmul.f32 %v8558_v1, %v1094_v50  ;;  %v960_v3 = vsel %vm958_vm7, %v5152_v5, %v955_v25 }
 0x120   :  { %v8561_v32 = vunpack.i.h.bf16 %v8560_v23  ;;  %v847_v4 = vsel %vm845_vm6, %v5147_v55, %v842_v19  ;;  %v795_v49 = vmul.f32 %v783_v62, %v6015_v60  ;;  %v804_v17 = vmul.f32 %v783_v62, %v8511_v30  ;;  %v8562_v62 = vld [vmem:[#allocation6_spill] sm:$0xff] }
 0x121   :  { %v1009_v41 = vrot.slane %v959_v28, %v5625_v12  ;;  %v1005_v58 = vrot.slane %v960_v3, %v5625_v12  ;;  %v812_v51 = vadd.f32 %v794_v22, %v699_v43  ;;  %v821_v5 = vadd.f32 %v803_v44, %v708_v34  ;;  %v8563_v22 = vld [vmem:[#allocation15_spill] sm:$0xff] }
 0x122   :  { %v846_v24 = vsel %vm845_vm6, %v842_v19, %v8561_v32  ;;  %v892_v59 = vrot.slane %v847_v4, %v5625_v12  ;;  %v813_v18 = vadd.f32 %v795_v49, %v700_v42  ;;  %v822_v39 = vadd.f32 %v804_v17, %v709_v53 }
 0x123   :  { %v896_v40 = vrot.slane %v846_v24, %v5625_v12  ;;  %v6683_v2 = vpack.i.bf16 %v6654_v21, %v6648_v61  ;;  %v6689_v55 = vpack.i.bf16 %v6661_v27, %v6651_v38  ;;  %v1133_v11 = vrot.slane %v8563_v22, %v8562_v62 }
 0x124   :  { %v907_v60 = vmul.f32 %v892_v59, %v6068_v63  ;;  %v916_v30 = vmul.f32 %v892_v59, %v6050_v16  ;;  %v1137_v15 = vrot.slane %v8563_v22, %v8564_v37  ;;  %v1020_v52 = vmul.f32 %v1005_v58, %v6155_v36 }
 0x125   :  { %v908_v8 = vmul.f32 %v896_v40, %v6068_v63  ;;  %v917_v44 = vmul.f32 %v896_v40, %v6050_v16  ;;  %5179 = vrot.lane.b32.xlu1 %v6683_v2, %s5555_s11  ;;  %v1029_v45 = vmul.f32 %v1005_v58, %v6134_v54  ;;  %5184 = vrot.lane.b32.xlu0 %v6689_v55, %s5555_s11 }
 0x126   :  { %v925_v25 = vadd.f32 %v907_v60, %v812_v51  ;;  %v934_v33 = vadd.f32 %v916_v30, %v821_v5  ;;  %v1021_v48 = vmul.f32 %v1009_v41, %v6155_v36  ;;  %v1030_v0 = vmul.f32 %v1009_v41, %v6134_v54  ;;  %v8567_v51 = vld [vmem:[#allocation22_spill] sm:$0xff] }
 0x127   :  { %v926_v50 = vadd.f32 %v908_v8, %v813_v18  ;;  %v935_v63 = vadd.f32 %v917_v44, %v822_v39  ;;  %v1178_v13 = vrot.slane %v1133_v11, %v5625_v12  ;;  %v1182_v1 = vrot.slane %v1137_v15, %v5625_v12 }
 0x128   :  { %v1038_v7 = vadd.f32 %v1020_v52, %v925_v25  ;;  %v1047_v16 = vadd.f32 %v1029_v45, %v934_v33  ;;  %v2703_v24 = vpack.c.bf16 %v6579_v10, %v6547_v46  ;;  %v2705_v4 = vpack.c.bf16 %v6661_v27, %v6651_v38  ;;  %v6824_v25 = vld [vmem:[%s8393_s4 + $0xc] sm:$0xff]  }
 0x129   :  { %v1039_v29 = vadd.f32 %v1021_v48, %v926_v50  ;;  %v1048_v31 = vadd.f32 %v1030_v0, %v935_v63  ;;  %v2702_v49 = vpack.c.bf16 %v6550_v35, %v6526_v9  ;;  %v2704_v17 = vpack.c.bf16 %v6654_v21, %v6648_v61  ;;  %v6840_v48 = vld [vmem:[%s8393_s4 + $0x14] ss:$0 sps:$4 sm:$0xff]   ;;  %v7303_v61 = vld [vmem:[%s8393_s4 + $0x38] ss:$0 sps:$4 sm:$0xff]  }
 0x12a   :  { %v1068_v19 = vadd.f32 %v6266_v6, %v1038_v7  ;;  %v1077_v47 = vadd.f32 %v6235_v20, %v1047_v16  ;;  %v8568_v33 = vmov 0   ;;  %v7282_v27 = vld [vmem:[%s8393_s4 + $0x30] sm:$0xff]  }
 0x12b   :  { %v1069_v57 = vadd.f32 %v6266_v6, %v1039_v29  ;;  %v1078_v36 = vadd.f32 %v6235_v20, %v1048_v31  ;;  %v8565_v20 = vld [vmem:[#allocation18_spill] sm:$0xff]  ;;  %v8566_v6 = vld [vmem:[#allocation21_spill] sm:$0xff]  ;;  %v2740_v46 = vsel %vm1353_vm8, %v2704_v17, 0 }
 0x12c   :  { %v1086_v28 = vmax.f32 %v1068_v19, 0.0  ;;  %v1095_v54 = vmax.f32 %v1077_v47, 0.0  ;;  %v8573_v10 = vld [vmem:[#allocation38_spill] sm:$0xff] }
 0x12d   :  { %v1087_v43 = vmax.f32 %v1069_v57, 0.0  ;;  %v1096_v42 = vmax.f32 %v1078_v36, 0.0 }
 0x12e   :  { %v6711_v34 = vmul.f32 %v1178_v13, %v1086_v28  ;;  %v6713_v53 = vmul.f32 %v1178_v13, %v1095_v54 }
 0x12f   :  { %v6715_v3 = vmul.f32 %v1182_v1, %v1087_v43  ;;  %v6717_v23 = vmul.f32 %v1182_v1, %v1096_v42 }
 0x130   :  { %v6721_v32 = vpack.i.bf16 %v6713_v53, %v6711_v34  ;;  %v2706_v58 = vpack.c.bf16 %v6713_v53, %v6711_v34 }
 0x131   :  { %v6725_v12 = vpack.i.bf16 %v6717_v23, %v6715_v3  ;;  %v2707_v41 = vpack.c.bf16 %v6717_v23, %v6715_v3 }
 0x132   :  { %5189 = vrot.lane.b32.xlu1 %v6721_v32, %s5555_s11 }
 0x133   :  { %5194 = vrot.lane.b32.xlu0 %v6725_v12, %s5555_s11 }
 0x136   :  { %5199 = vrot.lane.b32.xlu1 %v8565_v20, %s5554_s0 }
 0x137   :  { %5204 = vrot.lane.b32.xlu0 %v6626_v14, %s5554_s0 }
 0x13a   :  { %5209 = vrot.lane.b32.xlu1 %v6630_v26, %s5554_s0 }
 0x13b   :  { %5214 = vrot.lane.b32.xlu0 %v8566_v6, %s5554_s0 }
 0x13e   :  { %5219 = vrot.lane.b32.xlu1 %v8567_v51, %s5554_s0 }
 0x13f   :  { %5224 = vrot.lane.b32.xlu0 %v6689_v55, %s5554_s0 }
 0x142   :  { %5229 = vrot.lane.b32.xlu1 %v6721_v32, %s5554_s0 }
 0x143   :  { %5234 = vrot.lane.b32.xlu0 %v6725_v12, %s5554_s0 }
 0x146   :  { %5239 = vrot.lane.b32.xlu1 %v6683_v2, %s5554_s0 }
 0x147   :  { %5244 = vrot.lane.b32.xlu0 %v8566_v6, %s5556_s14 }
 0x14a   :  { %5249 = vrot.lane.b32.xlu1 %v8565_v20, %s5556_s14 }
 0x14b   :  { %5254 = vrot.lane.b32.xlu0 %v8567_v51, %s5556_s14 }
 0x14e   :  { %5259 = vrot.lane.b32.xlu1 %v6626_v14, %s5556_s14 }
 0x14f   :  { %5264 = vrot.lane.b32.xlu0 %v6630_v26, %s5556_s14 }
 0x152   :  { %5269 = vrot.lane.b32.xlu1 %v6683_v2, %s5556_s14 }
 0x153   :  { %5274 = vrot.lane.b32.xlu0 %v6689_v55, %s5556_s14 }
 0x156   :  { %5279 = vrot.lane.b32.xlu1 %v6721_v32, %s5556_s14 }
 0x157   :  { %5284 = vrot.lane.b32.xlu0 %v6725_v12, %s5556_s14 }
 0x15a   :  { %5289 = vrot.lane.b32.xlu1 %v8565_v20, %s5557_s19 }
 0x15b   :  { %5294 = vrot.lane.b32.xlu0 %v6626_v14, %s5557_s19 }
 0x15c   :  { %v5155_v5 = vpop.permute.xlu0 %5154  ;;  %v5160_v39 = vpop.permute.xlu1 %5159 }
 0x15d   :  { %v5157_v59 = vunpack.i.h.bf16 %v5155_v5  ;;  %v5156_v18 = vunpack.i.l.bf16 %v5155_v5  ;;  %v5162_v40 = vunpack.i.h.bf16 %v5160_v39  ;;  %v5161_v60 = vunpack.i.l.bf16 %v5160_v39 }
 0x15e   :  { %5299 = vrot.lane.b32.xlu1 %v6630_v26, %s5557_s19 }
 0x15f   :  { %5304 = vrot.lane.b32.xlu0 %v8566_v6, %s5557_s19  ;;  %v1321_v30 = vsel %vm195_vm1, %v5156_v18, %v5161_v60  ;;  %v1322_v62 = vsel %vm195_vm1, %v5157_v59, %v5162_v40 }
 0x160   :  { %v1326_v22 = vpack.c.bf16 %v1322_v62, %v1321_v30 }
 0x162   :  { %5309 = vrot.lane.b32.xlu1 %v8567_v51, %s5557_s19  ;;  %4726 = vmatprep.subr.msk.bf16.mxu0 %vm1353_vm8, %v1326_v22 }
 0x163   :  { %5314 = vrot.lane.b32.xlu0 %v6689_v55, %s5557_s19 }
 0x166   :  { %5319 = vrot.lane.b32.xlu1 %v6721_v32, %s5557_s19  ;;  %v6802_v11 = vpop.permute.xlu0 %5164 }
 0x167   :  { %5324 = vrot.lane.b32.xlu0 %v6725_v12, %s5557_s19  ;;  %v5167_v37 = vunpack.i.h.bf16 %v6802_v11  ;;  %v5166_v15 = vunpack.i.l.bf16 %v6802_v11 }
 0x169   :  { %v1323_v8 = vsel %vm195_vm1, %v5166_v15, %v5156_v18  ;;  %v1324_v44 = vsel %vm195_vm1, %v5167_v37, %v5157_v59 }
 0x16a   :  { %5329 = vrot.lane.b32.xlu1 %v6683_v2, %s5557_s19  ;;  %v1325_v52 = vpack.c.bf16 %v1324_v44, %v1323_v8 }
 0x16b   :  { %5334 = vrot.lane.b32.xlu0 %v6626_v14, %s5558_s28 }
 0x16c   :  { %v1355_v45 = vsel %vm1353_vm8, %v1325_v52, 0 }
 0x16d   :  { %1396 = vmatpush1.bf16.msra.mxu0 %v1355_v45 }
 0x16e   :  { %5339 = vrot.lane.b32.xlu1 %v6630_v26, %s5558_s28 }
 0x16f   :  { %5344 = vrot.lane.b32.xlu0 %v6683_v2, %s5558_s28 }
 0x170   :  { %4727 = vmatmul.mubr.msk.bf16.vlgmr.msra.gmra.mxu0 %vm1346_vm9, %v6824_v25 }
 0x171   :  { %1423 = vmatprep.mubr.bf16.mxu0 %v8568_v33 }
 0x172   :  { %5349 = vrot.lane.b32.xlu1 %v8566_v6, %s5558_s28 }
 0x173   :  { %5354 = vrot.lane.b32.xlu0 %v8565_v20, %s5558_s28 }
 0x176   :  { %5359 = vrot.lane.b32.xlu1 %v6721_v32, %s5558_s28 }
 0x177   :  { %5364 = vrot.lane.b32.xlu0 %v6725_v12, %s5558_s28 }
 0x178   :  { %4728 = vmatmul.mubr.msk.bf16.gmra.mxu0 %vm1346_vm9, %v6840_v48 }
 0x179   :  { %1515 = vmatprep.mubr.bf16.mxu0 %v8568_v33 }
 0x17a   :  { %5369 = vrot.lane.b32.xlu1 %v8567_v51, %s5558_s28 }
 0x17b   :  { %5374 = vrot.lane.b32.xlu0 %v6689_v55, %s5558_s28 }
 0x17e   :  { %5379 = vrot.lane.b32.xlu1 %v8566_v6, %s5559_s9 }
 0x17f   :  { %5384 = vrot.lane.b32.xlu0 %v8565_v20, %s5559_s9 }
 0x182   :  { %5389 = vrot.lane.b32.xlu1 %v6626_v14, %s5559_s9 }
 0x183   :  { %5394 = vrot.lane.b32.xlu0 %v6630_v26, %s5559_s9 }
 0x186   :  { %5399 = vrot.lane.b32.xlu1 %v6683_v2, %s5559_s9 }
 0x187   :  { %5404 = vrot.lane.b32.xlu0 %v6689_v55, %s5559_s9 }
 0x18a   :  { %5409 = vrot.lane.b32.xlu1 %v6721_v32, %s5559_s9 }
 0x18b   :  { %5414 = vrot.lane.b32.xlu0 %v6725_v12, %s5559_s9 }
 0x18c   :  { %v5170_v0 = vpop.permute.xlu1 %5169 }
 0x18d   :  { %v5175_v50 = vpop.permute.xlu0 %5174  ;;  %v5172_v63 = vunpack.i.h.bf16 %v5170_v0  ;;  %v5171_v7 = vunpack.i.l.bf16 %v5170_v0 }
 0x18e   :  { %5419 = vrot.lane.b32.xlu1 %v8567_v51, %s5559_s9  ;;  %v5177_v16 = vunpack.i.h.bf16 %v5175_v50  ;;  %v5176_v29 = vunpack.i.l.bf16 %v5175_v50 }
 0x18f   :  { %5424 = vrot.lane.b32.xlu0 %v6626_v14, %s5560_s16  ;;  %v1319_v19 = vsel %vm195_vm1, %v5161_v60, %v5171_v7  ;;  %v1320_v47 = vsel %vm195_vm1, %v5162_v40, %v5172_v63 }
 0x190   :  { %v1317_v31 = vsel %vm195_vm1, %v5171_v7, %v5176_v29  ;;  %v1318_v13 = vsel %vm195_vm1, %v5172_v63, %v5177_v16  ;;  %v1327_v57 = vpack.c.bf16 %v1320_v47, %v1319_v19 }
 0x191   :  { %v1328_v1 = vpack.c.bf16 %v1318_v13, %v1317_v31 }
 0x192   :  { %5429 = vrot.lane.b32.xlu1 %v6630_v26, %s5560_s16  ;;  %v1361_v36 = vsel %vm1353_vm8, %v1327_v57, 0 }
 0x193   :  { %5434 = vrot.lane.b32.xlu0 %v6683_v2, %s5560_s16  ;;  %4729 = vmatprep.subr.msk.bf16.mxu1 %vm1353_vm8, %v1328_v1 }
 0x194   :  { %1447 = vmatpush1.bf16.msra.mxu1 %v1361_v36 }
 0x196   :  { %5439 = vrot.lane.b32.xlu1 %v8566_v6, %s5560_s16 }
 0x197   :  { %5444 = vrot.lane.b32.xlu0 %v8565_v20, %s5560_s16  ;;  %v5180_v28 = vpop.permute.xlu1 %5179  ;;  %4730 = vmatmul.mubr.msk.bf16.vlgmr.msra.gmra.mxu1 %vm1346_vm9, %v6824_v25  ;;  %v5185_v42 = vpop.permute.xlu0 %5184 }
 0x198   :  { %v5182_v54 = vunpack.i.h.bf16 %v5180_v28  ;;  %v5181_v43 = vunpack.i.l.bf16 %v5180_v28  ;;  %1474 = vmatprep.mubr.bf16.mxu1 %v8568_v33  ;;  %v5187_v5 = vunpack.i.h.bf16 %v5185_v42  ;;  %v5186_v59 = vunpack.i.l.bf16 %v5185_v42 }
 0x19a   :  { %5449 = vrot.lane.b32.xlu1 %v6721_v32, %s5560_s16  ;;  %v1315_v18 = vsel %vm195_vm1, %v5176_v29, %v5181_v43  ;;  %v1316_v39 = vsel %vm195_vm1, %v5177_v16, %v5182_v54  ;;  %v1314_v40 = vsel %vm195_vm1, %v5182_v54, %v5187_v5  ;;  %v1313_v60 = vsel %vm195_vm1, %v5181_v43, %v5186_v59 }
 0x19b   :  { %5454 = vrot.lane.b32.xlu0 %v6725_v12, %s5560_s16  ;;  %v1329_v30 = vpack.c.bf16 %v1316_v39, %v1315_v18  ;;  %v1330_v62 = vpack.c.bf16 %v1314_v40, %v1313_v60 }
 0x19d   :  { %v1367_v22 = vsel %vm1353_vm8, %v1329_v30, 0  ;;  %4732 = vmatprep.subr.msk.bf16.mxu0 %vm1353_vm8, %v1330_v62  ;;  %v4581_v30 = vld [vmem:[%s8394_s5] sm:$0xff] }
 0x19e   :  { %5459 = vrot.lane.b32.xlu1 %v8567_v51, %s5560_s16  ;;  %1498 = vmatpush1.bf16.msra.mxu0 %v1367_v22 }
 0x19f   :  { %5464 = vrot.lane.b32.xlu0 %v6689_v55, %s5560_s16  ;;  %4731 = vmatmul.mubr.msk.bf16.gmra.mxu1 %vm1346_vm9, %v6840_v48 }
 0x1a0   :  { %1566 = vmatprep.mubr.bf16.mxu1 %v8568_v33 }
 0x1a1   :  { %4733 = vmatmul.mubr.msk.bf16.vlgmr.msra.gmra.mxu0 %vm1346_vm9, %v6824_v25 }
 0x1a2   :  { %5469 = vrot.lane.b32.xlu1 %v8566_v6, %s5561_s22  ;;  %1525 = vmatprep.mubr.bf16.mxu0 %v8568_v33 }
 0x1a3   :  { %5474 = vrot.lane.b32.xlu0 %v8565_v20, %s5561_s22 }
 0x1a4   :  { %v5190_v8 = vpop.permute.xlu1 %5189 }
 0x1a5   :  { %v5192_v44 = vunpack.i.h.bf16 %v5190_v8  ;;  %v5191_v52 = vunpack.i.l.bf16 %v5190_v8  ;;  %v5195_v45 = vpop.permute.xlu0 %5194 }
 0x1a6   :  { %v5197_v0 = vunpack.i.h.bf16 %v5195_v45  ;;  %v5196_v50 = vunpack.i.l.bf16 %v5195_v45  ;;  %5479 = vrot.lane.b32.xlu1 %v6626_v14, %s5561_s22  ;;  %v4582_v45 = vld [vmem:[%s8394_s5 + $0x8] sm:$0xff] }
 0x1a7   :  { %v1311_v6 = vsel %vm195_vm1, %v5186_v59, %v5191_v52  ;;  %v1312_v63 = vsel %vm195_vm1, %v5187_v5, %v5192_v44  ;;  %5484 = vrot.lane.b32.xlu0 %v6630_v26, %s5561_s22 }
 0x1a8   :  { %v1310_v20 = vsel %vm195_vm1, %v5192_v44, %v5197_v0  ;;  %v1307_v7 = vsel %vm195_vm1, %v5196_v50, %v5166_v15  ;;  %v1308_v14 = vsel %vm195_vm1, %v5197_v0, %v5167_v37  ;;  %v1309_v16 = vsel %vm195_vm1, %v5191_v52, %v5196_v50  ;;  %v5200_v29 = vpop.permute.xlu1 %5199 }
 0x1a9   :  { %v1332_v31 = vpack.c.bf16 %v1310_v20, %v1309_v16  ;;  %v1333_v13 = vpack.c.bf16 %v1308_v14, %v1307_v7  ;;  %v5202_v26 = vunpack.i.h.bf16 %v5200_v29  ;;  %v5201_v19 = vunpack.i.l.bf16 %v5200_v29  ;;  %v5205_v47 = vpop.permute.xlu0 %5204  ;;  %4734 = vmatmul.mubr.msk.bf16.gmra.mxu0 %vm1346_vm9, %v6840_v48 }
 0x1aa   :  { %v5207_v1 = vunpack.i.h.bf16 %v5205_v47  ;;  %v5206_v57 = vunpack.i.l.bf16 %v5205_v47  ;;  %5489 = vrot.lane.b32.xlu1 %v6683_v2, %s5561_s22  ;;  %v1331_v15 = vpack.c.bf16 %v1312_v63, %v1311_v6  ;;  %4918 = vmatprep.mubr.msk.bf16.mxu0 %vm1346_vm9, %v6824_v25 }
 0x1ab   :  { %5494 = vrot.lane.b32.xlu0 %v6689_v55, %s5561_s22  ;;  %4735 = vmatprep.subr.msk.bf16.mxu1 %vm1353_vm8, %v1332_v31  ;;  %v1379_v11 = vsel %vm1353_vm8, %v1333_v13, 0 }
 0x1ac   :  { %4970 = vmatprep.subr.msk.bf16.mxu0 %vm1353_vm8, %v1333_v13  ;;  %v1373_v37 = vsel %vm1353_vm8, %v1331_v15, 0  ;;  %v6948_v36 = vpop.permute.xlu1 %5209  ;;  %v1254_v2 = vsel %vm100_vm0, %v5202_v26, %v5207_v1  ;;  %v1253_v28 = vsel %vm100_vm0, %v5201_v19, %v5206_v57  ;;  %v7010_v15 = vld [vmem:[%s8393_s4] sm:$0xff]  }
 0x1ad   :  { %1549 = vmatpush1.bf16.msra.mxu1 %v1373_v37  ;;  %4917 = vmatpush3.bf16.msra.mxu0 %v1379_v11  ;;  %v5212_v55 = vunpack.i.h.bf16 %v6948_v36  ;;  %v5211_v54 = vunpack.i.l.bf16 %v6948_v36  ;;  %v5215_v43 = vpop.permute.xlu0 %5214  ;;  %v1261_v62 = vpack.c.bf16 %v1254_v2, %v1253_v28 }
 0x1ae   :  { %v5217_v42 = vunpack.i.h.bf16 %v5215_v43  ;;  %v5216_v5 = vunpack.i.l.bf16 %v5215_v43  ;;  %5499 = vrot.lane.b32.xlu1 %v6721_v32, %s5561_s22 }
 0x1af   :  { %v1251_v59 = vsel %vm100_vm0, %v5206_v57, %v5211_v54  ;;  %v1252_v18 = vsel %vm100_vm0, %v5207_v1, %v5212_v55  ;;  %5504 = vrot.lane.b32.xlu0 %v6725_v12, %s5561_s22  ;;  %v1654_v50 = vsel %vm1353_vm8, %v1261_v62, 0 }
 0x1b0   :  { %v1262_v39 = vpack.c.bf16 %v1252_v18, %v1251_v59  ;;  %v1256_v40 = vsel %vm100_vm0, %v5217_v42, %v5202_v26  ;;  %v1255_v60 = vsel %vm100_vm0, %v5216_v5, %v5201_v19  ;;  %4736 = vmatmul.mubr.msk.bf16.vlgmr.msra.gmra.mxu1 %vm1346_vm9, %v6824_v25  ;;  %v5220_v32 = vpop.permute.xlu1 %5219 }
 0x1b1   :  { %v1260_v22 = vpack.c.bf16 %v1256_v40, %v1255_v60  ;;  %v5222_v8 = vunpack.i.h.bf16 %v5220_v32  ;;  %v5221_v44 = vunpack.i.l.bf16 %v5220_v32  ;;  %v5225_v12 = vpop.permute.xlu0 %5224  ;;  %1576 = vmatprep.mubr.bf16.mxu1 %v8568_v33  ;;  %4919 = vmatmul.mubr.msk.bf16.vlgmr.msra.gmra.mxu0 %vm1346_vm9, %v6840_v48 }
 0x1b2   :  { %5509 = vrot.lane.b32.xlu1 %v8567_v51, %s5561_s22  ;;  %4745 = vmatprep.subr.msk.bf16.mxu0 %vm1353_vm8, %v1262_v39  ;;  %v4583_v51 = vld [vmem:[%s8394_s5 + $0x10] sm:$0xff]  ;;  %v5227_v63 = vunpack.i.h.bf16 %v5225_v12  ;;  %v5226_v20 = vunpack.i.l.bf16 %v5225_v12 }
 0x1b3   :  { %v1257_v25 = vsel %vm100_vm0, %v5221_v44, %v5216_v5  ;;  %v1258_v52 = vsel %vm100_vm0, %v5222_v8, %v5217_v42  ;;  %4586 = vperm.xlu0 %4991, %v4581_v30   ;;  %4742 = vmatprep.subr.msk.bf16.mxu1 %vm1353_vm8, %v1260_v22 }
 0x1b4   :  { %v5230_v0 = vpop.permute.xlu1 %5229  ;;  %v1259_v6 = vpack.c.bf16 %v1258_v52, %v1257_v25  ;;  %1740 = vmatpush1.bf16.msra.mxu0 %v1654_v50  ;;  %1757 = vmatprep.mubr.bf16.mxu0 %v8568_v33 }
 0x1b5   :  { %v5232_v7 = vunpack.i.h.bf16 %v5230_v0  ;;  %v5231_v14 = vunpack.i.l.bf16 %v5230_v0  ;;  %v5235_v16 = vpop.permute.xlu0 %5234  ;;  %v7053_v0 = vld [vmem:[%s8393_s4 + $0x8] ss:$0 sps:$4 sm:$0xff]  }
 0x1b6   :  { %v5237_v29 = vunpack.i.h.bf16 %v5235_v16  ;;  %v5236_v31 = vunpack.i.l.bf16 %v5235_v16  ;;  %4591 = vperm.xlu1 %4992, %v4582_v45   ;;  %v1648_v13 = vsel %vm1353_vm8, %v1259_v6, 0 }
 0x1b7   :  { %v1245_v26 = vsel %vm100_vm0, %v5226_v20, %v5231_v14  ;;  %v1246_v19 = vsel %vm100_vm0, %v5227_v63, %v5232_v7  ;;  %4596 = vperm.xlu0 %4991, %v4583_v51   ;;  %1689 = vmatpush1.bf16.msra.mxu1 %v1648_v13 }
 0x1b8   :  { %v1244_v47 = vsel %vm100_vm0, %v5232_v7, %v5237_v29  ;;  %v1243_v1 = vsel %vm100_vm0, %v5231_v14, %v5236_v31  ;;  %4737 = vmatmul.mubr.msk.bf16.gmra.mxu1 %vm1346_vm9, %v6840_v48  ;;  %v5240_v57 = vpop.permute.xlu1 %5239  ;;  %v1242_v43 = vsel %vm100_vm0, %v5237_v29, %v5222_v8  ;;  %v1265_v42 = vpack.c.bf16 %v1246_v19, %v1245_v26 }
 0x1b9   :  { %v1266_v11 = vpack.c.bf16 %v1244_v47, %v1243_v1  ;;  %v5242_v37 = vunpack.i.h.bf16 %v5240_v57  ;;  %v5241_v2 = vunpack.i.l.bf16 %v5240_v57  ;;  %v5245_v28 = vpop.permute.xlu0 %5244  ;;  %1706 = vmatprep.mubr.bf16.mxu1 %v8568_v33  ;;  %v1241_v39 = vsel %vm100_vm0, %v5236_v31, %v5221_v44  ;;  %4746 = vmatmul.mubr.msk.bf16.vlgmr.msra.gmra.mxu0 %vm1346_vm9, %v7010_v15 }
 0x1ba   :  { %v1666_v32 = vsel %vm1353_vm8, %v1265_v42, 0  ;;  %v5246_v62 = vunpack.i.l.bf16 %v5245_v28  ;;  %1767 = vmatprep.mubr.bf16.mxu0 %v8568_v33  ;;  %v1267_v25 = vpack.c.bf16 %v1242_v43, %v1241_v39 }
 0x1bb   :  { %v1247_v5 = vsel %vm100_vm0, %v5241_v2, %v5226_v20  ;;  %v1248_v48 = vsel %vm100_vm0, %v5242_v37, %v5227_v63  ;;  %v1249_v59 = vsel %vm100_vm0, %v5211_v54, %v5241_v2  ;;  %v1250_v18 = vsel %vm100_vm0, %v5212_v55, %v5242_v37  ;;  %4751 = vmatprep.subr.msk.bf16.mxu0 %vm1353_vm8, %v1266_v11 }
 0x1bc   :  { %v1264_v40 = vpack.c.bf16 %v1248_v48, %v1247_v5  ;;  %v7028_v60 = vpop.permute.xlu1 %5249  ;;  %v1263_v30 = vpack.c.bf16 %v1250_v18, %v1249_v59  ;;  %v5247_v54 = vunpack.i.h.bf16 %v5245_v28  ;;  %1842 = vmatpush1.bf16.msra.mxu0 %v1666_v32  ;;  %v1672_v59 = vsel %vm1353_vm8, %v1267_v25, 0 }
 0x1bd   :  { %v5252_v36 = vunpack.i.h.bf16 %v7028_v60  ;;  %v5251_v55 = vunpack.i.l.bf16 %v7028_v60  ;;  %v7035_v22 = vpop.permute.xlu0 %5254 }
 0x1be   :  { %4748 = vmatprep.subr.msk.bf16.mxu1 %vm1353_vm8, %v1264_v40  ;;  %v1660_v8 = vsel %vm1353_vm8, %v1263_v30, 0  ;;  %v5257_v51 = vunpack.i.h.bf16 %v7035_v22  ;;  %v5256_v50 = vunpack.i.l.bf16 %v7035_v22 }
 0x1bf   :  { %v1976_v44 = vsel %vm308_vm2, %v5246_v62, %v5251_v55  ;;  %v1977_v12 = vsel %vm308_vm2, %v5247_v54, %v5252_v36 }
 0x1c0   :  { %v1981_v52 = vpack.c.bf16 %v1977_v12, %v1976_v44  ;;  %4743 = vmatmul.mubr.msk.bf16.vlgmr.msra.gmra.mxu1 %vm1346_vm9, %v7010_v15  ;;  %v5260_v45 = vpop.permute.xlu1 %5259  ;;  %v1978_v20 = vsel %vm308_vm2, %v5256_v50, %v5246_v62  ;;  %v1979_v7 = vsel %vm308_vm2, %v5257_v51, %v5247_v54  ;;  %v7116_v44 = vld [vmem:[%s8393_s4 + $0x18] sm:$0xff]  }
 0x1c1   :  { %1791 = vmatpush1.bf16.msra.mxu1 %v1660_v8  ;;  %v5265_v6 = vpop.permute.xlu0 %5264  ;;  %1716 = vmatprep.mubr.bf16.mxu1 %v8568_v33  ;;  %v5262_v26 = vunpack.i.h.bf16 %v5260_v45  ;;  %v5261_v19 = vunpack.i.l.bf16 %v5260_v45  ;;  %v1980_v47 = vpack.c.bf16 %v1979_v7, %v1978_v20 }
 0x1c2   :  { %4971 = vmatprep.subr.msk.bf16.mxu1 %vm1353_vm8, %v1267_v25  ;;  %4761 = vmatprep.subr.msk.bf16.mxu0 %vm1353_vm8, %v1981_v52  ;;  %v5267_v1 = vunpack.i.h.bf16 %v5265_v6  ;;  %v5266_v57 = vunpack.i.l.bf16 %v5265_v6 }
 0x1c3   :  { %4747 = vmatmul.mubr.msk.bf16.gmra.mxu0 %vm1346_vm9, %v7053_v0  ;;  %v2008_v28 = vsel %vm1353_vm8, %v1980_v47, 0  ;;  %v1974_v62 = vsel %vm308_vm2, %v5251_v55, %v5261_v19  ;;  %v1975_v22 = vsel %vm308_vm2, %v5252_v36, %v5262_v26 }
 0x1c4   :  { %v5270_v63 = vpop.permute.xlu1 %5269  ;;  %1859 = vmatprep.mubr.bf16.mxu0 %v8568_v33  ;;  %v1973_v43 = vsel %vm308_vm2, %v5262_v26, %v5267_v1  ;;  %v1972_v42 = vsel %vm308_vm2, %v5261_v19, %v5266_v57  ;;  %v1982_v6 = vpack.c.bf16 %v1975_v22, %v1974_v62 }
 0x1c5   :  { %v5272_v14 = vunpack.i.h.bf16 %v5270_v63  ;;  %v5271_v16 = vunpack.i.l.bf16 %v5270_v63  ;;  %v7066_v29 = vpop.permute.xlu0 %5274  ;;  %v1983_v5 = vpack.c.bf16 %v1973_v43, %v1972_v42 }
 0x1c6   :  { %v5277_v31 = vunpack.i.h.bf16 %v7066_v29  ;;  %v5276_v13 = vunpack.i.l.bf16 %v7066_v29  ;;  %v2014_v7 = vsel %vm1353_vm8, %v1982_v6, 0 }
 0x1c7   :  { %v1970_v39 = vsel %vm308_vm2, %v5266_v57, %v5271_v16  ;;  %v1971_v40 = vsel %vm308_vm2, %v5267_v1, %v5272_v14 }
 0x1c8   :  { %4744 = vmatmul.mubr.msk.bf16.gmra.mxu1 %vm1346_vm9, %v7053_v0  ;;  %v1969_v11 = vsel %vm308_vm2, %v5272_v14, %v5277_v31  ;;  %v1968_v37 = vsel %vm308_vm2, %v5271_v16, %v5276_v13  ;;  %v5280_v48 = vpop.permute.xlu1 %5279  ;;  %v1984_v12 = vpack.c.bf16 %v1971_v40, %v1970_v39  ;;  %v7141_v14 = vld [vmem:[%s8393_s4 + $0x20] ss:$0 sps:$4 sm:$0xff]  }
 0x1c9   :  { %1808 = vmatprep.mubr.bf16.mxu1 %v8568_v33  ;;  %v1985_v2 = vpack.c.bf16 %v1969_v11, %v1968_v37  ;;  %v5285_v18 = vpop.permute.xlu0 %5284  ;;  %v5282_v25 = vunpack.i.h.bf16 %v5280_v48  ;;  %v5281_v52 = vunpack.i.l.bf16 %v5280_v48 }
 0x1ca   :  { %v5287_v32 = vunpack.i.h.bf16 %v5285_v18  ;;  %v5286_v30 = vunpack.i.l.bf16 %v5285_v18  ;;  %v2020_v63 = vsel %vm1353_vm8, %v1984_v12, 0 }
 0x1cb   :  { %4752 = vmatmul.mubr.msk.bf16.vlgmr.msra.gmra.mxu0 %vm1346_vm9, %v7010_v15  ;;  %v1966_v16 = vsel %vm308_vm2, %v5276_v13, %v5281_v52  ;;  %v1967_v29 = vsel %vm308_vm2, %v5277_v31, %v5282_v25 }
 0x1cc   :  { %2049 = vmatpush1.bf16.msra.mxu0 %v2008_v28  ;;  %1869 = vmatprep.mubr.bf16.mxu0 %v8568_v33  ;;  %v7099_v54 = vpop.permute.xlu1 %5289  ;;  %v1962_v55 = vsel %vm308_vm2, %v5286_v30, %v5256_v50  ;;  %v1963_v60 = vsel %vm308_vm2, %v5287_v32, %v5257_v51  ;;  %v1965_v20 = vsel %vm308_vm2, %v5282_v25, %v5287_v32 }
 0x1cd   :  { %4767 = vmatprep.subr.msk.bf16.mxu0 %vm1353_vm8, %v1985_v2  ;;  %v7109_v8 = vpop.permute.xlu0 %5294  ;;  %v1988_v36 = vpack.c.bf16 %v1963_v60, %v1962_v55  ;;  %v1964_v50 = vsel %vm308_vm2, %v5281_v52, %v5286_v30  ;;  %v5291_v1 = vunpack.i.l.bf16 %v7099_v54  ;;  %v1986_v13 = vpack.c.bf16 %v1967_v29, %v1966_v16 }
 0x1ce   :  { %v5297_v2 = vunpack.i.h.bf16 %v7109_v8  ;;  %v5296_v28 = vunpack.i.l.bf16 %v7109_v8 }
 0x1cf   :  { %v2032_v40 = vsel %vm1353_vm8, %v1988_v36, 0 }
 0x1d0   :  { %4749 = vmatmul.mubr.msk.bf16.vlgmr.msra.gmra.mxu1 %vm1346_vm9, %v7010_v15  ;;  %v7124_v45 = vpop.permute.xlu1 %5299 }
 0x1d1   :  { %4923 = vmatpush3.bf16.msra.mxu1 %v1672_v59  ;;  %1818 = vmatprep.mubr.bf16.mxu1 %v8568_v33  ;;  %v5305_v51 = vpop.permute.xlu0 %5304  ;;  %v5302_v57 = vunpack.i.h.bf16 %v7124_v45  ;;  %v5301_v31 = vunpack.i.l.bf16 %v7124_v45 }
 0x1d2   :  { %4764 = vmatprep.subr.msk.bf16.mxu1 %vm1353_vm8, %v1983_v5  ;;  %v5307_v26 = vunpack.i.h.bf16 %v5305_v51  ;;  %v5306_v19 = vunpack.i.l.bf16 %v5305_v51  ;;  %v2026_v5 = vsel %vm1353_vm8, %v1986_v13, 0 }
 0x1d3   :  { %4753 = vmatmul.mubr.msk.bf16.gmra.mxu0 %vm1346_vm9, %v7053_v0  ;;  %v2359_v48 = vsel %vm421_vm3, %v5296_v28, %v5301_v31  ;;  %v2360_v59 = vsel %vm421_vm3, %v5297_v2, %v5302_v57 }
 0x1d4   :  { %2066 = vmatprep.mubr.bf16.mxu0 %v8568_v33  ;;  %v7148_v47 = vpop.permute.xlu1 %5309  ;;  %v2363_v37 = vsel %vm421_vm3, %v5306_v19, %v5291_v1  ;;  %v2370_v18 = vpack.c.bf16 %v2360_v59, %v2359_v48 }
 0x1d5   :  { %v5315_v39 = vpop.permute.xlu0 %5314  ;;  %v5312_v32 = vunpack.i.h.bf16 %v7148_v47  ;;  %v5311_v30 = vunpack.i.l.bf16 %v7148_v47 }
 0x1d6   :  { %v5317_v55 = vunpack.i.h.bf16 %v5315_v39  ;;  %v5316_v60 = vunpack.i.l.bf16 %v5315_v39  ;;  %v8571_v39 = vld [vmem:[#allocation36_spill] sm:$0xff] }
 0x1d7   :  { %v2365_v62 = vsel %vm421_vm3, %v5311_v30, %v5306_v19  ;;  %v2366_v22 = vsel %vm421_vm3, %v5312_v32, %v5307_v26 }
 0x1d8   :  { %4750 = vmatmul.mubr.msk.bf16.gmra.mxu1 %vm1346_vm9, %v7053_v0  ;;  %v5320_v42 = vpop.permute.xlu1 %5319 }
 0x1d9   :  { %4924 = vmatprep.mubr.msk.bf16.mxu1 %vm1346_vm9, %v7010_v15  ;;  %v1987_v15 = vpack.c.bf16 %v1965_v20, %v1964_v50  ;;  %v5325_v25 = vpop.permute.xlu0 %5324  ;;  %v5322_v6 = vunpack.i.h.bf16 %v5320_v42  ;;  %v2367_v20 = vpack.c.bf16 %v2366_v22, %v2365_v62 }
 0x1da   :  { %v5327_v50 = vunpack.i.h.bf16 %v5325_v25  ;;  %v5326_v51 = vunpack.i.l.bf16 %v5325_v25 }
 0x1db   :  { %4762 = vmatmul.mubr.msk.bf16.vlgmr.msra.gmra.mxu0 %vm1346_vm9, %v7116_v44  ;;  %v2395_v29 = vsel %vm1353_vm8, %v2367_v20, 0  ;;  %v2354_v13 = vsel %vm421_vm3, %v5317_v55, %v5322_v6 }
 0x1dc   :  { %2151 = vmatpush1.bf16.msra.mxu0 %v2020_v63  ;;  %2076 = vmatprep.mubr.bf16.mxu0 %v8568_v33  ;;  %v5321_v63 = vunpack.i.l.bf16 %v5320_v42  ;;  %v2352_v19 = vsel %vm421_vm3, %v5322_v6, %v5327_v50  ;;  %v8569_v42 = vld [vmem:[#allocation37_spill] sm:$0xff]  ;;  %v2350_v59 = vsel %vm421_vm3, %v5327_v50, %v5312_v32 }
 0x1dd   :  { %4972 = vmatprep.subr.msk.bf16.mxu0 %vm1353_vm8, %v1988_v36  ;;  %v2361_v36 = vsel %vm421_vm3, %v5291_v1, %v5296_v28  ;;  %v7268_v62 = vpop.permute.xlu0 %5334 }
 0x1de   :  { %v2351_v47 = vsel %vm421_vm3, %v5321_v63, %v5326_v51  ;;  %v2353_v1 = vsel %vm421_vm3, %v5316_v60, %v5321_v63  ;;  %v5337_v9 = vunpack.i.h.bf16 %v7268_v62  ;;  %v5336_v35 = vunpack.i.l.bf16 %v7268_v62 }
 0x1df   :  { %v2746_v63 = vsel %vm1353_vm8, %v2706_v58, 0 }
 0x1e0   :  { %4925 = vmatmul.mubr.msk.bf16.vlgmr.msra.gmra.mxu1 %vm1346_vm9, %v7053_v0  ;;  %v5292_v0 = vunpack.i.h.bf16 %v7099_v54  ;;  %v5330_v54 = vpop.permute.xlu1 %5329 }
 0x1e1   :  { %2100 = vmatpush1.bf16.msra.mxu1 %v2014_v7  ;;  %2117 = vmatprep.mubr.bf16.mxu1 %v8568_v33  ;;  %v5332_v8 = vunpack.i.h.bf16 %v5330_v54  ;;  %v5331_v12 = vunpack.i.l.bf16 %v5330_v54  ;;  %v7276_v38 = vpop.permute.xlu0 %5344 }
 0x1e2   :  { %4770 = vmatprep.subr.msk.bf16.mxu1 %vm1353_vm8, %v1987_v15  ;;  %v2364_v11 = vsel %vm421_vm3, %v5307_v26, %v5292_v0  ;;  %v2362_v52 = vsel %vm421_vm3, %v5292_v0, %v5297_v2  ;;  %v2374_v0 = vpack.c.bf16 %v2352_v19, %v2351_v47 }
 0x1e3   :  { %4763 = vmatmul.mubr.msk.bf16.gmra.mxu0 %vm1346_vm9, %v7141_v14  ;;  %v2368_v43 = vpack.c.bf16 %v2364_v11, %v2363_v37  ;;  %v2355_v15 = vsel %vm421_vm3, %v5331_v12, %v5316_v60  ;;  %v2356_v7 = vsel %vm421_vm3, %v5332_v8, %v5317_v55  ;;  %v2369_v26 = vpack.c.bf16 %v2362_v52, %v2361_v36  ;;  %v5519_v11 = vld [vmem:[%s8393_s4 + $0x24] sm:$0xff]  }
 0x1e4   :  { %2168 = vmatprep.mubr.bf16.mxu0 %v8568_v33  ;;  %v2372_v16 = vpack.c.bf16 %v2356_v7, %v2355_v15  ;;  %v2373_v37 = vpack.c.bf16 %v2354_v13, %v2353_v1  ;;  %v2357_v2 = vsel %vm421_vm3, %v5301_v31, %v5331_v12  ;;  %v2358_v28 = vsel %vm421_vm3, %v5302_v57, %v5332_v8 }
 0x1e5   :  { %v2349_v31 = vsel %vm421_vm3, %v5326_v51, %v5311_v30  ;;  %v5355_v8 = vpop.permute.xlu0 %5354  ;;  %v2734_v12 = vsel %vm1353_vm8, %v2702_v49, 0  ;;  %v5347_v55 = vunpack.i.h.bf16 %v7276_v38  ;;  %v5346_v60 = vunpack.i.l.bf16 %v7276_v38 }
 0x1e6   :  { %v2375_v45 = vpack.c.bf16 %v2350_v59, %v2349_v31  ;;  %v5357_v17 = vunpack.i.h.bf16 %v5355_v8  ;;  %v5356_v25 = vunpack.i.l.bf16 %v5355_v8 }
 0x1e8   :  { %4765 = vmatmul.mubr.msk.bf16.vlgmr.msra.gmra.mxu1 %vm1346_vm9, %v7116_v44  ;;  %v2419_v54 = vsel %vm1353_vm8, %v2375_v45, 0  ;;  %v3081_v36 = vsel %vm619_vm4, %v5356_v25, %v5336_v35  ;;  %v3082_v3 = vsel %vm619_vm4, %v5357_v17, %v5337_v9 }
 0x1e9   :  { %2202 = vmatpush1.bf16.msra.mxu1 %v2026_v5  ;;  %2127 = vmatprep.mubr.bf16.mxu1 %v8568_v33  ;;  %v8570_v5 = vld [vmem:[#allocation34_spill] sm:$0xff]  ;;  %v7325_v6 = vpop.permute.xlu0 %5364 }
 0x1ea   :  { %4780 = vmatprep.subr.msk.bf16.mxu1 %vm1353_vm8, %v2368_v43  ;;  %v2413_v43 = vsel %vm1353_vm8, %v2373_v37, 0  ;;  %v2701_v48 = vpack.c.bf16 %v8570_v5, %v8569_v42 }
 0x1eb   :  { %4768 = vmatmul.mubr.msk.bf16.vlgmr.msra.gmra.mxu0 %vm1346_vm9, %v7116_v44 }
 0x1ec   :  { %4929 = vmatpush3.bf16.msra.mxu0 %v2032_v40  ;;  %2178 = vmatprep.mubr.bf16.mxu0 %v8568_v33  ;;  %v8572_v40 = vld [vmem:[#allocation33_spill] sm:$0xff] }
 0x1ed   :  { %4783 = vmatprep.subr.msk.bf16.mxu0 %vm1353_vm8, %v2370_v18  ;;  %v5520_v18 = vld [vmem:[%s8393_s4 + $0x2c] ss:$0 sps:$4 sm:$0xff]   ;;  %v2700_v32 = vpack.c.bf16 %v8572_v40, %v8571_v39 }
 0x1ef   :  { %v2728_v30 = vsel %vm1353_vm8, %v2700_v32, 0 }
 0x1f0   :  { %4766 = vmatmul.mubr.msk.bf16.gmra.mxu1 %vm1346_vm9, %v7141_v14 }
 0x1f1   :  { %2219 = vmatprep.mubr.bf16.mxu1 %v8568_v33 }
 0x1f3   :  { %4769 = vmatmul.mubr.msk.bf16.gmra.mxu0 %vm1346_vm9, %v7141_v14 }
 0x1f4   :  { %4930 = vmatprep.mubr.msk.bf16.mxu0 %vm1346_vm9, %v7116_v44 }
 0x1f8   :  { %4771 = vmatmul.mubr.msk.bf16.vlgmr.msra.gmra.mxu1 %vm1346_vm9, %v7116_v44  ;;  %v2401_v44 = vsel %vm1353_vm8, %v2369_v26, 0 }
 0x1f9   :  { %2436 = vmatpush1.bf16.msra.mxu1 %v2395_v29  ;;  %2229 = vmatprep.mubr.bf16.mxu1 %v8568_v33 }
 0x1fa   :  { %4786 = vmatprep.subr.msk.bf16.mxu1 %vm1353_vm8, %v2372_v16  ;;  %v5375_v16 = vpop.permute.xlu0 %5374 }
 0x1fb   :  { %4931 = vmatmul.mubr.msk.bf16.vlgmr.msra.gmra.mxu0 %vm1346_vm9, %v7141_v14 }
 0x1fc   :  { %2487 = vmatpush1.bf16.msra.mxu0 %v2401_v44  ;;  %2504 = vmatprep.mubr.bf16.mxu0 %v8568_v33  ;;  %v5376_v44 = vunpack.i.l.bf16 %v5375_v16 }
 0x1fd   :  { %4789 = vmatprep.subr.msk.bf16.mxu0 %vm1353_vm8, %v2374_v0  ;;  %v5377_v0 = vunpack.i.h.bf16 %v5375_v16 }
 0x200   :  { %4772 = vmatmul.mubr.msk.bf16.gmra.mxu1 %vm1346_vm9, %v7141_v14  ;;  %v2371_v14 = vpack.c.bf16 %v2358_v28, %v2357_v2 }
 0x201   :  { %2453 = vmatprep.mubr.bf16.mxu1 %v8568_v33 }
 0x202   :  { %v2407_v57 = vsel %vm1353_vm8, %v2371_v14, 0 }
 0x203   :  { %4784 = vmatmul.mubr.msk.bf16.vlgmr.msra.gmra.mxu0 %vm1346_vm9, %v5519_v11 }
 0x204   :  { %2589 = vmatpush1.bf16.msra.mxu0 %v2413_v43  ;;  %2514 = vmatprep.mubr.bf16.mxu0 %v8568_v33 }
 0x205   :  { %4799 = vmatprep.subr.msk.bf16.mxu0 %vm1353_vm8, %v2701_v48 }
 0x208   :  { %4781 = vmatmul.mubr.msk.bf16.vlgmr.msra.gmra.mxu1 %vm1346_vm9, %v5519_v11 }
 0x209   :  { %2538 = vmatpush1.bf16.msra.mxu1 %v2407_v57  ;;  %2463 = vmatprep.mubr.bf16.mxu1 %v8568_v33  ;;  %v5366_v57 = vunpack.i.l.bf16 %v7325_v6 }
 0x20a   :  { %4973 = vmatprep.subr.msk.bf16.mxu1 %vm1353_vm8, %v2375_v45  ;;  %v5367_v45 = vunpack.i.h.bf16 %v7325_v6 }
 0x20b   :  { %4785 = vmatmul.mubr.msk.bf16.gmra.mxu0 %vm1346_vm9, %v5520_v18 }
 0x20c   :  { %2606 = vmatprep.mubr.bf16.mxu0 %v8568_v33 }
 0x210   :  { %4782 = vmatmul.mubr.msk.bf16.gmra.mxu1 %vm1346_vm9, %v5520_v18 }
 0x211   :  { %2555 = vmatprep.mubr.bf16.mxu1 %v8568_v33 }
 0x213   :  { %4790 = vmatmul.mubr.msk.bf16.vlgmr.msra.gmra.mxu0 %vm1346_vm9, %v5519_v11 }
 0x214   :  { %2769 = vmatpush1.bf16.msra.mxu0 %v2728_v30  ;;  %2616 = vmatprep.mubr.bf16.mxu0 %v8568_v33 }
 0x215   :  { %4805 = vmatprep.subr.msk.bf16.mxu0 %vm1353_vm8, %v2705_v4  ;;  %v5340_v4 = vpop.permute.xlu1 %5339 }
 0x216   :  { %v5342_v49 = vunpack.i.h.bf16 %v5340_v4  ;;  %v5341_v52 = vunpack.i.l.bf16 %v5340_v4 }
 0x218   :  { %4787 = vmatmul.mubr.msk.bf16.vlgmr.msra.gmra.mxu1 %vm1346_vm9, %v5519_v11  ;;  %v3078_v20 = vsel %vm619_vm4, %v5342_v49, %v5347_v55  ;;  %v3077_v50 = vsel %vm619_vm4, %v5341_v52, %v5346_v60  ;;  %v3079_v37 = vsel %vm619_vm4, %v5336_v35, %v5341_v52  ;;  %v3080_v2 = vsel %vm619_vm4, %v5337_v9, %v5342_v49  ;;  %v7422_v9 = vld [vmem:[%s8393_s4 + $0x3c] sm:$0xff]  }
 0x219   :  { %4935 = vmatpush3.bf16.msra.mxu1 %v2419_v54  ;;  %2565 = vmatprep.mubr.bf16.mxu1 %v8568_v33  ;;  %v7305_v21 = vpop.permute.xlu1 %5349  ;;  %v3090_v51 = vpack.c.bf16 %v3078_v20, %v3077_v50  ;;  %v3089_v40 = vpack.c.bf16 %v3080_v2, %v3079_v37  ;;  %v3075_v49 = vsel %vm619_vm4, %v5346_v60, %v5376_v44 }
 0x21a   :  { %4802 = vmatprep.subr.msk.bf16.mxu1 %vm1353_vm8, %v2703_v24  ;;  %v8574_v24 = vld [vmem:[#allocation35_spill] sm:$0xff]  ;;  %v5352_v58 = vunpack.i.h.bf16 %v7305_v21  ;;  %v5351_v15 = vunpack.i.l.bf16 %v7305_v21  ;;  %v3076_v52 = vsel %vm619_vm4, %v5347_v55, %v5377_v0  ;;  %v7464_v21 = vld [vmem:[%s8393_s4 + $0x44] ss:$0 sps:$4 sm:$0xff]  }
 0x21b   :  { %4791 = vmatmul.mubr.msk.bf16.gmra.mxu0 %vm1346_vm9, %v5520_v18  ;;  %v2708_v22 = vpack.c.bf16 %v8574_v24, %v8573_v10  ;;  %v3121_v10 = vsel %vm1353_vm8, %v3089_v40, 0  ;;  %v3091_v38 = vpack.c.bf16 %v3076_v52, %v3075_v49 }
 0x21c   :  { %2786 = vmatprep.mubr.bf16.mxu0 %v8568_v33  ;;  %v3084_v19 = vsel %vm619_vm4, %v5352_v58, %v5357_v17  ;;  %v3083_v47 = vsel %vm619_vm4, %v5351_v15, %v5356_v25 }
 0x21d   :  { %v7323_v23 = vpop.permute.xlu1 %5359  ;;  %v2752_v34 = vsel %vm1353_vm8, %v2708_v22, 0  ;;  %v3087_v14 = vpack.c.bf16 %v3084_v19, %v3083_v47  ;;  %v3127_v20 = vsel %vm1353_vm8, %v3091_v38, 0  ;;  %v7552_v38 = vld [vmem:[%s8393_s4 + $0x48] sm:$0xff]  }
 0x21e   :  { %v5362_v13 = vunpack.i.h.bf16 %v7323_v23 }
 0x21f   :  { %v3115_v39 = vsel %vm1353_vm8, %v3087_v14, 0 }
 0x220   :  { %4788 = vmatmul.mubr.msk.bf16.gmra.mxu1 %vm1346_vm9, %v5520_v18  ;;  %v3074_v48 = vsel %vm619_vm4, %v5377_v0, %v5362_v13  ;;  %v3072_v24 = vsel %vm619_vm4, %v5362_v13, %v5367_v45 }
 0x221   :  { %4936 = vmatprep.mubr.msk.bf16.mxu1 %vm1346_vm9, %v5519_v11  ;;  %v7350_v7 = vpop.permute.xlu1 %5369  ;;  %v5361_v11 = vunpack.i.l.bf16 %v7323_v23 }
 0x222   :  { %v5372_v42 = vunpack.i.h.bf16 %v7350_v7  ;;  %v5371_v5 = vunpack.i.l.bf16 %v7350_v7 }
 0x223   :  { %4800 = vmatmul.mubr.msk.bf16.vlgmr.msra.gmra.mxu0 %vm1346_vm9, %v7282_v27  ;;  %v3073_v59 = vsel %vm619_vm4, %v5376_v44, %v5361_v11 }
 0x224   :  { %2871 = vmatpush1.bf16.msra.mxu0 %v2740_v46  ;;  %2796 = vmatprep.mubr.bf16.mxu0 %v8568_v33  ;;  %v3069_v30 = vsel %vm619_vm4, %v5366_v57, %v5371_v5  ;;  %v3070_v54 = vsel %vm619_vm4, %v5367_v45, %v5372_v42  ;;  %v3085_v60 = vsel %vm619_vm4, %v5371_v5, %v5351_v15 }
 0x225   :  { %4974 = vmatprep.subr.msk.bf16.mxu0 %vm1353_vm8, %v2708_v22  ;;  %v7377_v28 = vpop.permute.xlu1 %5379  ;;  %v3094_v46 = vpack.c.bf16 %v3070_v54, %v3069_v30  ;;  %v3071_v22 = vsel %vm619_vm4, %v5361_v11, %v5366_v57 }
 0x226   :  { %v3093_v35 = vpack.c.bf16 %v3072_v24, %v3071_v22  ;;  %v5382_v50 = vunpack.i.h.bf16 %v7377_v28 }
 0x228   :  { %4937 = vmatmul.mubr.msk.bf16.vlgmr.msra.gmra.mxu1 %vm1346_vm9, %v5520_v18  ;;  %v3092_v18 = vpack.c.bf16 %v3074_v48, %v3073_v59  ;;  %v3133_v55 = vsel %vm1353_vm8, %v3093_v35, 0 }
 0x229   :  { %2820 = vmatpush1.bf16.msra.mxu1 %v2734_v12  ;;  %2837 = vmatprep.mubr.bf16.mxu1 %v8568_v33  ;;  %v7403_v62 = vpop.permute.xlu1 %5389 }
 0x22a   :  { %4808 = vmatprep.subr.msk.bf16.mxu1 %vm1353_vm8, %v2707_v41  ;;  %v3088_v41 = vpack.c.bf16 %v3082_v3, %v3081_v36  ;;  %v5392_v8 = vunpack.i.h.bf16 %v7403_v62  ;;  %v5391_v12 = vunpack.i.l.bf16 %v7403_v62 }
 0x22b   :  { %4801 = vmatmul.mubr.msk.bf16.gmra.mxu0 %vm1346_vm9, %v7303_v61 }
 0x22c   :  { %2888 = vmatprep.mubr.bf16.mxu0 %v8568_v33 }
 0x22d   :  { %v7441_v23 = vpop.permute.xlu1 %5399 }
 0x22e   :  { %v5402_v11 = vunpack.i.h.bf16 %v7441_v23  ;;  %v5401_v37 = vunpack.i.l.bf16 %v7441_v23 }
 0x230   :  { %4803 = vmatmul.mubr.msk.bf16.vlgmr.msra.gmra.mxu1 %vm1346_vm9, %v7282_v27  ;;  %v7346_v53 = vpop.f32.mrf.mxu0 }
 0x231   :  { %2922 = vmatpush1.bf16.msra.mxu1 %v2746_v63  ;;  %2847 = vmatprep.mubr.bf16.mxu1 %v8568_v33 }
 0x232   :  { %4818 = vmatprep.subr.msk.bf16.mxu1 %vm1353_vm8, %v3088_v41  ;;  %v7354_v29 = vpop.f32.mrf.mxu0  ;;  %v3086_v41 = vsel %vm619_vm4, %v5372_v42, %v5352_v58 }
 0x233   :  { %4806 = vmatmul.mubr.msk.bf16.vlgmr.msra.gmra.mxu0 %vm1346_vm9, %v7282_v27  ;;  %v3095_v63 = vpack.c.bf16 %v3086_v41, %v3085_v60 }
 0x234   :  { %4941 = vmatpush3.bf16.msra.mxu0 %v2752_v34  ;;  %2898 = vmatprep.mubr.bf16.mxu0 %v8568_v33  ;;  %v7358_v26 = vpop.f32.mrf.mxu0  ;;  %v7469_v34 = vpop.permute.xlu1 %5409 }
 0x235   :  { %4821 = vmatprep.subr.msk.bf16.mxu0 %vm1353_vm8, %v3090_v51  ;;  %v5381_v51 = vunpack.i.l.bf16 %v7377_v28  ;;  %v5412_v16 = vunpack.i.h.bf16 %v7469_v34  ;;  %v5411_v19 = vunpack.i.l.bf16 %v7469_v34  ;;  %v3139_v54 = vsel %vm1353_vm8, %v3095_v63, 0 }
 0x236   :  { %v7369_v1 = vpop.f32.mrf.mxu0 }
 0x238   :  { %4804 = vmatmul.mubr.msk.bf16.gmra.mxu1 %vm1346_vm9, %v7303_v61  ;;  %v7381_v43 = vpop.f32.mrf.mxu0 }
 0x239   :  { %2939 = vmatprep.mubr.bf16.mxu1 %v8568_v33 }
 0x23a   :  { %v7391_v31 = vpop.f32.mrf.mxu0 }
 0x23b   :  { %4807 = vmatmul.mubr.msk.bf16.gmra.mxu0 %vm1346_vm9, %v7303_v61 }
 0x23c   :  { %4942 = vmatprep.mubr.msk.bf16.mxu0 %vm1346_vm9, %v7282_v27  ;;  %v1429_v32 = vpop.f32.mrf.mxu0 }
 0x23e   :  { %v1430_v4 = vpop.f32.mrf.mxu0 }
 0x240   :  { %4809 = vmatmul.mubr.msk.bf16.vlgmr.msra.gmra.mxu1 %vm1346_vm9, %v7282_v27  ;;  %v5385_v27 = vpop.permute.xlu0 %5384 }
 0x241   :  { %3156 = vmatpush1.bf16.msra.mxu1 %v3115_v39  ;;  %2949 = vmatprep.mubr.bf16.mxu1 %v8568_v33  ;;  %v5387_v17 = vunpack.i.h.bf16 %v5385_v27  ;;  %v5386_v25 = vunpack.i.l.bf16 %v5385_v27 }
 0x242   :  { %4824 = vmatprep.subr.msk.bf16.mxu1 %vm1353_vm8, %v3092_v18 }
 0x243   :  { %4943 = vmatmul.mubr.msk.bf16.vlgmr.msra.gmra.mxu0 %vm1346_vm9, %v7303_v61  ;;  %v3469_v36 = vsel %vm732_vm5, %v5387_v17, %v5392_v8  ;;  %v3471_v15 = vsel %vm732_vm5, %v5382_v50, %v5387_v17  ;;  %v3470_v7 = vsel %vm732_vm5, %v5381_v51, %v5386_v25 }
 0x244   :  { %3207 = vmatpush1.bf16.msra.mxu0 %v3121_v10  ;;  %3224 = vmatprep.mubr.bf16.mxu0 %v8568_v33  ;;  %v7455_v6 = vpop.permute.xlu0 %5394  ;;  %v3474_v13 = vpack.c.bf16 %v3471_v15, %v3470_v7 }
 0x245   :  { %4827 = vmatprep.subr.msk.bf16.mxu0 %vm1353_vm8, %v3094_v46  ;;  %v5397_v5 = vunpack.i.h.bf16 %v7455_v6  ;;  %v5396_v48 = vunpack.i.l.bf16 %v7455_v6  ;;  %v5420_v46 = vpop.permute.xlu1 %5419 }
 0x246   :  { %v3502_v18 = vsel %vm1353_vm8, %v3474_v13, 0  ;;  %v5422_v49 = vunpack.i.h.bf16 %v5420_v46  ;;  %v5421_v52 = vunpack.i.l.bf16 %v5420_v46 }
 0x247   :  { %v3464_v39 = vsel %vm732_vm5, %v5396_v48, %v5401_v37  ;;  %v3465_v40 = vsel %vm732_vm5, %v5397_v5, %v5402_v11  ;;  %v3467_v60 = vsel %vm732_vm5, %v5392_v8, %v5397_v5  ;;  %v3466_v41 = vsel %vm732_vm5, %v5391_v12, %v5396_v48 }
 0x248   :  { %4810 = vmatmul.mubr.msk.bf16.gmra.mxu1 %vm1346_vm9, %v7303_v61  ;;  %v3468_v61 = vsel %vm732_vm5, %v5386_v25, %v5391_v12  ;;  %v5405_v58 = vpop.permute.xlu0 %5404  ;;  %v3477_v30 = vpack.c.bf16 %v3465_v40, %v3464_v39  ;;  %v3472_v6 = vsel %vm732_vm5, %v5421_v52, %v5381_v51  ;;  %v3476_v51 = vpack.c.bf16 %v3467_v60, %v3466_v41 }
 0x249   :  { %3173 = vmatprep.mubr.bf16.mxu1 %v8568_v33  ;;  %v3475_v3 = vpack.c.bf16 %v3469_v36, %v3468_v61  ;;  %v5407_v47 = vunpack.i.h.bf16 %v5405_v58  ;;  %v5406_v0 = vunpack.i.l.bf16 %v5405_v58  ;;  %v7576_v12 = vpop.permute.xlu1 %5429 }
 0x24b   :  { %4822 = vmatmul.mubr.msk.bf16.vlgmr.msra.gmra.mxu0 %vm1346_vm9, %v7422_v9  ;;  %v3460_v2 = vsel %vm732_vm5, %v5406_v0, %v5411_v19  ;;  %v3461_v14 = vsel %vm732_vm5, %v5407_v47, %v5412_v16  ;;  %v3463_v25 = vsel %vm732_vm5, %v5402_v11, %v5407_v47  ;;  %v3462_v35 = vsel %vm732_vm5, %v5401_v37, %v5406_v0 }
 0x24c   :  { %3309 = vmatpush1.bf16.msra.mxu0 %v3133_v55  ;;  %3234 = vmatprep.mubr.bf16.mxu0 %v8568_v33  ;;  %v7504_v59 = vpop.permute.xlu0 %5414  ;;  %v3479_v57 = vpack.c.bf16 %v3461_v14, %v3460_v2  ;;  %v3478_v55 = vpack.c.bf16 %v3463_v25, %v3462_v35  ;;  %v3508_v11 = vsel %vm1353_vm8, %v3476_v51, 0  ;;  %v7599_v2 = vld [vmem:[%s8393_s4 + $0x50] ss:$0 sps:$4 sm:$0xff]  }
 0x24d   :  { %4837 = vmatprep.subr.msk.bf16.mxu0 %vm1353_vm8, %v3475_v3  ;;  %v5417_v62 = vunpack.i.h.bf16 %v7504_v59  ;;  %v5416_v8 = vunpack.i.l.bf16 %v7504_v59  ;;  %v7609_v48 = vpop.permute.xlu1 %5439 }
 0x24e   :  { %v3514_v28 = vsel %vm1353_vm8, %v3478_v55, 0  ;;  %v8463_v51 = vunpack.i.h.bf16 %v7609_v48 }
 0x24f   :  { %v3459_v14 = vsel %vm732_vm5, %v5412_v16, %v5417_v62  ;;  %v3458_v5 = vsel %vm732_vm5, %v5411_v19, %v5416_v8  ;;  %v5431_v19 = vunpack.i.l.bf16 %v7576_v12 }
 0x250   :  { %4819 = vmatmul.mubr.msk.bf16.vlgmr.msra.gmra.mxu1 %vm1346_vm9, %v7422_v9  ;;  %v7524_v27 = vpop.permute.xlu0 %5424 }
 0x251   :  { %3258 = vmatpush1.bf16.msra.mxu1 %v3127_v20  ;;  %3183 = vmatprep.mubr.bf16.mxu1 %v8568_v33  ;;  %v5427_v16 = vunpack.i.h.bf16 %v7524_v27  ;;  %v5426_v34 = vunpack.i.l.bf16 %v7524_v27 }
 0x252   :  { %4975 = vmatprep.subr.msk.bf16.mxu1 %vm1353_vm8, %v3095_v63  ;;  %v3473_v63 = vsel %vm732_vm5, %v5422_v49, %v5382_v50  ;;  %v3457_v50 = vsel %vm732_vm5, %v5417_v62, %v5422_v49  ;;  %v7638_v49 = vpop.permute.xlu1 %5449 }
 0x253   :  { %4823 = vmatmul.mubr.msk.bf16.gmra.mxu0 %vm1346_vm9, %v7464_v21  ;;  %v3482_v58 = vpack.c.bf16 %v3473_v63, %v3472_v6 }
 0x254   :  { %3326 = vmatprep.mubr.bf16.mxu0 %v8568_v33  ;;  %v7543_v3 = vpop.permute.xlu0 %5434 }
 0x255   :  { %v5436_v46 = vunpack.i.l.bf16 %v7543_v3 }
 0x257   :  { %v7485_v44 = vpop.f32.mrf.mxu1  ;;  %v3851_v63 = vsel %vm845_vm6, %v5431_v19, %v5436_v46 }
 0x258   :  { %4820 = vmatmul.mubr.msk.bf16.gmra.mxu1 %vm1346_vm9, %v7464_v21  ;;  %v7588_v7 = vpop.permute.xlu0 %5444 }
 0x259   :  { %3275 = vmatprep.mubr.bf16.mxu1 %v8568_v33  ;;  %v7500_v42 = vpop.f32.mrf.mxu1  ;;  %v5446_v59 = vunpack.i.l.bf16 %v7588_v7 }
 0x25b   :  { %v7506_v45 = vpop.f32.mrf.mxu1  ;;  %4828 = vmatmul.mubr.msk.bf16.vlgmr.msra.gmra.mxu0 %vm1346_vm9, %v7422_v9 }
 0x25c   :  { %3543 = vmatpush1.bf16.msra.mxu0 %v3502_v18  ;;  %3336 = vmatprep.mubr.bf16.mxu0 %v8568_v33  ;;  %v5432_v18 = vunpack.i.h.bf16 %v7576_v12 }
 0x25d   :  { %v7515_v32 = vpop.f32.mrf.mxu1  ;;  %4843 = vmatprep.subr.msk.bf16.mxu0 %vm1353_vm8, %v3479_v57 }
 0x25f   :  { %v7522_v4 = vpop.f32.mrf.mxu1 }
 0x260   :  { %4825 = vmatmul.mubr.msk.bf16.vlgmr.msra.gmra.mxu1 %vm1346_vm9, %v7422_v9 }
 0x261   :  { %4947 = vmatpush3.bf16.msra.mxu1 %v3139_v54  ;;  %3285 = vmatprep.mubr.bf16.mxu1 %v8568_v33  ;;  %v7528_v10 = vpop.f32.mrf.mxu0  ;;  %v7530_v24 = vpop.f32.mrf.mxu1  ;;  %v5437_v54 = vunpack.i.h.bf16 %v7543_v3 }
 0x262   :  { %4840 = vmatprep.subr.msk.bf16.mxu1 %vm1353_vm8, %v3477_v30  ;;  %v3480_v30 = vpack.c.bf16 %v3459_v14, %v3458_v5 }
 0x263   :  { %4829 = vmatmul.mubr.msk.bf16.gmra.mxu0 %vm1346_vm9, %v7464_v21  ;;  %v7534_v22 = vpop.f32.mrf.mxu0  ;;  %v1480_v17 = vpop.f32.mrf.mxu1  ;;  %v3852_v6 = vsel %vm845_vm6, %v5432_v18, %v5437_v54 }
 0x264   :  { %3560 = vmatprep.mubr.bf16.mxu0 %v8568_v33  ;;  %v3855_v17 = vsel %vm845_vm6, %v5446_v59, %v5426_v34  ;;  %v3520_v60 = vsel %vm1353_vm8, %v3480_v30, 0  ;;  %v3864_v12 = vpack.c.bf16 %v3852_v6, %v3851_v63  ;;  %v5451_v6 = vunpack.i.l.bf16 %v7638_v49 }
 0x265   :  { %v7541_v61 = vpop.f32.mrf.mxu0  ;;  %v1481_v36 = vpop.f32.mrf.mxu1 }
 0x267   :  { %v7547_v23 = vpop.f32.mrf.mxu0 }
 0x268   :  { %4826 = vmatmul.mubr.msk.bf16.gmra.mxu1 %vm1346_vm9, %v7464_v21 }
 0x269   :  { %4948 = vmatprep.mubr.msk.bf16.mxu1 %vm1346_vm9, %v7422_v9  ;;  %v7572_v20 = vpop.f32.mrf.mxu0  ;;  %v3456_v9 = vsel %vm732_vm5, %v5416_v8, %v5421_v52  ;;  %v7640_v52 = vpop.permute.xlu0 %5454 }
 0x26a   :  { %v3481_v0 = vpack.c.bf16 %v3457_v50, %v3456_v9  ;;  %v3526_v50 = vsel %vm1353_vm8, %v3482_v58, 0 }
 0x26b   :  { %4838 = vmatmul.mubr.msk.bf16.vlgmr.msra.gmra.mxu0 %vm1346_vm9, %v7552_v38  ;;  %v7581_v15 = vpop.f32.mrf.mxu0 }
 0x26c   :  { %3645 = vmatpush1.bf16.msra.mxu0 %v3514_v28  ;;  %3570 = vmatprep.mubr.bf16.mxu0 %v8568_v33 }
 0x26d   :  { %4976 = vmatprep.subr.msk.bf16.mxu0 %vm1353_vm8, %v3482_v58  ;;  %v1531_v47 = vpop.f32.mrf.mxu0 }
 0x26e   :  { %v7666_v47 = vpop.permute.xlu1 %5459 }
 0x26f   :  { %v1532_v37 = vpop.f32.mrf.mxu0 }
 0x270   :  { %v7591_v13 = vpop.f32.mrf.mxu1  ;;  %4949 = vmatmul.mubr.msk.bf16.vlgmr.msra.gmra.mxu1 %vm1346_vm9, %v7464_v21  ;;  %v5447_v21 = vunpack.i.h.bf16 %v7588_v7  ;;  %v5441_v7 = vunpack.i.l.bf16 %v7609_v48 }
 0x271   :  { %3594 = vmatpush1.bf16.msra.mxu1 %v3508_v11  ;;  %3611 = vmatprep.mubr.bf16.mxu1 %v8568_v33  ;;  %v7623_v40 = vpop.f32.mrf.mxu0 }
 0x272   :  { %4846 = vmatprep.subr.msk.bf16.mxu1 %vm1353_vm8, %v3481_v0  ;;  %v7615_v57 = vpop.f32.mrf.mxu1  ;;  %v3856_v27 = vsel %vm845_vm6, %v5447_v21, %v5427_v16  ;;  %v7668_v0 = vpop.permute.xlu0 %5464  ;;  %v3858_v58 = vsel %vm845_vm6, %v8463_v51, %v5447_v21 }
 0x273   :  { %4839 = vmatmul.mubr.msk.bf16.gmra.mxu0 %vm1346_vm9, %v7599_v2  ;;  %v7636_v35 = vpop.f32.mrf.mxu0  ;;  %v3862_v36 = vpack.c.bf16 %v3856_v27, %v3855_v17  ;;  %v3857_v17 = vsel %vm845_vm6, %v5441_v7, %v5446_v59  ;;  %v5467_v27 = vunpack.i.h.bf16 %v7668_v0  ;;  %v7700_v63 = vpop.permute.xlu1 %5469 }
 0x274   :  { %v7621_v39 = vpop.f32.mrf.mxu1  ;;  %3662 = vmatprep.mubr.bf16.mxu0 %v8568_v33 }
 0x275   :  { %v4921_v41 = vpop.f32.mrf.mxu0 }
 0x276   :  { %v7634_v25 = vpop.f32.mrf.mxu1  ;;  %v5452_v41 = vunpack.i.h.bf16 %v7638_v49  ;;  %v3861_v49 = vpack.c.bf16 %v3858_v58, %v3857_v17 }
 0x277   :  { %v7659_v8 = vpop.f32.mrf.mxu0 }
 0x278   :  { %v7642_v55 = vpop.f32.mrf.mxu1  ;;  %4841 = vmatmul.mubr.msk.bf16.vlgmr.msra.gmra.mxu1 %vm1346_vm9, %v7552_v38 }
 0x279   :  { %3696 = vmatpush1.bf16.msra.mxu1 %v3520_v60  ;;  %3621 = vmatprep.mubr.bf16.mxu1 %v8568_v33  ;;  %v1759_v9 = vpop.f32.mrf.mxu0 }
 0x27a   :  { %4856 = vmatprep.subr.msk.bf16.mxu1 %vm1353_vm8, %v3862_v36  ;;  %v7657_v62 = vpop.f32.mrf.mxu1  ;;  %v7671_v11 = vadd.f32 %v1759_v9, %v7485_v44 }
 0x27b   :  { %4844 = vmatmul.mubr.msk.bf16.vlgmr.msra.gmra.mxu0 %vm1346_vm9, %v7552_v38  ;;  %v1761_v14 = vpop.f32.mrf.mxu0 }
 0x27c   :  { %v1582_v28 = vpop.f32.mrf.mxu1  ;;  %4953 = vmatpush3.bf16.msra.mxu0 %v3526_v50  ;;  %3672 = vmatprep.mubr.bf16.mxu0 %v8568_v33  ;;  %v7676_v5 = vadd.f32 %v1761_v14, %v7500_v42  ;;  %v5466_v42 = vunpack.i.l.bf16 %v7668_v0  ;;  %v5461_v0 = vunpack.i.l.bf16 %v7666_v47  ;;  %v5456_v14 = vunpack.i.l.bf16 %v7640_v52 }
 0x27d   :  { %4859 = vmatprep.subr.msk.bf16.mxu0 %vm1353_vm8, %v3864_v12  ;;  %v1763_v44 = vpop.f32.mrf.mxu0  ;;  %v3853_v12 = vsel %vm845_vm6, %v5426_v34, %v5431_v19  ;;  %v8464_v28 = vunpack.i.h.bf16 %v7666_v47 }
 0x27e   :  { %v1583_v37 = vpop.f32.mrf.mxu1  ;;  %v7693_v36 = vadd.f32 %v1763_v44, %v7506_v45  ;;  %v3854_v45 = vsel %vm845_vm6, %v5427_v16, %v5432_v18  ;;  %v3847_v34 = vsel %vm845_vm6, %v5466_v42, %v5451_v6  ;;  %v3843_v51 = vsel %vm845_vm6, %v5456_v14, %v5461_v0 }
 0x27f   :  { %v1765_v60 = vpop.f32.mrf.mxu0  ;;  %v5457_v37 = vunpack.i.h.bf16 %v7640_v52 }
 0x280   :  { %v7682_v30 = vpop.f32.mrf.mxu1  ;;  %4842 = vmatmul.mubr.msk.bf16.gmra.mxu1 %vm1346_vm9, %v7599_v2  ;;  %v7703_v59 = vadd.f32 %v1765_v60, %v7515_v32  ;;  %v3848_v32 = vsel %vm845_vm6, %v5467_v27, %v5452_v41 }
 0x281   :  { %3713 = vmatprep.mubr.bf16.mxu1 %v8568_v33  ;;  %v3866_v44 = vpack.c.bf16 %v3848_v32, %v3847_v34  ;;  %v3844_v52 = vsel %vm845_vm6, %v5457_v37, %v8464_v28  ;;  %v7748_v32 = vpop.permute.xlu0 %5474 }
 0x282   :  { %v7696_v21 = vpop.f32.mrf.mxu1 }
 0x283   :  { %v1769_v50 = vpop.f32.mrf.mxu0  ;;  %4845 = vmatmul.mubr.msk.bf16.gmra.mxu0 %vm1346_vm9, %v7599_v2 }
 0x284   :  { %v7710_v9 = vpop.f32.mrf.mxu1  ;;  %v7720_v19 = vadd.f32 %v1769_v50, %v7522_v4  ;;  %4954 = vmatprep.mubr.msk.bf16.mxu0 %vm1346_vm9, %v7552_v38  ;;  %v3889_v4 = vsel %vm1353_vm8, %v3861_v49, 0  ;;  %v3863_v50 = vpack.c.bf16 %v3854_v45, %v3853_v12  ;;  %v3846_v12 = vsel %vm845_vm6, %v5452_v41, %v5457_v37 }
 0x285   :  { %v1771_v18 = vpop.f32.mrf.mxu0  ;;  %v3868_v45 = vpack.c.bf16 %v3844_v52, %v3843_v51  ;;  %v5477_v37 = vunpack.i.h.bf16 %v7748_v32 }
 0x286   :  { %v7724_v16 = vpop.f32.mrf.mxu1  ;;  %v7729_v58 = vadd.f32 %v1771_v18, %v7530_v24  ;;  %v7742_v24 = vpop.permute.xlu1 %5479 }
 0x287   :  { %v1773_v60 = vpop.f32.mrf.mxu0 }
 0x288   :  { %v7731_v17 = vpop.f32.mrf.mxu1  ;;  %4847 = vmatmul.mubr.msk.bf16.vlgmr.msra.gmra.mxu1 %vm1346_vm9, %v7552_v38  ;;  %v3845_v60 = vsel %vm845_vm6, %v5451_v6, %v5456_v14  ;;  %v3850_v14 = vsel %vm845_vm6, %v5437_v54, %v5467_v27 }
 0x289   :  { %3930 = vmatpush1.bf16.msra.mxu1 %v3889_v4  ;;  %3723 = vmatprep.mubr.bf16.mxu1 %v8568_v33  ;;  %v1774_v49 = vpop.f32.mrf.mxu0  ;;  %v3895_v4 = vsel %vm1353_vm8, %v3863_v50, 0  ;;  %v5476_v50 = vunpack.i.l.bf16 %v7748_v32  ;;  %v3867_v32 = vpack.c.bf16 %v3846_v12, %v3845_v60 }
 0x28a   :  { %4862 = vmatprep.subr.msk.bf16.mxu1 %vm1353_vm8, %v3866_v44  ;;  %v7746_v38 = vpop.f32.mrf.mxu1  ;;  %v5482_v44 = vunpack.i.h.bf16 %v7742_v24  ;;  %v5481_v49 = vunpack.i.l.bf16 %v7742_v24  ;;  %v7799_v12 = vpop.permute.xlu1 %5489 }
 0x28b   :  { %v1861_v18 = vpop.f32.mrf.mxu0  ;;  %4955 = vmatmul.mubr.msk.bf16.vlgmr.msra.gmra.mxu0 %vm1346_vm9, %v7599_v2 }
 0x28c   :  { %v1722_v34 = vpop.f32.mrf.mxu1  ;;  %v7760_v28 = vadd.f32 %v1861_v18, %v7591_v13  ;;  %3981 = vmatpush1.bf16.msra.mxu0 %v3895_v4  ;;  %3998 = vmatprep.mubr.bf16.mxu0 %v8568_v33  ;;  %v3849_v13 = vsel %vm845_vm6, %v5436_v46, %v5466_v42  ;;  %v4242_v46 = vsel %vm958_vm7, %v5476_v50, %v5481_v49 }
 0x28d   :  { %4865 = vmatprep.subr.msk.bf16.mxu0 %vm1353_vm8, %v3868_v45  ;;  %v1863_v41 = vpop.f32.mrf.mxu0  ;;  %v4243_v3 = vsel %vm958_vm7, %v5477_v37, %v5482_v44 }
 0x28e   :  { %v1723_v51 = vpop.f32.mrf.mxu1  ;;  %v7767_v6 = vadd.f32 %v1863_v41, %v7615_v57  ;;  %v7782_v57 = vld [vmem:[%s8393_s4 + $0x54] sm:$0xff]   ;;  %v4249_v4 = vpack.c.bf16 %v4243_v3, %v4242_v46  ;;  %v3907_v41 = vsel %vm1353_vm8, %v3867_v32, 0 }
 0x28f   :  { %v1865_v45 = vpop.f32.mrf.mxu0  ;;  %v3865_v51 = vpack.c.bf16 %v3850_v14, %v3849_v13 }
 0x290   :  { %v1810_v52 = vpop.f32.mrf.mxu1  ;;  %4848 = vmatmul.mubr.msk.bf16.gmra.mxu1 %vm1346_vm9, %v7599_v2  ;;  %v7796_v2 = vadd.f32 %v1865_v45, %v7621_v39  ;;  %v7820_v45 = vpop.permute.xlu0 %5484 }
 0x291   :  { %v7793_v54 = vadd.f32 %v1810_v52, %v7528_v10  ;;  %3947 = vmatprep.mubr.bf16.mxu1 %v8568_v33  ;;  %v1867_v42 = vpop.f32.mrf.mxu0  ;;  %v3859_v10 = vsel %vm845_vm6, %v5461_v0, %v5441_v7  ;;  %v8576_v52 = vunpack.i.h.bf16 %v7666_v47 }
 0x292   :  { %v1812_v27 = vpop.f32.mrf.mxu1  ;;  %v7805_v18 = vadd.f32 %v1867_v42, %v7634_v25 }
 0x293   :  { %v7802_v34 = vadd.f32 %v1812_v27, %v7534_v22  ;;  %v1871_v60 = vpop.f32.mrf.mxu0  ;;  %4860 = vmatmul.mubr.msk.bf16.vlgmr.msra.gmra.mxu0 %vm1346_vm9, %v7782_v57  ;;  %v8575_v22 = vunpack.i.h.bf16 %v7609_v48  ;;  %v7845_v27 = vld [vmem:[%s8393_s4 + $0x5c] ss:$0 sps:$4 sm:$0xff]  }
 0x294   :  { %v1814_v39 = vpop.f32.mrf.mxu1  ;;  %v7826_v0 = vadd.f32 %v1871_v60, %v7642_v55  ;;  %4083 = vmatpush1.bf16.msra.mxu0 %v3907_v41  ;;  %4008 = vmatprep.mubr.bf16.mxu0 %v8568_v33  ;;  %v3901_v55 = vsel %vm1353_vm8, %v3865_v51, 0  ;;  %v1709_v60 = vadd.f32 %v7682_v30, %v7346_v53  ;;  %v1711_v30 = vadd.f32 %v7696_v21, %v7354_v29 }
 0x295   :  { %v3860_v25 = vsel %vm845_vm6, %v8576_v52, %v8575_v22  ;;  %v7823_v7 = vadd.f32 %v1814_v39, %v7541_v61  ;;  %4875 = vmatprep.subr.msk.bf16.mxu0 %vm1353_vm8, %v4249_v4  ;;  %v1873_v48 = vpop.f32.mrf.mxu0  ;;  %v5472_v61 = vunpack.i.h.bf16 %v7700_v63  ;;  %v7856_v39 = vpop.permute.xlu0 %5494 }
 0x296   :  { %v1816_v13 = vpop.f32.mrf.mxu1  ;;  %v7834_v14 = vadd.f32 %v1873_v48, %v7657_v62  ;;  %v7836_v32 = vpack.c.bf16 %v3860_v25, %v3859_v10  ;;  %v7848_v62 = vpop.permute.xlu1 %5499 }
 0x297   :  { %v7831_v47 = vadd.f32 %v1816_v13, %v7547_v23  ;;  %v1875_v3 = vpop.f32.mrf.mxu0  ;;  %v5471_v23 = vunpack.i.l.bf16 %v7700_v63  ;;  %v5501_v41 = vunpack.i.l.bf16 %v7848_v62 }
 0x298   :  { %v1820_v46 = vpop.f32.mrf.mxu1  ;;  %4857 = vmatmul.mubr.msk.bf16.vlgmr.msra.gmra.mxu1 %vm1346_vm9, %v7782_v57 }
 0x299   :  { %v7851_v42 = vadd.f32 %v1820_v46, %v7572_v20  ;;  %4032 = vmatpush1.bf16.msra.mxu1 %v3901_v55  ;;  %3957 = vmatprep.mubr.bf16.mxu1 %v8568_v33  ;;  %v1876_v4 = vpop.f32.mrf.mxu0  ;;  %v4245_v20 = vsel %vm958_vm7, %v5472_v61, %v5477_v37  ;;  %v4244_v53 = vsel %vm958_vm7, %v5471_v23, %v5476_v50  ;;  %v5496_v37 = vunpack.i.l.bf16 %v7856_v39 }
 0x29a   :  { %4977 = vmatprep.subr.msk.bf16.mxu1 %vm1353_vm8, %v7836_v32  ;;  %v1822_v10 = vpop.f32.mrf.mxu1  ;;  %v5497_v46 = vunpack.i.h.bf16 %v7856_v39  ;;  %v1713_v55 = vadd.f32 %v7710_v9, %v7358_v26  ;;  %v5492_v50 = vunpack.i.h.bf16 %v7799_v12  ;;  %v4248_v39 = vpack.c.bf16 %v4245_v20, %v4244_v53 }
 0x29b   :  { %v7861_v51 = vadd.f32 %v1822_v10, %v7581_v15  ;;  %v2068_v52 = vpop.f32.mrf.mxu0  ;;  %4861 = vmatmul.mubr.msk.bf16.gmra.mxu0 %vm1346_vm9, %v7845_v27  ;;  %v5502_v15 = vunpack.i.h.bf16 %v7848_v62  ;;  %v5491_v10 = vunpack.i.l.bf16 %v7799_v12  ;;  %v4234_v29 = vsel %vm958_vm7, %v5496_v37, %v5501_v41 }
 0x29c   :  { %v1824_v22 = vpop.f32.mrf.mxu1  ;;  %v7877_v25 = vadd.f32 %v2068_v52, %v1709_v60  ;;  %4100 = vmatprep.mubr.bf16.mxu0 %v8568_v33  ;;  %v1715_v9 = vadd.f32 %v7724_v16, %v7369_v1  ;;  %v5487_v20 = vunpack.i.h.bf16 %v7820_v45  ;;  %v1719_v53 = vadd.f32 %v7731_v17, %v7381_v43 }
 0x29d   :  { %v2070_v48 = vpop.f32.mrf.mxu0  ;;  %v4235_v26 = vsel %vm958_vm7, %v5497_v46, %v5502_v15  ;;  %v5486_v22 = vunpack.i.l.bf16 %v7820_v45  ;;  %v1721_v43 = vadd.f32 %v7746_v38, %v7391_v31  ;;  %v3913_v31 = vsel %vm1353_vm8, %v7836_v32, 0 }
 0x29e   :  { %v1825_v13 = vpop.f32.mrf.mxu1  ;;  %v7884_v3 = vadd.f32 %v2070_v48, %v1711_v30  ;;  %v4253_v16 = vpack.c.bf16 %v4235_v26, %v4234_v29  ;;  %v4239_v45 = vsel %vm958_vm7, %v5487_v20, %v5492_v50  ;;  %v4236_v32 = vsel %vm958_vm7, %v5491_v10, %v5496_v37 }
 0x29f   :  { %v2072_v4 = vpop.f32.mrf.mxu0 }
 0x2a0   :  { %v4926_v21 = vpop.f32.mrf.mxu1  ;;  %4858 = vmatmul.mubr.msk.bf16.gmra.mxu1 %vm1346_vm9, %v7845_v27  ;;  %v7903_v60 = vadd.f32 %v2072_v4, %v1713_v55 }
 0x2a1   :  { %v7901_v12 = vadd.f32 %v4926_v21, %v7623_v40  ;;  %4049 = vmatprep.mubr.bf16.mxu1 %v8568_v33  ;;  %v2074_v30 = vpop.f32.mrf.mxu0  ;;  %v4238_v40 = vsel %vm958_vm7, %v5486_v22, %v5491_v10  ;;  %v4276_v21 = vsel %vm1353_vm8, %v4248_v39, 0 }
 0x2a2   :  { %v1912_v52 = vpop.f32.mrf.mxu1  ;;  %v7913_v1 = vadd.f32 %v2074_v30, %v1715_v9  ;;  %v4251_v39 = vpack.c.bf16 %v4239_v45, %v4238_v40 }
 0x2a3   :  { %v7911_v13 = vadd.f32 %v1912_v52, %v7636_v35  ;;  %v2078_v55 = vpop.f32.mrf.mxu0  ;;  %4866 = vmatmul.mubr.msk.bf16.vlgmr.msra.gmra.mxu0 %vm1346_vm9, %v7782_v57  ;;  %v5510_v52 = vpop.permute.xlu1 %5509 }
 0x2a4   :  { %v4927_v48 = vpop.f32.mrf.mxu1  ;;  %v7924_v35 = vadd.f32 %v2078_v55, %v1719_v53  ;;  %4317 = vmatpush1.bf16.msra.mxu0 %v4276_v21  ;;  %4110 = vmatprep.mubr.bf16.mxu0 %v8568_v33  ;;  %v5511_v21 = vunpack.i.l.bf16 %v5510_v52 }
 0x2a5   :  { %4881 = vmatprep.subr.msk.bf16.mxu0 %vm1353_vm8, %v4253_v16  ;;  %v2080_v29 = vpop.f32.mrf.mxu0  ;;  %v4237_v16 = vsel %vm958_vm7, %v5492_v50, %v5497_v46  ;;  %v5505_v50 = vpop.permute.xlu0 %5504 }
 0x2a6   :  { %v1915_v17 = vpop.f32.mrf.mxu1  ;;  %v7931_v26 = vadd.f32 %v2080_v29, %v1721_v43 }
 0x2a7   :  { %v7929_v4 = vadd.f32 %v1915_v17, %v7659_v8  ;;  %v2082_v38 = vpop.f32.mrf.mxu0 }
 0x2a8   :  { %v2119_v9 = vpop.f32.mrf.mxu1  ;;  %4863 = vmatmul.mubr.msk.bf16.vlgmr.msra.gmra.mxu1 %vm1346_vm9, %v7782_v57 }
 0x2a9   :  { %v7938_v30 = vadd.f32 %v2119_v9, %v7671_v11  ;;  %4959 = vmatpush3.bf16.msra.mxu1 %v3913_v31  ;;  %4059 = vmatprep.mubr.bf16.mxu1 %v8568_v33  ;;  %v2083_v53 = vpop.f32.mrf.mxu0  ;;  %v5512_v11 = vunpack.i.h.bf16 %v5510_v52  ;;  %v5507_v9 = vunpack.i.h.bf16 %v5505_v50  ;;  %v5506_v31 = vunpack.i.l.bf16 %v5505_v50 }
 0x2aa   :  { %4878 = vmatprep.subr.msk.bf16.mxu1 %vm1353_vm8, %v4251_v39  ;;  %v2121_v8 = vpop.f32.mrf.mxu1 }
 0x2ab   :  { %v7943_v40 = vadd.f32 %v2121_v8, %v7676_v5  ;;  %v2170_v55 = vpop.f32.mrf.mxu0  ;;  %4867 = vmatmul.mubr.msk.bf16.gmra.mxu0 %vm1346_vm9, %v7845_v27  ;;  %v4247_v24 = vsel %vm958_vm7, %v5512_v11, %v5472_v61  ;;  %v4231_v8 = vsel %vm958_vm7, %v5507_v9, %v5512_v11 }
 0x2ac   :  { %v2123_v48 = vpop.f32.mrf.mxu1  ;;  %v7955_v43 = vadd.f32 %v2170_v55, %v7793_v54  ;;  %4334 = vmatprep.mubr.bf16.mxu0 %v8568_v33  ;;  %v4240_v54 = vsel %vm958_vm7, %v5481_v49, %v5486_v22 }
 0x2ad   :  { %v7952_v45 = vadd.f32 %v2123_v48, %v7693_v36  ;;  %v2172_v46 = vpop.f32.mrf.mxu0  ;;  %v4241_v36 = vsel %vm958_vm7, %v5482_v44, %v5487_v20  ;;  %v4246_v44 = vsel %vm958_vm7, %v5511_v21, %v5471_v23 }
 0x2ae   :  { %v2125_v5 = vpop.f32.mrf.mxu1  ;;  %v7962_v10 = vadd.f32 %v2172_v46, %v7802_v34  ;;  %v4252_v34 = vpack.c.bf16 %v4237_v16, %v4236_v32  ;;  %v4256_v61 = vpack.c.bf16 %v4247_v24, %v4246_v44 }
 0x2af   :  { %v7959_v37 = vadd.f32 %v2125_v5, %v7703_v59  ;;  %v2174_v29 = vpop.f32.mrf.mxu0  ;;  %v7977_v59 = vld [vmem:[%s8393_s4 + $0x60] sm:$0xff]  }
 0x2b0   :  { %v2129_v17 = vpop.f32.mrf.mxu1  ;;  %4864 = vmatmul.mubr.msk.bf16.gmra.mxu1 %vm1346_vm9, %v7845_v27  ;;  %v7991_v22 = vadd.f32 %v2174_v29, %v7823_v7  ;;  %v4250_v7 = vpack.c.bf16 %v4241_v36, %v4240_v54  ;;  %v4288_v52 = vsel %vm1353_vm8, %v4252_v34, 0 }
 0x2b1   :  { %v7988_v49 = vadd.f32 %v2129_v17, %v7720_v19  ;;  %4960 = vmatprep.mubr.msk.bf16.mxu1 %vm1346_vm9, %v7782_v57  ;;  %v2176_v39 = vpop.f32.mrf.mxu0  ;;  %v4230_v57 = vsel %vm958_vm7, %v5506_v31, %v5511_v21  ;;  %v4233_v21 = vsel %vm958_vm7, %v5502_v15, %v5507_v9  ;;  %v4300_v9 = vsel %vm1353_vm8, %v4256_v61, 0 }
 0x2b2   :  { %v2131_v20 = vpop.f32.mrf.mxu1  ;;  %v7999_v63 = vadd.f32 %v2176_v39, %v7831_v47  ;;  %v4255_v32 = vpack.c.bf16 %v4231_v8, %v4230_v57  ;;  %v4282_v55 = vsel %vm1353_vm8, %v4250_v7, 0 }
 0x2b3   :  { %v7996_v23 = vadd.f32 %v2131_v20, %v7729_v58  ;;  %v2180_v19 = vpop.f32.mrf.mxu0  ;;  %4876 = vmatmul.mubr.msk.bf16.vlgmr.msra.gmra.mxu0 %vm1346_vm9, %v7977_v59 }
 0x2b4   :  { %v2133_v38 = vpop.f32.mrf.mxu1  ;;  %v8009_v58 = vadd.f32 %v2180_v19, %v7851_v42  ;;  %4419 = vmatpush1.bf16.msra.mxu0 %v4288_v52  ;;  %4344 = vmatprep.mubr.bf16.mxu0 %v8568_v33  ;;  %v8022_v42 = vld [vmem:[%s8393_s4 + $0x68] ss:$0 sps:$4 sm:$0xff]   ;;  %s5562_s4 = smov [#allocation2]  }
 0x2b5   :  { %4978 = vmatprep.subr.msk.bf16.mxu0 %vm1353_vm8, %v4256_v61  ;;  %v2182_v53 = vpop.f32.mrf.mxu0  ;;  %s4694_s13 = sshll.u32 %s5562_s4, 4  ;;  %s4695_s13 = int_to_ptr.vmem [resolvable:$true] %s4694_s13 }
 0x2b6   :  { %v2134_v47 = vpop.f32.mrf.mxu1  ;;  %v8014_v16 = vadd.f32 %v2182_v53, %v7861_v51  ;;  %v4232_v51 = vsel %vm958_vm7, %v5501_v41, %v5506_v31  ;;  %s5531_s15 = scalar_lea.vmem %s4695_s13, 1152  ;;  %p5536_p1 = scmp.lt.s32.totalorder %s4695_s13, %s4695_s13 }
 0x2b7   :  { %v2184_v11 = vpop.f32.mrf.mxu0  ;;  %v4254_v56 = vpack.c.bf16 %v4233_v21, %v4232_v51  ;;  %p5532_p0 = scmp.ne.s32.totalorder %s4695_s13, %s5531_s15  ;;  %p5537_p2 = scmp.lt.s32.totalorder %s5531_s15, %s5531_s15 }
 0x2b8   :  { %v2221_v48 = vpop.f32.mrf.mxu1  ;;  %4961 = vmatmul.mubr.msk.bf16.vlgmr.msra.gmra.mxu1 %vm1346_vm9, %v7845_v27 }
 0x2b9   :  { %v8033_v27 = vadd.f32 %v2221_v48, %v7760_v28  ;;  %4368 = vmatpush1.bf16.msra.mxu1 %v4282_v55  ;;  %4385 = vmatprep.mubr.bf16.mxu1 %v8568_v33  ;;  %v2185_v46 = vpop.f32.mrf.mxu0  ;;  %p5538_p3 = por %p5537_p2, %p5536_p1 }
 0x2ba   :  { %4884 = vmatprep.subr.msk.bf16.mxu1 %vm1353_vm8, %v4255_v32  ;;  %v2223_v5 = vpop.f32.mrf.mxu1 }
 0x2bb   :  { %v8038_v50 = vadd.f32 %v2223_v5, %v7767_v6  ;;  %v4932_v15 = vpop.f32.mrf.mxu0  ;;  %4877 = vmatmul.mubr.msk.bf16.gmra.mxu0 %vm1346_vm9, %v8022_v42  ;;  %p5539_p4 = pnand %p5538_p3, %p5532_p0 }
 0x2bc   :  { %v2225_v36 = vpop.f32.mrf.mxu1  ;;  %v8046_v28 = vadd.f32 %v4932_v15, %v7901_v12  ;;  %4436 = vmatprep.mubr.bf16.mxu0 %v8568_v33 }
 0x2bd   :  { %v8043_v62 = vadd.f32 %v2225_v36, %v7796_v2  ;;  %v2272_v54 = vpop.f32.mrf.mxu0  ;;  %v4294_v2 = vsel %vm1353_vm8, %v4254_v56, 0 }
 0x2be   :  { %v2227_v41 = vpop.f32.mrf.mxu1  ;;  %v8053_v6 = vadd.f32 %v2272_v54, %v7911_v13 }
 0x2bf   :  { %v8050_v17 = vadd.f32 %v2227_v41, %v7805_v18  ;;  %v4933_v34 = vpop.f32.mrf.mxu0 }
 0x2c0   :  { %v2231_v29 = vpop.f32.mrf.mxu1  ;;  %4879 = vmatmul.mubr.msk.bf16.vlgmr.msra.gmra.mxu1 %vm1346_vm9, %v7977_v59 }
 0x2c1   :  { %v8059_v12 = vadd.f32 %v2231_v29, %v7826_v0  ;;  %4470 = vmatpush1.bf16.msra.mxu1 %v4294_v2  ;;  %4395 = vmatprep.mubr.bf16.mxu1 %v8568_v33  ;;  %v2275_v24 = vpop.f32.mrf.mxu0 }
 0x2c2   :  { %v2233_v44 = vpop.f32.mrf.mxu1  ;;  %v8066_v13 = vadd.f32 %v2275_v24, %v7929_v4 }
 0x2c3   :  { %v8063_v18 = vadd.f32 %v2233_v44, %v7834_v14  ;;  %v2506_v39 = vpop.f32.mrf.mxu0  ;;  %4882 = vmatmul.mubr.msk.bf16.vlgmr.msra.gmra.mxu0 %vm1346_vm9, %v7977_v59 }
 0x2c4   :  { %v2235_v20 = vpop.f32.mrf.mxu1  ;;  %v8072_v0 = vadd.f32 %v2506_v39, %v7938_v30  ;;  %4965 = vmatpush3.bf16.msra.mxu0 %v4300_v9  ;;  %4446 = vmatprep.mubr.bf16.mxu0 %v8568_v33 }
 0x2c5   :  { %v2508_v38 = vpop.f32.mrf.mxu0 }
 0x2c6   :  { %v2236_v31 = vpop.f32.mrf.mxu1  ;;  %v8076_v14 = vadd.f32 %v2508_v38, %v7943_v40 }
 0x2c7   :  { %v2510_v19 = vpop.f32.mrf.mxu0 }
 0x2c8   :  { %v2455_v4 = vpop.f32.mrf.mxu1  ;;  %4880 = vmatmul.mubr.msk.bf16.gmra.mxu1 %vm1346_vm9, %v8022_v42  ;;  %v8082_v61 = vadd.f32 %v2510_v19, %v7952_v45 }
 0x2c9   :  { %v2673_v7 = vadd.f32 %v2455_v4, %v7877_v25  ;;  %4487 = vmatprep.mubr.bf16.mxu1 %v8568_v33  ;;  %v2512_v52 = vpop.f32.mrf.mxu0 }
 0x2ca   :  { %v2457_v30 = vpop.f32.mrf.mxu1  ;;  %v8087_v8 = vadd.f32 %v2512_v52, %v7959_v37 }
 0x2cb   :  { %v2674_v57 = vadd.f32 %v2457_v30, %v7884_v3  ;;  %v2516_v47 = vpop.f32.mrf.mxu0  ;;  %4883 = vmatmul.mubr.msk.bf16.gmra.mxu0 %vm1346_vm9, %v8022_v42 }
 0x2cc   :  { %v2459_v40 = vpop.f32.mrf.mxu1  ;;  %v8093_v25 = vadd.f32 %v2516_v47, %v7988_v49  ;;  %4966 = vmatprep.mubr.msk.bf16.mxu0 %vm1346_vm9, %v7977_v59 }
 0x2cd   :  { %v2682_v53 = vadd.f32 %v2459_v40, %v7903_v60  ;;  %v2518_v32 = vpop.f32.mrf.mxu0 }
 0x2ce   :  { %v2461_v45 = vpop.f32.mrf.mxu1  ;;  %v8099_v37 = vadd.f32 %v2518_v32, %v7996_v23 }
 0x2cf   :  { %v2683_v3 = vadd.f32 %v2461_v45, %v7913_v1  ;;  %v2520_v55 = vpop.f32.mrf.mxu0 }
 0x2d0   :  { %v2465_v48 = vpop.f32.mrf.mxu1  ;;  %4885 = vmatmul.mubr.msk.bf16.vlgmr.msra.gmra.mxu1 %vm1346_vm9, %v7977_v59 }
 0x2d1   :  { %v2691_v60 = vadd.f32 %v2465_v48, %v7924_v35  ;;  %4497 = vmatprep.mubr.bf16.mxu1 %v8568_v33  ;;  %v2521_v11 = vpop.f32.mrf.mxu0 }
 0x2d2   :  { %v2467_v49 = vpop.f32.mrf.mxu1 }
 0x2d3   :  { %v2692_v21 = vadd.f32 %v2467_v49, %v7931_v26  ;;  %v2608_v5 = vpop.f32.mrf.mxu0  ;;  %4967 = vmatmul.mubr.msk.bf16.vlgmr.msra.gmra.mxu0 %vm1346_vm9, %v8022_v42 }
 0x2d4   :  { %v2469_v51 = vpop.f32.mrf.mxu1  ;;  %v8109_v1 = vadd.f32 %v2608_v5, %v8033_v27 }
 0x2d5   :  { %v2610_v46 = vpop.f32.mrf.mxu0 }
 0x2d6   :  { %v2470_v23 = vpop.f32.mrf.mxu1  ;;  %v8112_v59 = vadd.f32 %v2610_v46, %v8038_v50 }
 0x2d7   :  { %v2612_v33 = vpop.f32.mrf.mxu0 }
 0x2d8   :  { %v2557_v35 = vpop.f32.mrf.mxu1  ;;  %4886 = vmatmul.mubr.msk.bf16.gmra.mxu1 %vm1346_vm9, %v8022_v42  ;;  %v8118_v36 = vadd.f32 %v2612_v33, %v8043_v62 }
 0x2d9   :  { %v2677_v26 = vadd.f32 %v2557_v35, %v7955_v43  ;;  %v2614_v56 = vpop.f32.mrf.mxu0 }
 0x2da   :  { %v2559_v15 = vpop.f32.mrf.mxu1  ;;  %v8122_v41 = vadd.f32 %v2614_v56, %v8050_v17 }
 0x2db   :  { %v2678_v27 = vadd.f32 %v2559_v15, %v7962_v10  ;;  %v2618_v50 = vpop.f32.mrf.mxu0 }
 0x2dc   :  { %v2561_v54 = vpop.f32.mrf.mxu1  ;;  %v8126_v2 = vadd.f32 %v2618_v50, %v8059_v12 }
 0x2dd   :  { %v2686_v29 = vadd.f32 %v2561_v54, %v7991_v22  ;;  %v2620_v34 = vpop.f32.mrf.mxu0 }
 0x2de   :  { %v2563_v42 = vpop.f32.mrf.mxu1  ;;  %v8130_v62 = vadd.f32 %v2620_v34, %v8063_v18 }
 0x2df   :  { %v2687_v43 = vadd.f32 %v2563_v42, %v7999_v63  ;;  %v2622_v24 = vpop.f32.mrf.mxu0 }
 0x2e0   :  { %v2567_v44 = vpop.f32.mrf.mxu1 }
 0x2e1   :  { %v2695_v10 = vadd.f32 %v2567_v44, %v8009_v58  ;;  %v2623_v20 = vpop.f32.mrf.mxu0 }
 0x2e2   :  { %v2569_v17 = vpop.f32.mrf.mxu1 }
 0x2e3   :  { %v2696_v39 = vadd.f32 %v2569_v17, %v8014_v16  ;;  %v2788_v22 = vpop.f32.mrf.mxu0 }
 0x2e4   :  { %v2571_v9 = vpop.f32.mrf.mxu1  ;;  %v8134_v31 = vadd.f32 %v2788_v22, %v2673_v7 }
 0x2e5   :  { %v2790_v38 = vpop.f32.mrf.mxu0 }
 0x2e6   :  { %v2572_v12 = vpop.f32.mrf.mxu1  ;;  %v8136_v4 = vadd.f32 %v2790_v38, %v2674_v57 }
 0x2e7   :  { %v2792_v19 = vpop.f32.mrf.mxu0 }
 0x2e8   :  { %v4938_v63 = vpop.f32.mrf.mxu1  ;;  %v8139_v30 = vadd.f32 %v2792_v19, %v2682_v53 }
 0x2e9   :  { %v2699_v18 = vadd.f32 %v4938_v63, %v8046_v28  ;;  %v2794_v58 = vpop.f32.mrf.mxu0 }
 0x2ea   :  { %v2659_v52 = vpop.f32.mrf.mxu1  ;;  %v8142_v47 = vadd.f32 %v2794_v58, %v2683_v3 }
 0x2eb   :  { %v2681_v40 = vadd.f32 %v2659_v52, %v8053_v6  ;;  %v2798_v45 = vpop.f32.mrf.mxu0 }
 0x2ec   :  { %v4939_v16 = vpop.f32.mrf.mxu1  ;;  %v8144_v7 = vadd.f32 %v2798_v45, %v2691_v60 }
 0x2ed   :  { %v2800_v48 = vpop.f32.mrf.mxu0 }
 0x2ee   :  { %v2662_v32 = vpop.f32.mrf.mxu1  ;;  %v8147_v55 = vadd.f32 %v2800_v48, %v2692_v21 }
 0x2ef   :  { %v2690_v57 = vadd.f32 %v2662_v32, %v8066_v13  ;;  %v2802_v28 = vpop.f32.mrf.mxu0 }
 0x2f0   :  { %v2839_v49 = vpop.f32.mrf.mxu1 }
 0x2f1   :  { %v3008_v53 = vadd.f32 %v2839_v49, %v8072_v0  ;;  %v2803_v51 = vpop.f32.mrf.mxu0 }
 0x2f2   :  { %v2841_v11 = vpop.f32.mrf.mxu1 }
 0x2f3   :  { %v3009_v6 = vadd.f32 %v2841_v11, %v8076_v14  ;;  %v2890_v5 = vpop.f32.mrf.mxu0 }
 0x2f4   :  { %v2843_v3 = vpop.f32.mrf.mxu1  ;;  %v8152_v60 = vadd.f32 %v2890_v5, %v2677_v26 }
 0x2f5   :  { %v3017_v23 = vadd.f32 %v2843_v3, %v8082_v61  ;;  %v2892_v35 = vpop.f32.mrf.mxu0 }
 0x2f6   :  { %v2845_v46 = vpop.f32.mrf.mxu1  ;;  %v8155_v21 = vadd.f32 %v2892_v35, %v2678_v27 }
 0x2f7   :  { %v3018_v13 = vadd.f32 %v2845_v46, %v8087_v8  ;;  %v2894_v15 = vpop.f32.mrf.mxu0 }
 0x2f8   :  { %v2849_v33 = vpop.f32.mrf.mxu1  ;;  %v8158_v56 = vadd.f32 %v2894_v15, %v2686_v29 }
 0x2f9   :  { %v3026_v0 = vadd.f32 %v2849_v33, %v8093_v25  ;;  %v2896_v14 = vpop.f32.mrf.mxu0 }
 0x2fa   :  { %v2851_v54 = vpop.f32.mrf.mxu1  ;;  %v8161_v42 = vadd.f32 %v2896_v14, %v2687_v43 }
 0x2fb   :  { %v3027_v50 = vadd.f32 %v2851_v54, %v8099_v37  ;;  %v2900_v26 = vpop.f32.mrf.mxu0 }
 0x2fc   :  { %v2853_v61 = vpop.f32.mrf.mxu1  ;;  %v8163_v34 = vadd.f32 %v2900_v26, %v2695_v10 }
 0x2fd   :  { %v2902_v8 = vpop.f32.mrf.mxu0 }
 0x2fe   :  { %v2854_v44 = vpop.f32.mrf.mxu1  ;;  %v8165_v27 = vadd.f32 %v2902_v8, %v2696_v39 }
 0x2ff   :  { %v2904_v17 = vpop.f32.mrf.mxu0 }
 0x300   :  { %v2941_v24 = vpop.f32.mrf.mxu1 }
 0x301   :  { %v3012_v25 = vadd.f32 %v2941_v24, %v8109_v1  ;;  %v2905_v20 = vpop.f32.mrf.mxu0 }
 0x302   :  { %v2943_v29 = vpop.f32.mrf.mxu1 }
 0x303   :  { %v3013_v9 = vadd.f32 %v2943_v29, %v8112_v59  ;;  %v4944_v37 = vpop.f32.mrf.mxu0 }
 0x304   :  { %v2945_v22 = vpop.f32.mrf.mxu1  ;;  %v8170_v12 = vadd.f32 %v4944_v37, %v2699_v18 }
 0x305   :  { %v3021_v43 = vadd.f32 %v2945_v22, %v8118_v36  ;;  %v2992_v38 = vpop.f32.mrf.mxu0 }
 0x306   :  { %v2947_v10 = vpop.f32.mrf.mxu1  ;;  %v8173_v39 = vadd.f32 %v2992_v38, %v2681_v40 }
 0x307   :  { %v3022_v63 = vadd.f32 %v2947_v10, %v8122_v41  ;;  %v4945_v52 = vpop.f32.mrf.mxu0 }
 0x308   :  { %v2951_v19 = vpop.f32.mrf.mxu1 }
 0x309   :  { %v3030_v1 = vadd.f32 %v2951_v19, %v8126_v2  ;;  %v2995_v16 = vpop.f32.mrf.mxu0 }
 0x30a   :  { %v2953_v58 = vpop.f32.mrf.mxu1  ;;  %v8177_v45 = vadd.f32 %v2995_v16, %v2690_v57 }
 0x30b   :  { %v3031_v59 = vadd.f32 %v2953_v58, %v8130_v62  ;;  %v3226_v36 = vpop.f32.mrf.mxu0 }
 0x30c   :  { %v2955_v32 = vpop.f32.mrf.mxu1  ;;  %v8179_v18 = vadd.f32 %v3226_v36, %v3008_v53 }
 0x30d   :  { %v3228_v49 = vpop.f32.mrf.mxu0 }
 0x30e   :  { %v2956_v48 = vpop.f32.mrf.mxu1  ;;  %v8181_v28 = vadd.f32 %v3228_v49, %v3009_v6 }
 0x30f   :  { %v3230_v40 = vpop.f32.mrf.mxu0 }
 0x310   :  { %v3175_v41 = vpop.f32.mrf.mxu1  ;;  %v8184_v51 = vadd.f32 %v3230_v40, %v3017_v23 }
 0x311   :  { %v3393_v11 = vadd.f32 %v3175_v41, %v8134_v31  ;;  %v3232_v3 = vpop.f32.mrf.mxu0 }
 0x312   :  { %v3177_v2 = vpop.f32.mrf.mxu1  ;;  %v8187_v57 = vadd.f32 %v3232_v3, %v3018_v13 }
 0x313   :  { %v3394_v62 = vadd.f32 %v3177_v2, %v8136_v4  ;;  %v3236_v46 = vpop.f32.mrf.mxu0 }
 0x314   :  { %v3179_v5 = vpop.f32.mrf.mxu1  ;;  %v8190_v35 = vadd.f32 %v3236_v46, %v3026_v0 }
 0x315   :  { %v3402_v53 = vadd.f32 %v3179_v5, %v8139_v30  ;;  %v3238_v33 = vpop.f32.mrf.mxu0 }
 0x316   :  { %v3181_v6 = vpop.f32.mrf.mxu1  ;;  %v8193_v54 = vadd.f32 %v3238_v33, %v3027_v50 }
 0x317   :  { %v3403_v15 = vadd.f32 %v3181_v6, %v8142_v47  ;;  %v3240_v23 = vpop.f32.mrf.mxu0 }
 0x318   :  { %v3185_v31 = vpop.f32.mrf.mxu1 }
 0x319   :  { %v3411_v14 = vadd.f32 %v3185_v31, %v8144_v7  ;;  %v3241_v4 = vpop.f32.mrf.mxu0 }
 0x31a   :  { %v3187_v61 = vpop.f32.mrf.mxu1 }
 0x31b   :  { %v3412_v13 = vadd.f32 %v3187_v61, %v8147_v55  ;;  %v3328_v44 = vpop.f32.mrf.mxu0 }
 0x31c   :  { %v3189_v26 = vpop.f32.mrf.mxu1  ;;  %v8197_v8 = vadd.f32 %v3328_v44, %v3012_v25 }
 0x31d   :  { %v3330_v0 = vpop.f32.mrf.mxu0 }
 0x31e   :  { %v3190_v30 = vpop.f32.mrf.mxu1  ;;  %v8199_v24 = vadd.f32 %v3330_v0, %v3013_v9 }
 0x31f   :  { %v3332_v47 = vpop.f32.mrf.mxu0 }
 0x320   :  { %v3277_v17 = vpop.f32.mrf.mxu1  ;;  %v8202_v29 = vadd.f32 %v3332_v47, %v3021_v43 }
 0x321   :  { %v3397_v50 = vadd.f32 %v3277_v17, %v8152_v60  ;;  %v3334_v7 = vpop.f32.mrf.mxu0 }
 0x322   :  { %v3279_v20 = vpop.f32.mrf.mxu1  ;;  %v8205_v37 = vadd.f32 %v3334_v7, %v3022_v63 }
 0x323   :  { %v3398_v22 = vadd.f32 %v3279_v20, %v8155_v21  ;;  %v3338_v10 = vpop.f32.mrf.mxu0 }
 0x324   :  { %v3281_v55 = vpop.f32.mrf.mxu1  ;;  %v8208_v38 = vadd.f32 %v3338_v10, %v3030_v1 }
 0x325   :  { %v3406_v25 = vadd.f32 %v3281_v55, %v8158_v56  ;;  %v3340_v19 = vpop.f32.mrf.mxu0 }
 0x326   :  { %v3283_v9 = vpop.f32.mrf.mxu1  ;;  %v8211_v58 = vadd.f32 %v3340_v19, %v3031_v59 }
 0x327   :  { %v3407_v52 = vadd.f32 %v3283_v9, %v8161_v42  ;;  %v3342_v43 = vpop.f32.mrf.mxu0 }
 0x328   :  { %v3287_v60 = vpop.f32.mrf.mxu1 }
 0x329   :  { %v3415_v16 = vadd.f32 %v3287_v60, %v8163_v34  ;;  %v3343_v21 = vpop.f32.mrf.mxu0 }
 0x32a   :  { %v3289_v32 = vpop.f32.mrf.mxu1 }
 0x32b   :  { %v3416_v63 = vadd.f32 %v3289_v32, %v8165_v27  ;;  %v3562_v48 = vpop.f32.mrf.mxu0 }
 0x32c   :  { %v3291_v36 = vpop.f32.mrf.mxu1  ;;  %v8215_v49 = vadd.f32 %v3562_v48, %v3393_v11 }
 0x32d   :  { %v3564_v1 = vpop.f32.mrf.mxu0 }
 0x32e   :  { %v3292_v56 = vpop.f32.mrf.mxu1  ;;  %v8217_v41 = vadd.f32 %v3564_v1, %v3394_v62 }
 0x32f   :  { %v3566_v42 = vpop.f32.mrf.mxu0 }
 0x330   :  { %v4950_v40 = vpop.f32.mrf.mxu1  ;;  %v8220_v2 = vadd.f32 %v3566_v42, %v3402_v53 }
 0x331   :  { %v3419_v59 = vadd.f32 %v4950_v40, %v8170_v12  ;;  %v3568_v34 = vpop.f32.mrf.mxu0 }
 0x332   :  { %v3379_v3 = vpop.f32.mrf.mxu1  ;;  %v8223_v46 = vadd.f32 %v3568_v34, %v3403_v15 }
 0x333   :  { %v3401_v5 = vadd.f32 %v3379_v3, %v8173_v39  ;;  %v3572_v6 = vpop.f32.mrf.mxu0 }
 0x334   :  { %v4951_v27 = vpop.f32.mrf.mxu1  ;;  %v8225_v11 = vadd.f32 %v3572_v6, %v3411_v14 }
 0x335   :  { %v3574_v31 = vpop.f32.mrf.mxu0 }
 0x336   :  { %v3382_v33 = vpop.f32.mrf.mxu1  ;;  %v8228_v23 = vadd.f32 %v3574_v31, %v3412_v13 }
 0x337   :  { %v3410_v62 = vadd.f32 %v3382_v33, %v8177_v45  ;;  %v3576_v12 = vpop.f32.mrf.mxu0 }
 0x338   :  { %v3613_v61 = vpop.f32.mrf.mxu1 }
 0x339   :  { %v8231_v53 = vadd.f32 %v3613_v61, %v8179_v18  ;;  %v3577_v26 = vpop.f32.mrf.mxu0 }
 0x33a   :  { %v3615_v4 = vpop.f32.mrf.mxu1 }
 0x33b   :  { %v8234_v39 = vadd.f32 %v3615_v4, %v8181_v28  ;;  %v3664_v44 = vpop.f32.mrf.mxu0 }
 0x33c   :  { %v3617_v15 = vpop.f32.mrf.mxu1  ;;  %v8239_v30 = vadd.f32 %v3664_v44, %v3397_v50 }
 0x33d   :  { %v8237_v14 = vadd.f32 %v3617_v15, %v8184_v51  ;;  %v3666_v13 = vpop.f32.mrf.mxu0 }
 0x33e   :  { %v3619_v45 = vpop.f32.mrf.mxu1  ;;  %v8244_v17 = vadd.f32 %v3666_v13, %v3398_v22 }
 0x33f   :  { %v8242_v0 = vadd.f32 %v3619_v45, %v8187_v57  ;;  %v3668_v47 = vpop.f32.mrf.mxu0 }
 0x340   :  { %v3623_v18 = vpop.f32.mrf.mxu1  ;;  %v8249_v28 = vadd.f32 %v3668_v47, %v3406_v25 }
 0x341   :  { %v8247_v20 = vadd.f32 %v3623_v18, %v8190_v35  ;;  %v3670_v55 = vpop.f32.mrf.mxu0 }
 0x342   :  { %v3625_v7 = vpop.f32.mrf.mxu1  ;;  %v8254_v50 = vadd.f32 %v3670_v55, %v3407_v52 }
 0x343   :  { %v8252_v51 = vadd.f32 %v3625_v7, %v8193_v54  ;;  %v3674_v9 = vpop.f32.mrf.mxu0 }
 0x344   :  { %v3627_v10 = vpop.f32.mrf.mxu1  ;;  %v8256_v57 = vadd.f32 %v3674_v9, %v3415_v16 }
 0x345   :  { %v3676_v19 = vpop.f32.mrf.mxu0 }
 0x346   :  { %v3628_v22 = vpop.f32.mrf.mxu1  ;;  %v8258_v60 = vadd.f32 %v3676_v19, %v3416_v63 }
 0x347   :  { %v3678_v35 = vpop.f32.mrf.mxu0 }
 0x348   :  { %v3715_v43 = vpop.f32.mrf.mxu1 }
 0x349   :  { %v8261_v25 = vadd.f32 %v3715_v43, %v8197_v8  ;;  %v3679_v21 = vpop.f32.mrf.mxu0 }
 0x34a   :  { %v3717_v32 = vpop.f32.mrf.mxu1 }
 0x34b   :  { %v8264_v54 = vadd.f32 %v3717_v32, %v8199_v24  ;;  %v4956_v36 = vpop.f32.mrf.mxu0 }
 0x34c   :  { %v3719_v52 = vpop.f32.mrf.mxu1  ;;  %v8269_v16 = vadd.f32 %v4956_v36, %v3419_v59 }
 0x34d   :  { %v8267_v48 = vadd.f32 %v3719_v52, %v8202_v29  ;;  %v3766_v63 = vpop.f32.mrf.mxu0 }
 0x34e   :  { %v3721_v56 = vpop.f32.mrf.mxu1  ;;  %v8274_v40 = vadd.f32 %v3766_v63, %v3401_v5 }
 0x34f   :  { %v8272_v1 = vadd.f32 %v3721_v56, %v8205_v37  ;;  %v4957_v42 = vpop.f32.mrf.mxu0 }
 0x350   :  { %8577 = vst [vmem:[#allocation17_spill] sm:$0xff] %v8274_v40  ;;  %v3725_v8 = vpop.f32.mrf.mxu1 }
 0x351   :  { %v8277_v3 = vadd.f32 %v3725_v8, %v8208_v38  ;;  %v3769_v34 = vpop.f32.mrf.mxu0 }
 0x352   :  { %v3727_v24 = vpop.f32.mrf.mxu1  ;;  %v8282_v29 = vadd.f32 %v3769_v34, %v3410_v62 }
 0x353   :  { %8578 = vst [vmem:[#allocation16_spill] sm:$0xff] %v8277_v3  ;;  %v8280_v27 = vadd.f32 %v3727_v24, %v8211_v58  ;;  %v4000_v6 = vpop.f32.mrf.mxu0 }
 0x354   :  { %8580 = vst [vmem:[#allocation24_spill] sm:$0xff] %v8282_v29  ;;  %v3729_v59 = vpop.f32.mrf.mxu1  ;;  %v8299_v29 = vpop.permute.xlu0 %4586 }
 0x355   :  { %8579 = vst [vmem:[#allocation23_spill] sm:$0xff] %v8280_v27  ;;  %v4002_v31 = vpop.f32.mrf.mxu0 }
 0x356   :  { %v3730_v33 = vpop.f32.mrf.mxu1 }
 0x357   :  { %v4004_v61 = vpop.f32.mrf.mxu0 }
 0x358   :  { %v3949_v37 = vpop.f32.mrf.mxu1 }
 0x359   :  { %v4006_v12 = vpop.f32.mrf.mxu0 }
 0x35a   :  { %v3951_v5 = vpop.f32.mrf.mxu1 }
 0x35b   :  { %v4010_v26 = vpop.f32.mrf.mxu0 }
 0x35c   :  { %v3953_v4 = vpop.f32.mrf.mxu1 }
 0x35d   :  { %v4012_v38 = vpop.f32.mrf.mxu0 }
 0x35e   :  { %v3955_v15 = vpop.f32.mrf.mxu1 }
 0x35f   :  { %v4014_v45 = vpop.f32.mrf.mxu0 }
 0x360   :  { %v3959_v44 = vpop.f32.mrf.mxu1 }
 0x361   :  { %v4015_v18 = vpop.f32.mrf.mxu0 }
 0x362   :  { %v3961_v13 = vpop.f32.mrf.mxu1  ;;  %v4167_v18 = vadd.f32 %v3949_v37, %v8215_v49  ;;  %v4170_v49 = vadd.f32 %v4002_v31, %v8234_v39  ;;  %v8318_v31 = vpop.permute.xlu1 %4591 }
 0x363   :  { %v4102_v47 = vpop.f32.mrf.mxu0 }
 0x364   :  { %v3963_v58 = vpop.f32.mrf.mxu1 }
 0x365   :  { %v8284_v7 = vpop.f32.mrf.mxu0 }
 0x366   :  { %v3964_v62 = vpop.f32.mrf.mxu1 }
 0x367   :  { %v8286_v10 = vpop.f32.mrf.mxu0 }
 0x368   :  { %v4051_v55 = vpop.f32.mrf.mxu1 }
 0x369   :  { %v8288_v22 = vpop.f32.mrf.mxu0 }
 0x36a   :  { %v4053_v9 = vpop.f32.mrf.mxu1 }
 0x36b   :  { %v8290_v43 = vpop.f32.mrf.mxu0 }
 0x36c   :  { %v4055_v19 = vpop.f32.mrf.mxu1  ;;  %8581 = vst [vmem:[#allocation25_spill] sm:$0xff] %v8290_v43  ;;  %v4185_v43 = vadd.f32 %v3959_v44, %v8225_v11  ;;  %v4188_v11 = vadd.f32 %v4012_v38, %v8252_v51  ;;  %v8320_v44 = vpop.permute.xlu0 %4596 }
 0x36d   :  { %v8292_v32 = vpop.f32.mrf.mxu0  ;;  %v4180_v51 = vadd.f32 %v4055_v19, %v8249_v28 }
 0x36e   :  { %v4057_v35 = vpop.f32.mrf.mxu1  ;;  %8582 = vst [vmem:[#allocation26_spill] sm:$0xff] %v8292_v32 }
 0x36f   :  { %v4116_v52 = vpop.f32.mrf.mxu0 }
 0x370   :  { %v4061_v21 = vpop.f32.mrf.mxu1  ;;  %v4168_v52 = vadd.f32 %v3951_v5, %v8217_v41  ;;  %v4178_v41 = vadd.f32 %v4004_v61, %v8237_v14  ;;  %v4171_v14 = vadd.f32 %v4051_v55, %v8239_v30 }
 0x371   :  { %v4117_v56 = vpop.f32.mrf.mxu0 }
 0x372   :  { %v4063_v36 = vpop.f32.mrf.mxu1  ;;  %v4176_v56 = vadd.f32 %v3953_v4, %v8220_v2  ;;  %v4179_v2 = vadd.f32 %v4006_v12, %v8242_v0  ;;  %v4186_v4 = vadd.f32 %v3961_v13, %v8228_v23  ;;  %v4172_v0 = vadd.f32 %v4053_v9, %v8244_v17 }
 0x373   :  { %v4336_v8 = vpop.f32.mrf.mxu0  ;;  %v4181_v13 = vadd.f32 %v4057_v35, %v8254_v50  ;;  %v4189_v17 = vadd.f32 %v4061_v21, %v8256_v57 }
 0x374   :  { %v4065_v63 = vpop.f32.mrf.mxu1 }
 0x375   :  { %v4338_v24 = vpop.f32.mrf.mxu0  ;;  %v4177_v63 = vadd.f32 %v3955_v15, %v8223_v46  ;;  %v4187_v46 = vadd.f32 %v4010_v26, %v8247_v20  ;;  %v8315_v15 = vadd.f32 %v4102_v47, %v8261_v25 }
 0x376   :  { %v4066_v42 = vpop.f32.mrf.mxu1  ;;  %v4555_v3 = vadd.f32 %v4338_v24, %v4168_v52 }
 0x377   :  { %v4340_v59 = vpop.f32.mrf.mxu0  ;;  %v4554_v42 = vadd.f32 %v4336_v8, %v4167_v18 }
 0x378   :  { %v8294_v34 = vpop.f32.mrf.mxu1  ;;  %v4563_v37 = vadd.f32 %v4340_v59, %v4176_v56  ;;  %v4600_v20 = vadd.f32 %v8299_v29, %v4555_v3  ;;  %v4190_v3 = vadd.f32 %v4063_v36, %v8258_v60 }
 0x379   :  { %8583 = vst [vmem:[#allocation10_spill] sm:$0xff] %v8294_v34  ;;  %v4342_v45 = vpop.f32.mrf.mxu0 }
 0x37a   :  { %v8296_v33 = vpop.f32.mrf.mxu1  ;;  %v4608_v25 = vadd.f32 %v8318_v31, %v4563_v37  ;;  %v4627_v8 = vmax.f32 %v4600_v20, 0.0 }
 0x37b   :  { %8584 = vst [vmem:[#allocation9_spill] sm:$0xff] %v8296_v33  ;;  %v4346_v62 = vpop.f32.mrf.mxu0  ;;  %v4169_v33 = vadd.f32 %v4000_v6, %v8231_v53  ;;  %v4599_v53 = vadd.f32 %v8299_v29, %v4554_v42 }
 0x37c   :  { %v4963_v58 = vpop.f32.mrf.mxu1  ;;  %v4572_v5 = vadd.f32 %v4346_v62, %v4185_v43  ;;  %v4635_v59 = vmax.f32 %v4608_v25, 0.0 }
 0x37d   :  { %v4348_v27 = vpop.f32.mrf.mxu0  ;;  %v4564_v58 = vadd.f32 %v4342_v45, %v4177_v63  ;;  %v4626_v9 = vmax.f32 %v4599_v53, 0.0 }
 0x37e   :  { %v8304_v32 = vpop.f32.mrf.mxu1  ;;  %v4617_v47 = vadd.f32 %v8320_v44, %v4572_v5  ;;  %v4573_v57 = vadd.f32 %v4348_v27, %v4186_v4 }
 0x37f   :  { %v4350_v34 = vpop.f32.mrf.mxu0  ;;  %v4609_v61 = vadd.f32 %v8318_v31, %v4564_v58 }
 0x380   :  { %v4387_v40 = vpop.f32.mrf.mxu1  ;;  %v4644_v62 = vmax.f32 %v4617_v47, 0.0 }
 0x381   :  { %v4351_v6 = vpop.f32.mrf.mxu0  ;;  %v4556_v12 = vadd.f32 %v4387_v40, %v4169_v33  ;;  %v4636_v50 = vmax.f32 %v4609_v61, 0.0 }
 0x382   :  { %v4389_v39 = vpop.f32.mrf.mxu1 }
 0x383   :  { %v4557_v23 = vadd.f32 %v4389_v39, %v4170_v49  ;;  %v4438_v38 = vpop.f32.mrf.mxu0  ;;  %v4601_v35 = vadd.f32 %v8299_v29, %v4556_v12 }
 0x384   :  { %v4391_v26 = vpop.f32.mrf.mxu1  ;;  %v4558_v55 = vadd.f32 %v4438_v38, %v4171_v14  ;;  %v4618_v14 = vadd.f32 %v8320_v44, %v4573_v57 }
 0x385   :  { %v4602_v30 = vadd.f32 %v8299_v29, %v4557_v23  ;;  %v4565_v28 = vadd.f32 %v4391_v26, %v4178_v41  ;;  %v4440_v43 = vpop.f32.mrf.mxu0  ;;  %v4628_v5 = vmax.f32 %v4601_v35, 0.0 }
 0x386   :  { %v4393_v19 = vpop.f32.mrf.mxu1  ;;  %v4603_v34 = vadd.f32 %v8299_v29, %v4558_v55  ;;  %v4559_v45 = vadd.f32 %v4440_v43, %v4172_v0 }
 0x387   :  { %v4629_v24 = vmax.f32 %v4602_v30, 0.0  ;;  %v4566_v40 = vadd.f32 %v4393_v19, %v4179_v2  ;;  %v4442_v18 = vpop.f32.mrf.mxu0  ;;  %v4610_v36 = vadd.f32 %v8318_v31, %v4565_v28  ;;  %v4174_v30 = vadd.f32 %v8284_v7, %v8264_v54 }
 0x388   :  { %v4397_v33 = vpop.f32.mrf.mxu1  ;;  %v4630_v52 = vmax.f32 %v4603_v34, 0.0  ;;  %v4604_v63 = vadd.f32 %v8299_v29, %v4559_v45  ;;  %v4567_v42 = vadd.f32 %v4442_v18, %v4180_v51  ;;  %v4183_v45 = vadd.f32 %v8288_v22, %v8272_v1  ;;  %v8585_v18 = vld [vmem:[#allocation10_spill] sm:$0xff] }
 0x389   :  { %v8335_v21 = vadd.f32 %v4629_v24, %v4626_v9  ;;  %v4611_v60 = vadd.f32 %v8318_v31, %v4566_v40  ;;  %v4444_v49 = vpop.f32.mrf.mxu0  ;;  %v4574_v58 = vadd.f32 %v4397_v33, %v4187_v46  ;;  %v4637_v51 = vmax.f32 %v4610_v36, 0.0 }
 0x38a   :  { %v4399_v56 = vpop.f32.mrf.mxu1  ;;  %v4568_v2 = vadd.f32 %v4444_v49, %v4181_v13  ;;  %v4654_v53 = vadd.f32 %v4630_v52, %v4627_v8  ;;  %v4631_v39 = vmax.f32 %v4604_v63, 0.0  ;;  %v4612_v4 = vadd.f32 %v8318_v31, %v4567_v42  ;;  %v8587_v63 = vld [vmem:[#allocation9_spill] sm:$0xff] }
 0x38b   :  { %v4638_v37 = vmax.f32 %v4611_v60, 0.0  ;;  %v4575_v41 = vadd.f32 %v4399_v56, %v4188_v11  ;;  %v4448_v6 = vpop.f32.mrf.mxu0  ;;  %v4619_v26 = vadd.f32 %v8320_v44, %v4574_v58  ;;  %v4182_v40 = vadd.f32 %v8286_v10, %v8267_v48  ;;  %v8586_v56 = vld [vmem:[#allocation17_spill] sm:$0xff] }
 0x38c   :  { %v4401_v27 = vpop.f32.mrf.mxu1  ;;  %v4613_v23 = vadd.f32 %v8318_v31, %v4568_v2  ;;  %v8346_v25 = vadd.f32 %v4631_v39, %v4628_v5  ;;  %v4639_v46 = vmax.f32 %v4612_v4, 0.0  ;;  %v4576_v61 = vadd.f32 %v4448_v6, %v4189_v17  ;;  %v8588_v2 = vld [vmem:[#allocation16_spill] sm:$0xff]  ;;  %v8589_v5 = vld [vmem:[#allocation25_spill] sm:$0xff]  ;;  %v8591_v4 = vld [vmem:[#allocation26_spill] sm:$0xff] }
 0x38d   :  { %v8342_v0 = vadd.f32 %v4638_v37, %v4635_v59  ;;  %v4620_v20 = vadd.f32 %v8320_v44, %v4575_v41  ;;  %v4450_v12 = vpop.f32.mrf.mxu0  ;;  %v4646_v7 = vmax.f32 %v4619_v26, 0.0  ;;  %v4175_v42 = vadd.f32 %v8587_v63, %v8586_v56  ;;  %v8590_v27 = vld [vmem:[#allocation23_spill] sm:$0xff] }
 0x38e   :  { %v4402_v11 = vpop.f32.mrf.mxu1  ;;  %v4640_v13 = vmax.f32 %v4613_v23, 0.0  ;;  %v4577_v47 = vadd.f32 %v4450_v12, %v4190_v3  ;;  %v4657_v55 = vadd.f32 %v4639_v46, %v4636_v50  ;;  %v4621_v9 = vadd.f32 %v8320_v44, %v4576_v61  ;;  %v8592_v12 = vld [vmem:[#allocation24_spill] sm:$0xff] }
 0x38f   :  { %v4647_v38 = vmax.f32 %v4620_v20, 0.0  ;;  %v4452_v19 = vpop.f32.mrf.mxu0  ;;  %v4645_v3 = vmax.f32 %v4618_v14, 0.0  ;;  %v4191_v39 = vadd.f32 %v8589_v5, %v8588_v2  ;;  %v4192_v6 = vadd.f32 %v8591_v4, %v8590_v27 }
 0x390   :  { %v4489_v28 = vpop.f32.mrf.mxu1  ;;  %v8354_v8 = vadd.f32 %v4640_v13, %v4637_v51  ;;  %v4622_v24 = vadd.f32 %v8320_v44, %v4577_v47  ;;  %v4648_v34 = vmax.f32 %v4621_v9, 0.0  ;;  %v4184_v26 = vadd.f32 %v8304_v32, %v8592_v12 }
 0x391   :  { %v8352_v43 = vadd.f32 %v4647_v38, %v4644_v62  ;;  %v4560_v17 = vadd.f32 %v4489_v28, %v8315_v15  ;;  %v4453_v54 = vpop.f32.mrf.mxu0  ;;  %v4193_v15 = vadd.f32 %v8585_v18, %v8269_v16 }
 0x392   :  { %v4491_v59 = vpop.f32.mrf.mxu1  ;;  %v4649_v35 = vmax.f32 %v4622_v24, 0.0  ;;  %v4660_v62 = vadd.f32 %v4648_v34, %v4645_v3 }
 0x393   :  { %v4605_v50 = vadd.f32 %v8299_v29, %v4560_v17  ;;  %v4561_v33 = vadd.f32 %v4491_v59, %v4174_v30  ;;  %v4968_v60 = vpop.f32.mrf.mxu0 }
 0x394   :  { %v4493_v57 = vpop.f32.mrf.mxu1  ;;  %v4661_v48 = vadd.f32 %v4649_v35, %v4646_v7  ;;  %v4580_v37 = vadd.f32 %v4968_v60, %v4193_v15 }
 0x395   :  { %v4632_v36 = vmax.f32 %v4605_v50, 0.0  ;;  %v4606_v10 = vadd.f32 %v8299_v29, %v4561_v33  ;;  %v4569_v52 = vadd.f32 %v4493_v57, %v4182_v40  ;;  %v4540_v58 = vpop.f32.mrf.mxu0 }
 0x396   :  { %v4495_v49 = vpop.f32.mrf.mxu1  ;;  %v4625_v20 = vadd.f32 %v8320_v44, %v4580_v37  ;;  %v4562_v23 = vadd.f32 %v4540_v58, %v4175_v42 }
 0x397   :  { %v4662_v41 = vadd.f32 %v8335_v21, %v4632_v36  ;;  %v4633_v1 = vmax.f32 %v4606_v10, 0.0  ;;  %v4614_v22 = vadd.f32 %v8318_v31, %v4569_v52  ;;  %v4570_v16 = vadd.f32 %v4495_v49, %v4183_v45  ;;  %v4969_v51 = vpop.f32.mrf.mxu0 }
 0x398   :  { %v4499_v14 = vpop.f32.mrf.mxu1  ;;  %v4652_v13 = vmax.f32 %v4625_v20, 0.0  ;;  %v4607_v30 = vadd.f32 %v8299_v29, %v4562_v23 }
 0x399   :  { %v4671_v46 = vmul.f32 0.33333334, %v4662_v41  ;;  %v4663_v11 = vadd.f32 %v4654_v53, %v4633_v1  ;;  %v4641_v61 = vmax.f32 %v4614_v22, 0.0  ;;  %v4615_v21 = vadd.f32 %v8318_v31, %v4570_v16  ;;  %v4543_v9 = vpop.f32.mrf.mxu0 }
 0x39a   :  { %v4578_v38 = vadd.f32 %v4499_v14, %v4191_v39  ;;  %v4501_v47 = vpop.f32.mrf.mxu1  ;;  %v4670_v40 = vadd.f32 %v4661_v48, %v4652_v13  ;;  %v4634_v3 = vmax.f32 %v4607_v30, 0.0  ;;  %v4571_v34 = vadd.f32 %v4543_v9, %v4184_v26 }
 0x39b   :  { %4680 = vst [vmem:[#allocation2] sm:$0xff] %v4671_v46  ;;  %v4672_v28 = vmul.f32 0.33333334, %v4663_v11  ;;  %v4665_v19 = vadd.f32 %v8342_v0, %v4641_v61  ;;  %v4642_v17 = vmax.f32 %v4615_v21, 0.0  ;;  %v4579_v24 = vadd.f32 %v4501_v47, %v4192_v6 }
 0x39c   :  { %v4623_v53 = vadd.f32 %v8320_v44, %v4578_v38  ;;  %v4503_v59 = vpop.f32.mrf.mxu1  ;;  %v4679_v29 = vmul.f32 0.33333334, %v4670_v40  ;;  %v4664_v35 = vadd.f32 %v8346_v25, %v4634_v3  ;;  %v4616_v33 = vadd.f32 %v8318_v31, %v4571_v34 }
 0x39d   :  { %4681 = vst [vmem:[#allocation2 + $0x8] sm:$0xff] %v4672_v28  ;;  %v4674_v32 = vmul.f32 0.33333334, %v4665_v19  ;;  %v4666_v54 = vadd.f32 %v4657_v55, %v4642_v17  ;;  %v4624_v7 = vadd.f32 %v8320_v44, %v4579_v24 }
 0x39e   :  { %v4650_v50 = vmax.f32 %v4623_v53, 0.0  ;;  %v4504_v0 = vpop.f32.mrf.mxu1  ;;  %4688 = vst [vmem:[#allocation2 + $0x40] sm:$0xff] %v4679_v29  ;;  %v4673_v57 = vmul.f32 0.33333334, %v4664_v35  ;;  %v4643_v60 = vmax.f32 %v4616_v33, 0.0 }
 0x39f   :  { %4683 = vst [vmem:[#allocation2 + $0x18] sm:$0xff] %v4674_v32  ;;  %v4675_v45 = vmul.f32 0.33333334, %v4666_v54  ;;  %v4651_v18 = vmax.f32 %v4624_v7, 0.0 }
 0x3a0   :  { %v4668_v15 = vadd.f32 %v8352_v43, %v4650_v50  ;;  %4682 = vst [vmem:[#allocation2 + $0x10] sm:$0xff] %v4673_v57  ;;  %v4667_v55 = vadd.f32 %v8354_v8, %v4643_v60 }
 0x3a1   :  { %4684 = vst [vmem:[#allocation2 + $0x20] sm:$0xff] %v4675_v45  ;;  %v4669_v36 = vadd.f32 %v4660_v62, %v4651_v18 }
 0x3a2   :  { %v4677_v44 = vmul.f32 0.33333334, %v4668_v15  ;;  %v4676_v31 = vmul.f32 0.33333334, %v4667_v55 }
 0x3a3   :  { %v4678_v25 = vmul.f32 0.33333334, %v4669_v36 }
 0x3a4   :  { %4686 = vst [vmem:[#allocation2 + $0x30] sm:$0xff] %v4677_v44  ;;  %4685 = vst [vmem:[#allocation2 + $0x28] sm:$0xff] %v4676_v31 }
 0x3a5   :  { %4687 = vst [vmem:[#allocation2 + $0x38] sm:$0xff] %v4678_v25 }
 0x3a6   :  { %5542 = shalt.err (!%p5539_p4)
}
 0x3a7   :  { %s5563_s16 = smov 384   ;;  %s5564_s17 = smov 24  }
 0x3a8   :  { %4700 = dma.vmem_to_hbm [thread:$0]  %s4695_s13, 1152, %s8395_s6, [#allocation3], %s5563_s16, %s5563_s16, %s5564_s17  }
 0x3a9   :  { %5551 = dma.done.wait [#allocation3], 1152  }
 0x3aa   :  { %5552 = vsyncadd [#allocation3], 4294966144 }
 0x3ab   :  { %4704 = vsyncpa [#allocation3], 1 }

</bundles_post_ra>
